<compile_context>
chip_gen: v5e
topology: v5e:2x2
jax: 0.10.0
libtpu: 0.0.40
codegen_flags: <defaults>
</compile_context>

<pallas_src>
import functools

import jax
import jax.numpy as jnp
from jax.experimental import pallas as pl
from jax.experimental.pallas import tpu as pltpu


# ----------------------------------------------------------------------------
# Fused kernel: one grid step per batch; BN + final conv on the last step.
# ----------------------------------------------------------------------------
def fused_attention_mlp_kernel(
    x_ref, s_ref,
    wx_ref, bq_ref, wkv_ref, bkv_ref, wm_ref, bm_ref,
    w1b_ref, b1_ref, gamma_ref, beta_ref, w2_ref, b2_ref,
    out_ref,
    h1_ref,
    *, B, H, dh, N, M, Np, Mp, count, compute_dtype,
):
    f32 = jnp.float32
    cdt = compute_dtype
    D = H * dh
    b = pl.program_id(0)

    x_b = x_ref[...]   # [D, Np]  compute dtype
    s_b = s_ref[...]   # [D, Mp]  compute dtype

    # ---- stacked projections (better MXU row occupancy at small D) ----------
    # wx = [Wq / sqrt(dh) ; W1a] : gives scaled q and the x-part of MLP conv1.
    qx = jnp.dot(wx_ref[...], x_b, preferred_element_type=f32)          # [3D, Np]
    q = qx[:D, :] + bq_ref[...]                                         # scale folded in
    h1x = qx[D:, :]                                                     # [2D, Np]

    kv = jnp.dot(wkv_ref[...], s_b, preferred_element_type=f32) + bkv_ref[...]  # [2D, Mp]
    k = kv[:D, :]
    v = kv[D:, :]

    # Additive key-padding mask, computed in-kernel (no extra input).
    mcol = jax.lax.broadcasted_iota(jnp.int32, (1, Mp), 1)
    kmask = jnp.where(mcol < M, 0.0, -1e30).astype(f32)                 # [1, Mp]

    # ---- per-head attention; heads are contiguous dh-row slices (H is small) ----
    heads = []
    for h in range(H):                  # static unroll; only one [Np,Mp] scores live/head
        r0 = h * dh
        qh = q[r0:r0 + dh, :].astype(cdt)
        kh = k[r0:r0 + dh, :].astype(cdt)
        vh = v[r0:r0 + dh, :].astype(cdt)
        # scores[n, m] = sum_d qh[d, n] * kh[d, m]  (contract head_dim, no .T)
        scores = jax.lax.dot_general(
            qh, kh, (((0,), (0,)), ((), ())), preferred_element_type=f32) + kmask
        scores = scores - jnp.max(scores, axis=-1, keepdims=True)
        p = jnp.exp(scores)
        p = p / jnp.sum(p, axis=-1, keepdims=True)                      # exact softmax
        # oh[d, n] = sum_m vh[d, m] * p[n, m]  (contract key axis, no .T)
        oh = jax.lax.dot_general(
            vh, p.astype(cdt), (((1,), (1,)), ((), ())), preferred_element_type=f32)
        heads.append(oh)
    o_all = jnp.concatenate(heads, axis=0)                              # [D, Np] f32

    # ---- head-merge conv + first MLP conv (message part) --------------------
    msg = (jnp.dot(wm_ref[...], o_all.astype(cdt), preferred_element_type=f32)
           + bm_ref[...])                                               # [D, Np]
    h1_b = (h1x
            + jnp.dot(w1b_ref[...], msg.astype(cdt), preferred_element_type=f32)
            + b1_ref[...])                                              # [2D, Np]

    # Zero the padded query lanes so the cross-batch BatchNorm sums are exact.
    qcol = jax.lax.broadcasted_iota(jnp.int32, (1, Np), 1)
    qmask = (qcol < N).astype(f32)                                      # [1, Np]
    start = pl.multiple_of(b * Np, 128)
    h1_ref[:, pl.ds(start, Np)] = h1_b * qmask

    # ---- last grid step: cross-batch BatchNorm + ReLU + final conv ----------
    @pl.when(b == B - 1)
    def _():
        h1s = h1_ref[...]                                               # [2D, B*Np]
        inv_count = 1.0 / count
        mean = jnp.sum(h1s, axis=1, keepdims=True) * inv_count          # padded lanes are 0
        qm = (jax.lax.broadcasted_iota(jnp.int32, (1, Np), 1) < N).astype(f32)
        maskf = jnp.tile(qm, (1, B))                                    # [1, B*Np]
        centered = (h1s - mean) * maskf
        var = jnp.sum(centered * centered, axis=1, keepdims=True) * inv_count  # two-pass
        var = jnp.maximum(var, 0.0)
        a = gamma_ref[...] * jax.lax.rsqrt(var + 1e-5)                  # fold gamma * inv
        hn = jnp.maximum(a * centered + beta_ref[...], 0.0)             # BN + ReLU
        y = (jnp.dot(w2_ref[...], hn.astype(cdt), preferred_element_type=f32)
             + b2_ref[...])                                             # [D, B*Np]
        out_ref[...] = y.astype(out_ref.dtype)


# ----------------------------------------------------------------------------
# Wrapper
# ----------------------------------------------------------------------------
def attentional_propagation(x, source, params, num_heads):
    B, D, N = x.shape
    M = source.shape[2]
    H = num_heads
    assert D % H == 0
    dh = D // H

    Np = pl.cdiv(N, 128) * 128   # lane-dense padding for queries / output
    Mp = pl.cdiv(M, 128) * 128   # lane-dense padding for keys / values

    # MXU-operand dtype: bf16 only on TPU (f32 accumulation); f32 elsewhere so
    # the kernel also runs under CPU interpret mode.
    on_tpu = jax.default_backend() == "tpu"
    cdt = jnp.bfloat16 if on_tpu else jnp.float32

    # Head-contiguous channel permutation: new row r = h*dh + d  <-  old c = d*H + h
    # (PyTorch .view(B, head_dim, H, N) implies old channel c = d*H + h.)
    perm = (jnp.arange(dh)[None, :] * H + jnp.arange(H)[:, None]).reshape(-1)

    scale = 1.0 / (dh ** 0.5)
    wq = params["wq"][perm] * scale            # fold 1/sqrt(dh) into Wq / bq
    bq = (params["bq"][perm] * scale)[:, None]
    wk = params["wk"][perm]
    wv = params["wv"][perm]
    wm = params["wm"][:, perm]                 # merge consumes the permuted head layout
    w1a = params["w1"][:, :D]                  # acts on x
    w1b = params["w1"][:, D:]                  # acts on message

    wx = jnp.concatenate([wq, w1a], axis=0).astype(cdt)       # [3D, D]
    wkv = jnp.concatenate([wk, wv], axis=0).astype(cdt)       # [2D, D]
    bkv = jnp.concatenate([params["bk"][perm], params["bv"][perm]])[:, None]
    bm = params["bm"][:, None]
    b1 = params["b1"][:, None]
    gamma = params["gamma"][:, None]
    beta = params["beta"][:, None]
    w2 = params["w2"].astype(cdt)
    b2 = params["b2"][:, None]
    wm_c = wm.astype(cdt)
    w1b_c = w1b.astype(cdt)

    # Channels-first, batch folded into the lane axis, zero-padded to 128 multiples.
    def flatten_pad(a, P):
        Bb, Dd, L = a.shape
        a = jnp.pad(a, ((0, 0), (0, 0), (0, P - L)))
        return jnp.transpose(a, (1, 0, 2)).reshape(Dd, Bb * P).astype(cdt)

    x_flat = flatten_pad(x, Np)        # [D, B*Np]
    s_flat = flatten_pad(source, Mp)   # [D, B*Mp]

    kernel = functools.partial(
        fused_attention_mlp_kernel,
        B=B, H=H, dh=dh, N=N, M=M, Np=Np, Mp=Mp,
        count=float(B * N), compute_dtype=cdt)

    def pin(shape):
        return pl.BlockSpec(shape, lambda b: (0, 0))

    in_specs = [
        pl.BlockSpec((D, Np), lambda b: (0, b)),     # x tile   (per batch)
        pl.BlockSpec((D, Mp), lambda b: (0, b)),     # source tile (per batch)
        pin((3 * D, D)),                             # [Wq_scaled ; W1a]
        pin((D, 1)),                                 # bq (scaled)
        pin((2 * D, D)),                             # [Wk ; Wv]
        pin((2 * D, 1)),                             # [bk ; bv]
        pin((D, D)),                                 # Wm
        pin((D, 1)),                                 # bm
        pin((2 * D, D)),                             # W1b
        pin((2 * D, 1)),                             # b1
        pin((2 * D, 1)),                             # gamma
        pin((2 * D, 1)),                             # beta
        pin((D, 2 * D)),                             # W2
        pin((D, 1)),                                 # b2
    ]
    out_spec = pl.BlockSpec((D, B * Np), lambda b: (0, 0))  # resident; written on last step

    # Advisory cost estimate so XLA schedules the surrounding pad/transpose well.
    flops = 2 * B * (
        (3 * D) * D * Np          # stacked [Wq;W1a] @ x
        + (2 * D) * D * Mp        # stacked [Wk;Wv] @ source
        + D * Np * Mp             # scores (all heads)
        + D * Np * Mp             # attend (all heads)
        + D * D * Np              # merge
        + (2 * D) * D * Np        # W1b @ msg
        + D * (2 * D) * Np)       # W2 @ hn
    transcendentals = B * H * Np * Mp
    w_bytes = sum(int(a.size) * a.dtype.itemsize
                  for a in (wx, wkv, wm_c, w1b_c, w2, bq, bkv, bm, b1, gamma, beta, b2))
    bytes_accessed = (int(x_flat.size) * x_flat.dtype.itemsize
                      + int(s_flat.size) * s_flat.dtype.itemsize
                      + w_bytes + D * B * Np * 4)
    cost = pl.CostEstimate(flops=int(flops), transcendentals=int(transcendentals),
                           bytes_accessed=int(bytes_accessed))

    # Derive the VMEM budget from the actual working set instead of hard-coding.
    it = 2 if on_tpu else 4
    est_vmem = (
        2 * (D * Np + D * Mp) * it            # double-buffered activation tiles
        + w_bytes                             # resident weights / biases
        + 2 * D * B * Np * 4                  # h1 scratch
        + D * B * Np * 4                      # resident output block
        + (Np * Mp + 6 * D * max(Np, Mp)) * 4 # per-step f32 temporaries (scores, q/k/v, h1)
    )
    vmem_limit = int(min(100 * 1024 * 1024, max(8 * 1024 * 1024, 2 * est_vmem)))

    out_flat = pl.pallas_call(
        kernel,
        grid=(B,),
        out_shape=jax.ShapeDtypeStruct((D, B * Np), jnp.float32),
        in_specs=in_specs,
        out_specs=out_spec,
        scratch_shapes=[pltpu.VMEM((2 * D, B * Np), jnp.float32)],
        compiler_params=pltpu.CompilerParams(
            dimension_semantics=("arbitrary",),   # BN couples batches -> sequential axis
            vmem_limit_bytes=vmem_limit),
        cost_estimate=cost,
    )(x_flat, s_flat, wx, bq, wkv, bkv, wm_c, bm, w1b_c, b1, gamma, beta, w2, b2)

    # [D, B*Np] -> [B, D, N]
    out = out_flat.reshape(D, B, Np).transpose(1, 0, 2)[:, :, :N]
    return out


def init_params(key, feature_dim):
    D = feature_dim
    ks = jax.random.split(key, 10)
    scale = 0.1
    params = {
        "wq": jax.random.normal(ks[0], (D, D), jnp.float32) * scale,
        "wk": jax.random.normal(ks[1], (D, D), jnp.float32) * scale,
        "wv": jax.random.normal(ks[2], (D, D), jnp.float32) * scale,
        "wm": jax.random.normal(ks[3], (D, D), jnp.float32) * scale,
        "bq": jax.random.normal(ks[4], (D,), jnp.float32) * scale,
        "bk": jax.random.normal(ks[5], (D,), jnp.float32) * scale,
        "bv": jax.random.normal(ks[6], (D,), jnp.float32) * scale,
        "bm": jax.random.normal(ks[7], (D,), jnp.float32) * scale,
        "w1": jax.random.normal(ks[8], (2 * D, 2 * D), jnp.float32) * scale,
        "b1": jax.random.normal(ks[9], (2 * D,), jnp.float32) * scale,
        "gamma": jnp.ones((2 * D,), jnp.float32),     # BatchNorm weight init
        "beta": jnp.zeros((2 * D,), jnp.float32),     # BatchNorm bias init
        "w2": jax.random.normal(jax.random.fold_in(key, 99), (D, 2 * D), jnp.float32) * scale,
        "b2": jnp.zeros((D,), jnp.float32),           # nn.init.constant_(mlp[-1].bias, 0.0)
    }
    return params


if __name__ == "__main__":
    B, D, H, N, M = 2, 32, 4, 16, 16   # feature_dim=32, num_heads=4, head_dim=8

    key = jax.random.PRNGKey(0)
    kx, ks, kp = jax.random.split(key, 3)
    x = jax.random.normal(kx, (B, D, N), jnp.float32)
    source = jax.random.normal(ks, (B, D, M), jnp.float32)
    params = init_params(kp, D)

    fwd = jax.jit(functools.partial(attentional_propagation, num_heads=H))
    out = fwd(x, source, params)
    out = jax.block_until_ready(out)

    assert out.shape == (B, D, N)
    assert jnp.all(jnp.isfinite(out))
    print("KERNEL_OK")
</pallas_src>

<mosaic_0001>
module attributes {stable_mosaic.version = 11 : i64} {
  func.func @fused_attention_mlp_kernel(%arg0: i32, %arg1: memref<32x128xf32, #tpu.memory_space<vmem>>, %arg2: memref<32x128xf32, #tpu.memory_space<vmem>>, %arg3: memref<96x32xf32, #tpu.memory_space<vmem>>, %arg4: memref<32x1xf32, #tpu.memory_space<vmem>>, %arg5: memref<64x32xf32, #tpu.memory_space<vmem>>, %arg6: memref<64x1xf32, #tpu.memory_space<vmem>>, %arg7: memref<32x32xf32, #tpu.memory_space<vmem>>, %arg8: memref<32x1xf32, #tpu.memory_space<vmem>>, %arg9: memref<64x32xf32, #tpu.memory_space<vmem>>, %arg10: memref<64x1xf32, #tpu.memory_space<vmem>>, %arg11: memref<64x1xf32, #tpu.memory_space<vmem>>, %arg12: memref<64x1xf32, #tpu.memory_space<vmem>>, %arg13: memref<32x64xf32, #tpu.memory_space<vmem>>, %arg14: memref<32x1xf32, #tpu.memory_space<vmem>>, %arg15: memref<32x256xf32, #tpu.memory_space<vmem>>, %arg16: memref<64x256xf32, #tpu.memory_space<vmem>>) attributes {dimension_semantics = [#tpu.dimension_semantics<arbitrary>], iteration_bounds = array<i64: 2>, scalar_prefetch = 0 : i64, scratch_operands = 1 : i64, tpu.core_type = #tpu.core_type<tc>, window_params = [{transform_indices = @transform_0, window_bounds = array<i64: 32, 128>}, {transform_indices = @transform_1, window_bounds = array<i64: 32, 128>}, {pipeline_mode = #tpu.pipeline_mode<synchronous>, transform_indices = @transform_2, window_bounds = array<i64: 96, 32>}, {pipeline_mode = #tpu.pipeline_mode<synchronous>, transform_indices = @transform_3, window_bounds = array<i64: 32, 1>}, {pipeline_mode = #tpu.pipeline_mode<synchronous>, transform_indices = @transform_4, window_bounds = array<i64: 64, 32>}, {pipeline_mode = #tpu.pipeline_mode<synchronous>, transform_indices = @transform_5, window_bounds = array<i64: 64, 1>}, {pipeline_mode = #tpu.pipeline_mode<synchronous>, transform_indices = @transform_6, window_bounds = array<i64: 32, 32>}, {pipeline_mode = #tpu.pipeline_mode<synchronous>, transform_indices = @transform_7, window_bounds = array<i64: 32, 1>}, {pipeline_mode = #tpu.pipeline_mode<synchronous>, transform_indices = @transform_8, window_bounds = array<i64: 64, 32>}, {pipeline_mode = #tpu.pipeline_mode<synchronous>, transform_indices = @transform_9, window_bounds = array<i64: 64, 1>}, {pipeline_mode = #tpu.pipeline_mode<synchronous>, transform_indices = @transform_10, window_bounds = array<i64: 64, 1>}, {pipeline_mode = #tpu.pipeline_mode<synchronous>, transform_indices = @transform_11, window_bounds = array<i64: 64, 1>}, {pipeline_mode = #tpu.pipeline_mode<synchronous>, transform_indices = @transform_12, window_bounds = array<i64: 32, 64>}, {pipeline_mode = #tpu.pipeline_mode<synchronous>, transform_indices = @transform_13, window_bounds = array<i64: 32, 1>}, {pipeline_mode = #tpu.pipeline_mode<synchronous>, transform_indices = @transform_14, window_bounds = array<i64: 32, 256>}]} {
    %c0 = arith.constant 0 : index
    %c0_0 = arith.constant 0 : index
    %0 = vector.load %arg1[%c0, %c0_0] : memref<32x128xf32, #tpu.memory_space<vmem>>, vector<32x128xf32>
    %c0_1 = arith.constant 0 : index
    %c0_2 = arith.constant 0 : index
    %1 = vector.load %arg2[%c0_1, %c0_2] : memref<32x128xf32, #tpu.memory_space<vmem>>, vector<32x128xf32>
    %c0_3 = arith.constant 0 : index
    %c0_4 = arith.constant 0 : index
    %2 = vector.load %arg3[%c0_3, %c0_4] : memref<96x32xf32, #tpu.memory_space<vmem>>, vector<96x32xf32>
    %cst = arith.constant dense<0.000000e+00> : vector<96x128xf32>
    %3 = tpu.matmul %2, %0, %cst {dimension_numbers = #tpu.dot_dimension_numbers<[1], [0], [0], [1], [0, 0, 1, 1], [], []>} : vector<96x32xf32>, vector<32x128xf32>, vector<96x128xf32> -> vector<96x128xf32>
    %4 = vector.extract_strided_slice %3 {offsets = [0, 0], sizes = [32, 128], strides = [1, 1]} : vector<96x128xf32> to vector<32x128xf32>
    %c0_5 = arith.constant 0 : index
    %c0_6 = arith.constant 0 : index
    %5 = vector.load %arg4[%c0_5, %c0_6] : memref<32x1xf32, #tpu.memory_space<vmem>>, vector<32x1xf32>
    %6 = vector.broadcast %5 : vector<32x1xf32> to vector<32x128xf32>
    %7 = arith.addf %4, %6 : vector<32x128xf32>
    %8 = vector.extract_strided_slice %3 {offsets = [32, 0], sizes = [64, 128], strides = [1, 1]} : vector<96x128xf32> to vector<64x128xf32>
    %c0_7 = arith.constant 0 : index
    %c0_8 = arith.constant 0 : index
    %9 = vector.load %arg5[%c0_7, %c0_8] : memref<64x32xf32, #tpu.memory_space<vmem>>, vector<64x32xf32>
    %cst_9 = arith.constant dense<0.000000e+00> : vector<64x128xf32>
    %10 = tpu.matmul %9, %1, %cst_9 {dimension_numbers = #tpu.dot_dimension_numbers<[1], [0], [0], [1], [0, 0, 1, 1], [], []>} : vector<64x32xf32>, vector<32x128xf32>, vector<64x128xf32> -> vector<64x128xf32>
    %c0_10 = arith.constant 0 : index
    %c0_11 = arith.constant 0 : index
    %11 = vector.load %arg6[%c0_10, %c0_11] : memref<64x1xf32, #tpu.memory_space<vmem>>, vector<64x1xf32>
    %12 = vector.broadcast %11 : vector<64x1xf32> to vector<64x128xf32>
    %13 = arith.addf %10, %12 : vector<64x128xf32>
    %14 = vector.extract_strided_slice %13 {offsets = [0, 0], sizes = [32, 128], strides = [1, 1]} : vector<64x128xf32> to vector<32x128xf32>
    %15 = vector.extract_strided_slice %13 {offsets = [32, 0], sizes = [32, 128], strides = [1, 1]} : vector<64x128xf32> to vector<32x128xf32>
    %16 = tpu.iota {dimensions = array<i32: 1>} : vector<1x128xi32>
    %c16_i32 = arith.constant 16 : i32
    %17 = vector.broadcast %c16_i32 : i32 to vector<1x128xi32>
    %18 = arith.cmpi slt, %16, %17 : vector<1x128xi32>
    %cst_12 = arith.constant 0.000000e+00 : f32
    %cst_13 = arith.constant -1.000000e+30 : f32
    %19 = vector.broadcast %cst_12 : f32 to vector<1x128xf32>
    %20 = vector.broadcast %cst_13 : f32 to vector<1x128xf32>
    %21 = arith.select %18, %19, %20 : vector<1x128xi1>, vector<1x128xf32>
    %22 = vector.extract_strided_slice %7 {offsets = [0, 0], sizes = [8, 128], strides = [1, 1]} : vector<32x128xf32> to vector<8x128xf32>
    %23 = vector.extract_strided_slice %14 {offsets = [0, 0], sizes = [8, 128], strides = [1, 1]} : vector<32x128xf32> to vector<8x128xf32>
    %24 = vector.extract_strided_slice %15 {offsets = [0, 0], sizes = [8, 128], strides = [1, 1]} : vector<32x128xf32> to vector<8x128xf32>
    %cst_14 = arith.constant dense<0.000000e+00> : vector<128x128xf32>
    %25 = tpu.matmul %22, %23, %cst_14 {dimension_numbers = #tpu.dot_dimension_numbers<[0], [0], [1], [1], [0, 1, 1, 1], [], []>} : vector<8x128xf32>, vector<8x128xf32>, vector<128x128xf32> -> vector<128x128xf32>
    %26 = vector.broadcast %21 : vector<1x128xf32> to vector<128x128xf32>
    %27 = arith.addf %25, %26 : vector<128x128xf32>
    %cst_15 = arith.constant dense<0xFF800000> : vector<128xf32>
    %28 = vector.multi_reduction <maximumf>, %27, %cst_15 [1] : vector<128x128xf32> to vector<128xf32>
    %29 = vector.shape_cast %28 : vector<128xf32> to vector<128x1xf32>
    %30 = vector.broadcast %29 : vector<128x1xf32> to vector<128x128xf32>
    %31 = arith.subf %27, %30 : vector<128x128xf32>
    %32 = math.exp %31 : vector<128x128xf32>
    %cst_16 = arith.constant dense<0.000000e+00> : vector<128xf32>
    %33 = vector.multi_reduction <add>, %32, %cst_16 [1] : vector<128x128xf32> to vector<128xf32>
    %34 = vector.shape_cast %33 : vector<128xf32> to vector<128x1xf32>
    %35 = vector.broadcast %34 : vector<128x1xf32> to vector<128x128xf32>
    %36 = arith.divf %32, %35 : vector<128x128xf32>
    %cst_17 = arith.constant dense<0.000000e+00> : vector<8x128xf32>
    %37 = tpu.matmul %24, %36, %cst_17 {dimension_numbers = #tpu.dot_dimension_numbers<[1], [1], [0], [0], [0, 0, 1, 0], [], []>} : vector<8x128xf32>, vector<128x128xf32>, vector<8x128xf32> -> vector<8x128xf32>
    %38 = vector.extract_strided_slice %7 {offsets = [8, 0], sizes = [8, 128], strides = [1, 1]} : vector<32x128xf32> to vector<8x128xf32>
    %39 = vector.extract_strided_slice %14 {offsets = [8, 0], sizes = [8, 128], strides = [1, 1]} : vector<32x128xf32> to vector<8x128xf32>
    %40 = vector.extract_strided_slice %15 {offsets = [8, 0], sizes = [8, 128], strides = [1, 1]} : vector<32x128xf32> to vector<8x128xf32>
    %cst_18 = arith.constant dense<0.000000e+00> : vector<128x128xf32>
    %41 = tpu.matmul %38, %39, %cst_18 {dimension_numbers = #tpu.dot_dimension_numbers<[0], [0], [1], [1], [0, 1, 1, 1], [], []>} : vector<8x128xf32>, vector<8x128xf32>, vector<128x128xf32> -> vector<128x128xf32>
    %42 = vector.broadcast %21 : vector<1x128xf32> to vector<128x128xf32>
    %43 = arith.addf %41, %42 : vector<128x128xf32>
    %cst_19 = arith.constant dense<0xFF800000> : vector<128xf32>
    %44 = vector.multi_reduction <maximumf>, %43, %cst_19 [1] : vector<128x128xf32> to vector<128xf32>
    %45 = vector.shape_cast %44 : vector<128xf32> to vector<128x1xf32>
    %46 = vector.broadcast %45 : vector<128x1xf32> to vector<128x128xf32>
    %47 = arith.subf %43, %46 : vector<128x128xf32>
    %48 = math.exp %47 : vector<128x128xf32>
    %cst_20 = arith.constant dense<0.000000e+00> : vector<128xf32>
    %49 = vector.multi_reduction <add>, %48, %cst_20 [1] : vector<128x128xf32> to vector<128xf32>
    %50 = vector.shape_cast %49 : vector<128xf32> to vector<128x1xf32>
    %51 = vector.broadcast %50 : vector<128x1xf32> to vector<128x128xf32>
    %52 = arith.divf %48, %51 : vector<128x128xf32>
    %cst_21 = arith.constant dense<0.000000e+00> : vector<8x128xf32>
    %53 = tpu.matmul %40, %52, %cst_21 {dimension_numbers = #tpu.dot_dimension_numbers<[1], [1], [0], [0], [0, 0, 1, 0], [], []>} : vector<8x128xf32>, vector<128x128xf32>, vector<8x128xf32> -> vector<8x128xf32>
    %54 = vector.extract_strided_slice %7 {offsets = [16, 0], sizes = [8, 128], strides = [1, 1]} : vector<32x128xf32> to vector<8x128xf32>
    %55 = vector.extract_strided_slice %14 {offsets = [16, 0], sizes = [8, 128], strides = [1, 1]} : vector<32x128xf32> to vector<8x128xf32>
    %56 = vector.extract_strided_slice %15 {offsets = [16, 0], sizes = [8, 128], strides = [1, 1]} : vector<32x128xf32> to vector<8x128xf32>
    %cst_22 = arith.constant dense<0.000000e+00> : vector<128x128xf32>
    %57 = tpu.matmul %54, %55, %cst_22 {dimension_numbers = #tpu.dot_dimension_numbers<[0], [0], [1], [1], [0, 1, 1, 1], [], []>} : vector<8x128xf32>, vector<8x128xf32>, vector<128x128xf32> -> vector<128x128xf32>
    %58 = vector.broadcast %21 : vector<1x128xf32> to vector<128x128xf32>
    %59 = arith.addf %57, %58 : vector<128x128xf32>
    %cst_23 = arith.constant dense<0xFF800000> : vector<128xf32>
    %60 = vector.multi_reduction <maximumf>, %59, %cst_23 [1] : vector<128x128xf32> to vector<128xf32>
    %61 = vector.shape_cast %60 : vector<128xf32> to vector<128x1xf32>
    %62 = vector.broadcast %61 : vector<128x1xf32> to vector<128x128xf32>
    %63 = arith.subf %59, %62 : vector<128x128xf32>
    %64 = math.exp %63 : vector<128x128xf32>
    %cst_24 = arith.constant dense<0.000000e+00> : vector<128xf32>
    %65 = vector.multi_reduction <add>, %64, %cst_24 [1] : vector<128x128xf32> to vector<128xf32>
    %66 = vector.shape_cast %65 : vector<128xf32> to vector<128x1xf32>
    %67 = vector.broadcast %66 : vector<128x1xf32> to vector<128x128xf32>
    %68 = arith.divf %64, %67 : vector<128x128xf32>
    %cst_25 = arith.constant dense<0.000000e+00> : vector<8x128xf32>
    %69 = tpu.matmul %56, %68, %cst_25 {dimension_numbers = #tpu.dot_dimension_numbers<[1], [1], [0], [0], [0, 0, 1, 0], [], []>} : vector<8x128xf32>, vector<128x128xf32>, vector<8x128xf32> -> vector<8x128xf32>
    %70 = vector.extract_strided_slice %7 {offsets = [24, 0], sizes = [8, 128], strides = [1, 1]} : vector<32x128xf32> to vector<8x128xf32>
    %71 = vector.extract_strided_slice %14 {offsets = [24, 0], sizes = [8, 128], strides = [1, 1]} : vector<32x128xf32> to vector<8x128xf32>
    %72 = vector.extract_strided_slice %15 {offsets = [24, 0], sizes = [8, 128], strides = [1, 1]} : vector<32x128xf32> to vector<8x128xf32>
    %cst_26 = arith.constant dense<0.000000e+00> : vector<128x128xf32>
    %73 = tpu.matmul %70, %71, %cst_26 {dimension_numbers = #tpu.dot_dimension_numbers<[0], [0], [1], [1], [0, 1, 1, 1], [], []>} : vector<8x128xf32>, vector<8x128xf32>, vector<128x128xf32> -> vector<128x128xf32>
    %74 = vector.broadcast %21 : vector<1x128xf32> to vector<128x128xf32>
    %75 = arith.addf %73, %74 : vector<128x128xf32>
    %cst_27 = arith.constant dense<0xFF800000> : vector<128xf32>
    %76 = vector.multi_reduction <maximumf>, %75, %cst_27 [1] : vector<128x128xf32> to vector<128xf32>
    %77 = vector.shape_cast %76 : vector<128xf32> to vector<128x1xf32>
    %78 = vector.broadcast %77 : vector<128x1xf32> to vector<128x128xf32>
    %79 = arith.subf %75, %78 : vector<128x128xf32>
    %80 = math.exp %79 : vector<128x128xf32>
    %cst_28 = arith.constant dense<0.000000e+00> : vector<128xf32>
    %81 = vector.multi_reduction <add>, %80, %cst_28 [1] : vector<128x128xf32> to vector<128xf32>
    %82 = vector.shape_cast %81 : vector<128xf32> to vector<128x1xf32>
    %83 = vector.broadcast %82 : vector<128x1xf32> to vector<128x128xf32>
    %84 = arith.divf %80, %83 : vector<128x128xf32>
    %cst_29 = arith.constant dense<0.000000e+00> : vector<8x128xf32>
    %85 = tpu.matmul %72, %84, %cst_29 {dimension_numbers = #tpu.dot_dimension_numbers<[1], [1], [0], [0], [0, 0, 1, 0], [], []>} : vector<8x128xf32>, vector<128x128xf32>, vector<8x128xf32> -> vector<8x128xf32>
    %86 = tpu.concatenate %37, %53, %69, %85 in 0 : vector<8x128xf32>, vector<8x128xf32>, vector<8x128xf32>, vector<8x128xf32> -> vector<32x128xf32>
    %c0_30 = arith.constant 0 : index
    %c0_31 = arith.constant 0 : index
    %87 = vector.load %arg7[%c0_30, %c0_31] : memref<32x32xf32, #tpu.memory_space<vmem>>, vector<32x32xf32>
    %cst_32 = arith.constant dense<0.000000e+00> : vector<32x128xf32>
    %88 = tpu.matmul %87, %86, %cst_32 {dimension_numbers = #tpu.dot_dimension_numbers<[1], [0], [0], [1], [0, 0, 1, 1], [], []>} : vector<32x32xf32>, vector<32x128xf32>, vector<32x128xf32> -> vector<32x128xf32>
    %c0_33 = arith.constant 0 : index
    %c0_34 = arith.constant 0 : index
    %89 = vector.load %arg8[%c0_33, %c0_34] : memref<32x1xf32, #tpu.memory_space<vmem>>, vector<32x1xf32>
    %90 = vector.broadcast %89 : vector<32x1xf32> to vector<32x128xf32>
    %91 = arith.addf %88, %90 : vector<32x128xf32>
    %c0_35 = arith.constant 0 : index
    %c0_36 = arith.constant 0 : index
    %92 = vector.load %arg9[%c0_35, %c0_36] : memref<64x32xf32, #tpu.memory_space<vmem>>, vector<64x32xf32>
    %cst_37 = arith.constant dense<0.000000e+00> : vector<64x128xf32>
    %93 = tpu.matmul %92, %91, %cst_37 {dimension_numbers = #tpu.dot_dimension_numbers<[1], [0], [0], [1], [0, 0, 1, 1], [], []>} : vector<64x32xf32>, vector<32x128xf32>, vector<64x128xf32> -> vector<64x128xf32>
    %94 = arith.addf %8, %93 : vector<64x128xf32>
    %c0_38 = arith.constant 0 : index
    %c0_39 = arith.constant 0 : index
    %95 = vector.load %arg10[%c0_38, %c0_39] : memref<64x1xf32, #tpu.memory_space<vmem>>, vector<64x1xf32>
    %96 = vector.broadcast %95 : vector<64x1xf32> to vector<64x128xf32>
    %97 = arith.addf %94, %96 : vector<64x128xf32>
    %98 = tpu.iota {dimensions = array<i32: 1>} : vector<1x128xi32>
    %c16_i32_40 = arith.constant 16 : i32
    %99 = vector.broadcast %c16_i32_40 : i32 to vector<1x128xi32>
    %100 = arith.cmpi slt, %98, %99 : vector<1x128xi32>
    %101 = arith.extui %100 : vector<1x128xi1> to vector<1x128xi32>
    %102 = arith.sitofp %101 : vector<1x128xi32> to vector<1x128xf32>
    %c128_i32 = arith.constant 128 : i32
    %103 = arith.muli %arg0, %c128_i32 : i32
    %104 = tpu.assume_multiple %103, 128 : i32
    %105 = vector.broadcast %102 : vector<1x128xf32> to vector<64x128xf32>
    %106 = arith.mulf %97, %105 : vector<64x128xf32>
    %c0_41 = arith.constant 0 : index
    %107 = arith.index_cast %104 : i32 to index
    %108 = vector.load %arg16[%c0_41, %107] : memref<64x256xf32, #tpu.memory_space<vmem>>, vector<64x128xf32>
    tpu.vector_store %arg16[%c0_41, %107], %106 {strides = array<i32>} : memref<64x256xf32, #tpu.memory_space<vmem>>, vector<64x128xf32>,
    %c1_i32 = arith.constant 1 : i32
    %109 = arith.cmpi eq, %arg0, %c1_i32 : i32
    %110 = arith.extui %109 : i1 to i32
    %c0_i32 = arith.constant 0 : i32
    %111 = arith.cmpi ne, %110, %c0_i32 : i32
    scf.if %111 {
      %c0_42 = arith.constant 0 : index
      %c0_43 = arith.constant 0 : index
      %112 = vector.load %arg16[%c0_42, %c0_43] : memref<64x256xf32, #tpu.memory_space<vmem>>, vector<64x256xf32>
      %cst_44 = arith.constant dense<0.000000e+00> : vector<64xf32>
      %113 = vector.multi_reduction <add>, %112, %cst_44 [1] : vector<64x256xf32> to vector<64xf32>
      %114 = vector.shape_cast %113 : vector<64xf32> to vector<64x1xf32>
      %cst_45 = arith.constant 3.125000e-02 : f32
      %115 = vector.broadcast %cst_45 : f32 to vector<64x1xf32>
      %116 = arith.mulf %114, %115 : vector<64x1xf32>
      %117 = tpu.iota {dimensions = array<i32: 1>} : vector<1x128xi32>
      %c16_i32_46 = arith.constant 16 : i32
      %118 = vector.broadcast %c16_i32_46 : i32 to vector<1x128xi32>
      %119 = arith.cmpi slt, %117, %118 : vector<1x128xi32>
      %120 = arith.extui %119 : vector<1x128xi1> to vector<1x128xi32>
      %121 = arith.sitofp %120 : vector<1x128xi32> to vector<1x128xf32>
      %122 = tpu.concatenate %121, %121 in 1 : vector<1x128xf32>, vector<1x128xf32> -> vector<1x256xf32>
      %123 = vector.broadcast %116 : vector<64x1xf32> to vector<64x256xf32>
      %124 = arith.subf %112, %123 : vector<64x256xf32>
      %125 = vector.broadcast %122 : vector<1x256xf32> to vector<64x256xf32>
      %126 = arith.mulf %124, %125 : vector<64x256xf32>
      %127 = arith.mulf %126, %126 : vector<64x256xf32>
      %cst_47 = arith.constant dense<0.000000e+00> : vector<64xf32>
      %128 = vector.multi_reduction <add>, %127, %cst_47 [1] : vector<64x256xf32> to vector<64xf32>
      %129 = vector.shape_cast %128 : vector<64xf32> to vector<64x1xf32>
      %cst_48 = arith.constant 3.125000e-02 : f32
      %130 = vector.broadcast %cst_48 : f32 to vector<64x1xf32>
      %131 = arith.mulf %129, %130 : vector<64x1xf32>
      %cst_49 = arith.constant 0.000000e+00 : f32
      %132 = vector.broadcast %cst_49 : f32 to vector<64x1xf32>
      %133 = arith.maximumf %131, %132 : vector<64x1xf32>
      %c0_50 = arith.constant 0 : index
      %c0_51 = arith.constant 0 : index
      %134 = vector.load %arg11[%c0_50, %c0_51] : memref<64x1xf32, #tpu.memory_space<vmem>>, vector<64x1xf32>
      %cst_52 = arith.constant 9.99999974E-6 : f32
      %135 = vector.broadcast %cst_52 : f32 to vector<64x1xf32>
      %136 = arith.addf %133, %135 : vector<64x1xf32>
      %137 = math.rsqrt %136 : vector<64x1xf32>
      %138 = arith.mulf %134, %137 : vector<64x1xf32>
      %139 = vector.broadcast %138 : vector<64x1xf32> to vector<64x256xf32>
      %140 = arith.mulf %139, %126 : vector<64x256xf32>
      %c0_53 = arith.constant 0 : index
      %c0_54 = arith.constant 0 : index
      %141 = vector.load %arg12[%c0_53, %c0_54] : memref<64x1xf32, #tpu.memory_space<vmem>>, vector<64x1xf32>
      %142 = vector.broadcast %141 : vector<64x1xf32> to vector<64x256xf32>
      %143 = arith.addf %140, %142 : vector<64x256xf32>
      %cst_55 = arith.constant 0.000000e+00 : f32
      %144 = vector.broadcast %cst_55 : f32 to vector<64x256xf32>
      %145 = arith.maximumf %143, %144 : vector<64x256xf32>
      %c0_56 = arith.constant 0 : index
      %c0_57 = arith.constant 0 : index
      %146 = vector.load %arg13[%c0_56, %c0_57] : memref<32x64xf32, #tpu.memory_space<vmem>>, vector<32x64xf32>
      %cst_58 = arith.constant dense<0.000000e+00> : vector<32x256xf32>
      %147 = tpu.matmul %146, %145, %cst_58 {dimension_numbers = #tpu.dot_dimension_numbers<[1], [0], [0], [1], [0, 0, 1, 1], [], []>} : vector<32x64xf32>, vector<64x256xf32>, vector<32x256xf32> -> vector<32x256xf32>
      %c0_59 = arith.constant 0 : index
      %c0_60 = arith.constant 0 : index
      %148 = vector.load %arg14[%c0_59, %c0_60] : memref<32x1xf32, #tpu.memory_space<vmem>>, vector<32x1xf32>
      %149 = vector.broadcast %148 : vector<32x1xf32> to vector<32x256xf32>
      %150 = arith.addf %147, %149 : vector<32x256xf32>
      %c0_61 = arith.constant 0 : index
      %c0_62 = arith.constant 0 : index
      %151 = vector.load %arg15[%c0_61, %c0_62] : memref<32x256xf32, #tpu.memory_space<vmem>>, vector<32x256xf32>
      tpu.vector_store %arg15[%c0_61, %c0_62], %150 {strides = array<i32>} : memref<32x256xf32, #tpu.memory_space<vmem>>, vector<32x256xf32>,
    } else {
    }
    return
  }
  func.func @transform_0(%arg0: i32) -> (i32, i32) {
    %c0_i32 = arith.constant 0 : i32
    %c0_i32_0 = arith.constant 0 : i32
    return %c0_i32, %arg0 : i32, i32
  }
  func.func @transform_1(%arg0: i32) -> (i32, i32) {
    %c0_i32 = arith.constant 0 : i32
    %c0_i32_0 = arith.constant 0 : i32
    return %c0_i32, %arg0 : i32, i32
  }
  func.func @transform_2(%arg0: i32) -> (i32, i32) {
    %c0_i32 = arith.constant 0 : i32
    %c0_i32_0 = arith.constant 0 : i32
    %c0_i32_1 = arith.constant 0 : i32
    return %c0_i32, %c0_i32_0 : i32, i32
  }
  func.func @transform_3(%arg0: i32) -> (i32, i32) {
    %c0_i32 = arith.constant 0 : i32
    %c0_i32_0 = arith.constant 0 : i32
    %c0_i32_1 = arith.constant 0 : i32
    return %c0_i32, %c0_i32_0 : i32, i32
  }
  func.func @transform_4(%arg0: i32) -> (i32, i32) {
    %c0_i32 = arith.constant 0 : i32
    %c0_i32_0 = arith.constant 0 : i32
    %c0_i32_1 = arith.constant 0 : i32
    return %c0_i32, %c0_i32_0 : i32, i32
  }
  func.func @transform_5(%arg0: i32) -> (i32, i32) {
    %c0_i32 = arith.constant 0 : i32
    %c0_i32_0 = arith.constant 0 : i32
    %c0_i32_1 = arith.constant 0 : i32
    return %c0_i32, %c0_i32_0 : i32, i32
  }
  func.func @transform_6(%arg0: i32) -> (i32, i32) {
    %c0_i32 = arith.constant 0 : i32
    %c0_i32_0 = arith.constant 0 : i32
    %c0_i32_1 = arith.constant 0 : i32
    return %c0_i32, %c0_i32_0 : i32, i32
  }
  func.func @transform_7(%arg0: i32) -> (i32, i32) {
    %c0_i32 = arith.constant 0 : i32
    %c0_i32_0 = arith.constant 0 : i32
    %c0_i32_1 = arith.constant 0 : i32
    return %c0_i32, %c0_i32_0 : i32, i32
  }
  func.func @transform_8(%arg0: i32) -> (i32, i32) {
    %c0_i32 = arith.constant 0 : i32
    %c0_i32_0 = arith.constant 0 : i32
    %c0_i32_1 = arith.constant 0 : i32
    return %c0_i32, %c0_i32_0 : i32, i32
  }
  func.func @transform_9(%arg0: i32) -> (i32, i32) {
    %c0_i32 = arith.constant 0 : i32
    %c0_i32_0 = arith.constant 0 : i32
    %c0_i32_1 = arith.constant 0 : i32
    return %c0_i32, %c0_i32_0 : i32, i32
  }
  func.func @transform_10(%arg0: i32) -> (i32, i32) {
    %c0_i32 = arith.constant 0 : i32
    %c0_i32_0 = arith.constant 0 : i32
    %c0_i32_1 = arith.constant 0 : i32
    return %c0_i32, %c0_i32_0 : i32, i32
  }
  func.func @transform_11(%arg0: i32) -> (i32, i32) {
    %c0_i32 = arith.constant 0 : i32
    %c0_i32_0 = arith.constant 0 : i32
    %c0_i32_1 = arith.constant 0 : i32
    return %c0_i32, %c0_i32_0 : i32, i32
  }
  func.func @transform_12(%arg0: i32) -> (i32, i32) {
    %c0_i32 = arith.constant 0 : i32
    %c0_i32_0 = arith.constant 0 : i32
    %c0_i32_1 = arith.constant 0 : i32
    return %c0_i32, %c0_i32_0 : i32, i32
  }
  func.func @transform_13(%arg0: i32) -> (i32, i32) {
    %c0_i32 = arith.constant 0 : i32
    %c0_i32_0 = arith.constant 0 : i32
    %c0_i32_1 = arith.constant 0 : i32
    return %c0_i32, %c0_i32_0 : i32, i32
  }
  func.func @transform_14(%arg0: i32) -> (i32, i32) {
    %c0_i32 = arith.constant 0 : i32
    %c0_i32_0 = arith.constant 0 : i32
    %c0_i32_1 = arith.constant 0 : i32
    return %c0_i32, %c0_i32_0 : i32, i32
  }
}

</mosaic_0001>

<bundles_post_ra>
// kernel: attentional_propagation.1
= control target key start
LH: loop header
LB: loop body
LE: loop exit
PB: predicated region body
PF: predicated region fallthrough
CT: control target
= control target key end

     0   :  { %s4219_s29 = smov 0   ;;  %s4221_s30 = smov 0   ;;  %s6993_s0 = inlined_call_operand.vmem [shape: f32[32,256], index: 0, kind: input, shape index: {}]   ;;  %s6994_s1 = inlined_call_operand.vmem [shape: f32[32,256], index: 1, kind: input, shape index: {}]   ;;  %s6995_s2 = inlined_call_operand.vmem [shape: f32[96,32], index: 2, kind: input, shape index: {}]   ;;  %s6996_s3 = inlined_call_operand.vmem [shape: f32[32,1], index: 3, kind: input, shape index: {}]   ;;  %s6997_s4 = inlined_call_operand.vmem [shape: f32[64,32], index: 4, kind: input, shape index: {}]   ;;  %s6998_s5 = inlined_call_operand.vmem [shape: f32[64,1], index: 5, kind: input, shape index: {}]   ;;  %s6999_s6 = inlined_call_operand.vmem [shape: f32[32,32], index: 6, kind: input, shape index: {}]   ;;  %s7000_s7 = inlined_call_operand.vmem [shape: f32[32,1], index: 7, kind: input, shape index: {}]   ;;  %s7001_s8 = inlined_call_operand.vmem [shape: f32[64,32], index: 8, kind: input, shape index: {}]   ;;  %s7002_s9 = inlined_call_operand.vmem [shape: f32[64,1], index: 9, kind: input, shape index: {}]   ;;  %s7003_s10 = inlined_call_operand.vmem [shape: f32[64,1], index: 10, kind: input, shape index: {}]   ;;  %s7004_s11 = inlined_call_operand.vmem [shape: f32[64,1], index: 11, kind: input, shape index: {}]   ;;  %s7005_s12 = inlined_call_operand.vmem [shape: f32[32,64], index: 12, kind: input, shape index: {}]   ;;  %s7006_s13 = inlined_call_operand.vmem [shape: f32[32,1], index: 13, kind: input, shape index: {}]   ;;  %s7007_s14 = inlined_call_operand.vmem [shape: f32[32,256], index: 14, kind: output, shape index: {}]  }
   0x1   :  { %s4223_s15 = smov 0  }
   0x2 LB: > { %s3670_s16 = sadd.s32 4294967295, %s4138_s15   ;;  %s4236_s17 = sadd.s32 1, %s4138_s15   ;;  %s4138_s15 = sphi %s4223_s15, %s7434_s15   ;;  %s4134_s30 = sphi %s4221_s30, %s7433_s30   ;;  %s4130_s29 = sphi %s4219_s29, %s7432_s29  }
   0x3   : > { %s28_s18 = ssub.s32 %s4138_s15, %s4236_s17  ;;  %s31_s19 = sadd.s32 1, %s4134_s30 }
   0x4   : > { %p29_p0 = scmp.eq.s32.totalorder %s28_s18, 0  ;;  %p38_p1 = scmp.ne.s32.totalorder %s4134_s30, %s4130_s29 }
   0x5   : > { %p39_p2 = scmp.eq.s32.totalorder %s4138_s15, 0  ;;  %p3672_p4 = scmp.ge.s32.totalorder %s4138_s15, 2 }
   0x6   : > { %s4245_s20 = scalar_select %p29_p0, %s4134_s30, %s31_s19  }
   0x7   : > { %p4247_p3 = por %p39_p2, %p38_p1  ;;  %399 = sbr.rel (%p3672_p4) target bundleno = 28 (0x1c), region = 64 }
   0xc   : > { %402 = sbr.rel (!%p4247_p3) target bundleno = 20 (0x14), region = 68  ;;  %s404_s22 = sand.u32 (%p4247_p3), 1, %s4134_s30  }
   0xd   : > { %s3674_s23 = sshll.u32 (%p4247_p3), %s4138_s15, 3  ;;  %s3673_s24 = sshll.u32 (%p4247_p3), %s404_s22, 5 }
   0xe   : > { %s408_s27 = scalar_lea.vmem (%p4247_p3), %s6993_s0, %s3674_s23  ;;  %s406_s28 = scalar_lea.vmem (%p4247_p3), [#allocation3], %s3673_s24 }
   0xf   : > { %v443_v0 = vld [vmem:[%s408_s27] sm:$0xff] (%p4247_p3)  ;;  %v445_v1 = vld [vmem:[%s408_s27 + $0x10] sm:$0xff] (%p4247_p3) }
  0x10   : > { %v447_v2 = vld [vmem:[%s408_s27 + $0x20] sm:$0xff] (%p4247_p3)  ;;  %444 = vst [vmem:[%s406_s28] sm:$0xff] (%p4247_p3), %v443_v0  ;;  %v449_v3 = vld [vmem:[%s408_s27 + $0x30] sm:$0xff] (%p4247_p3) }
  0x11   : > { %446 = vst [vmem:[%s406_s28 + $0x8] sm:$0xff] %v445_v1 }
  0x12   : > { %448 = vst [vmem:[%s406_s28 + $0x10] sm:$0xff] %v447_v2 }
  0x13   : > { %450 = vst [vmem:[%s406_s28 + $0x18] sm:$0xff] %v449_v3 }
  0x14 PF: > { %456 = sbr.rel (!%p4247_p3) target bundleno = 28 (0x1c), region = 106  ;;  %s458_s18 = sand.u32 (%p4247_p3), 1, %s4134_s30  }
  0x15   : > { %s3676_s19 = sshll.u32 (%p4247_p3), %s4138_s15, 3  ;;  %s3675_s22 = sshll.u32 (%p4247_p3), %s458_s18, 5 }
  0x16   : > { %s462_s26 = scalar_lea.vmem (%p4247_p3), %s6994_s1, %s3676_s19  ;;  %s460_s24 = scalar_lea.vmem (%p4247_p3), [#allocation4], %s3675_s22 }
  0x17   : > { %v497_v4 = vld [vmem:[%s462_s26] sm:$0xff] (%p4247_p3)  ;;  %v499_v5 = vld [vmem:[%s462_s26 + $0x10] sm:$0xff] (%p4247_p3) }
  0x18   : > { %v501_v6 = vld [vmem:[%s462_s26 + $0x20] sm:$0xff] (%p4247_p3)  ;;  %498 = vst [vmem:[%s460_s24] sm:$0xff] (%p4247_p3), %v497_v4  ;;  %v503_v7 = vld [vmem:[%s462_s26 + $0x30] sm:$0xff] (%p4247_p3) }
  0x19   : > { %500 = vst [vmem:[%s460_s24 + $0x8] sm:$0xff] %v499_v5 }
  0x1a   : > { %502 = vst [vmem:[%s460_s24 + $0x10] sm:$0xff] %v501_v6 }
  0x1b   : > { %504 = vst [vmem:[%s460_s24 + $0x18] sm:$0xff] %v503_v7 }
  0x1c PF: > { %p3677_p5 = scmp.ge.s32.totalorder %s4138_s15, 1  ;;  %p509_p6 = scmp.lt.s32.totalorder %s4138_s15, 3 }
  0x1e   : > { %p510_p7 = pnand %p3677_p5, %p509_p6 }
  0x20   : > { %513 = sbr.rel (%p510_p7) target bundleno = 3062 (0xbf6), region = 144 }
  0x25   : > { %s516_s21 = sand.u32 1, %s4130_s29   ;;  %v677_v8 = vld [vmem:[%s6996_s3] sm:$0xff]  ;;  %v4140_v9 = vmov 0   ;;  %vm587_vm0 = vcmask 261120   ;;  %v576_v21 = vld [vmem:[%s6995_s2 + $0x8] sm:$0xff]  ;;  %vm7067_vm1 = vcmask 64512   ;;  %v826_v0 = vlaneseq }
  0x26   : > { %s3678_s18 = sshll.u32 %s516_s21, 5  ;;  %3838 = vset.pattern.permute.xlu0 %v4140_v9  ;;  %3839 = vset.pattern.permute.xlu1 %v4140_v9  ;;  %v575_v18 = vld [vmem:[%s6995_s2] sm:$0xff]  ;;  %v706_v22 = vld [vmem:[%s6997_s4 + $0x8] sm:$0xff]  ;;  %v707_v44 = vld [vmem:[%s6997_s4 + $0x10] sm:$0xff]  ;;  %v4141_v4 = vmov -1e+30  }
  0x27   : > { %683 = vperm.xlu0 %3838, %v677_v8   ;;  %s518_s19 = scalar_lea.vmem [#allocation3], %s3678_s18  ;;  %s525_s22 = scalar_lea.vmem [#allocation4], %s3678_s18  ;;  %v705_v19 = vld [vmem:[%s6997_s4] sm:$0xff]  ;;  %v678_v23 = vld [vmem:[%s6996_s3 + $0x8] sm:$0xff]  ;;  %v708_v46 = vld [vmem:[%s6997_s4 + $0x18] sm:$0xff]  ;;  %v4347_v2 = vand.u32 127, %v826_v0 }
  0x28   : > { %v570_v10 = vld [vmem:[%s518_s19 + $0x18] sm:$0xff]  ;;  %v569_v12 = vld [vmem:[%s518_s19 + $0x10] sm:$0xff]  ;;  %v568_v14 = vld [vmem:[%s518_s19 + $0x8] sm:$0xff]  ;;  %688 = vperm.xlu1 %3839, %v678_v23   ;;  %s3777_s29 = sshll.u32 %s3670_s16, 7  ;;  %p3779_p8 = scmp.ne.s32.totalorder %s3670_s16, 1 }
  0x29   : > { %v574_v11 = vld [vmem:[%s525_s22 + $0x18] sm:$0xff]  ;;  %636 = vmatpush.msra.mxu0 %v570_v10  ;;  %v573_v13 = vld [vmem:[%s525_s22 + $0x10] sm:$0xff]  ;;  %v572_v15 = vld [vmem:[%s525_s22 + $0x8] sm:$0xff]  ;;  %7080 = vst [vmem:[#allocation5_spill] sm:$0xff] %v4347_v2  ;;  %vm7060_vm2 = vcmp.lt.s32.totalorder %v4347_v2, 16  ;;  %s3116_s25 = sshra.s32 %s3777_s29, 7 }
  0x2a   : > { %797 = vmatpush.msra.mxu1 %v574_v11  ;;  %v567_v16 = vld [vmem:[%s518_s19] sm:$0xff]  ;;  %v714_v24 = vld [vmem:[%s6998_s5 + $0x8] sm:$0xff]  ;;  %v711_v52 = vld [vmem:[%s6997_s4 + $0x30] sm:$0xff]  ;;  %v4353_v5 = vsel %vm7060_vm2, 0.0, %v4141_v4  ;;  %s3778_s23 = sshll.u32 %s3116_s25, 3 }
  0x2b   : > { %637 = vmatpush.msra.mxu0 %v569_v12  ;;  %v571_v17 = vld [vmem:[%s525_s22] sm:$0xff]  ;;  %v710_v50 = vld [vmem:[%s6997_s4 + $0x28] sm:$0xff]  ;;  %v712_v54 = vld [vmem:[%s6997_s4 + $0x38] sm:$0xff]  ;;  %7081 = vst [vmem:[#allocation6_spill] sm:$0xff] %v4353_v5  ;;  %s6693_s26 = scalar_lea.vmem [#allocation2], %s3778_s23 }
  0x2c   : > { %798 = vmatpush.msra.mxu1 %v573_v13  ;;  %v713_v20 = vld [vmem:[%s6998_s5] sm:$0xff] }
  0x2d   : > { %638 = vmatpush.msra.mxu0 %v568_v14  ;;  %v709_v48 = vld [vmem:[%s6997_s4 + $0x20] sm:$0xff] }
  0x2e   : > { %799 = vmatpush.msra.mxu1 %v572_v15 }
  0x2f   : > { %639 = vmatpush.msra.mxu0 %v567_v16  ;;  %723 = vperm.xlu0 %3838, %v713_v20  }
  0x30   : > { %800 = vmatpush.msra.mxu1 %v571_v17  ;;  %3680 = vmatmul.msk.f32.vlgmr.msra.gmra.mxu0 %vm587_vm0, %v575_v18 }
  0x31   : > { %3692 = vmatmul.msk.f32.vlgmr.msra.gmra.mxu1 %vm587_vm0, %v705_v19  ;;  %728 = vperm.xlu1 %3839, %v714_v24  }
  0x38   : > { %3681 = vmatmul.msk.f32.gmra.mxu0 %vm587_vm0, %v576_v21 }
  0x39   : > { %3693 = vmatmul.msk.f32.gmra.mxu1 %vm587_vm0, %v706_v22 }
  0x41   : > { %3694 = vmatmul.msk.f32.gmra.mxu1 %vm587_vm0, %v707_v44 }
  0x49   : > { %3695 = vmatmul.msk.f32.gmra.mxu1 %vm587_vm0, %v708_v46 }
  0x51   : > { %3696 = vmatmul.msk.f32.gmra.mxu1 %vm587_vm0, %v709_v48 }
  0x59   : > { %3697 = vmatmul.msk.f32.gmra.mxu1 %vm587_vm0, %v710_v50 }
  0x61   : > { %3698 = vmatmul.msk.f32.gmra.mxu1 %vm587_vm0, %v711_v52 }
  0x69   : > { %3699 = vmatmul.msk.f32.gmra.mxu1 %vm587_vm0, %v712_v54 }
  0x99   : > { %v684_v25 = vpop.permute.xlu0 %683 }
  0x9a   : > { %v689_v31 = vpop.permute.xlu1 %688 }
  0xa1   : > { %v724_v26 = vpop.permute.xlu0 %723 }
  0xa3   : > { %v729_v32 = vpop.permute.xlu1 %728 }
  0xad   : > { %v641_v27 = vpop.f32.mrf.mxu0 }
  0xae   : > { %v802_v28 = vpop.f32.mrf.mxu1  ;;  %v701_v30 = vadd.f32 %v684_v25, %v641_v27 }
  0xaf   : > { %v803_v29 = vadd.f32 %v802_v28, %v724_v26 }
  0xb0   : > { %830 = vxpose.xlu2.b32.start.end [1/1] (short) %v701_v30, 128 }
  0xb1   : > { %926 = vmatpush.msra.mxu2 %v803_v29 }
  0xb5   : > { %v644_v35 = vpop.f32.mrf.mxu0 }
  0xb6   : > { %v805_v33 = vpop.f32.mrf.mxu1  ;;  %v702_v36 = vadd.f32 %v689_v31, %v644_v35 }
  0xb7   : > { %v806_v34 = vadd.f32 %v805_v33, %v729_v32 }
  0xb9   : > { %1443 = vmatpush.msrb.mxu1 %v806_v34 }
  0xbe   : > { %v4380_v20 = vpop.f32.mrf.mxu1 }
  0xbf   : > { %7082 = vst [vmem:[#allocation7_spill] sm:$0xff] %v4380_v20 }
  0xc6   : > { %v4383_v22 = vpop.f32.mrf.mxu1 }
  0xc7   : > { %7083 = vst [vmem:[#allocation8_spill] sm:$0xff] %v4383_v22 }
  0xce   : > { %v4386_v24 = vpop.f32.mrf.mxu1 }
  0xcf   : > { %7084 = vst [vmem:[#allocation9_spill] sm:$0xff] %v4386_v24 }
  0xd6   : > { %v4389_v26 = vpop.f32.mrf.mxu1 }
  0xd7   : > { %7085 = vst [vmem:[#allocation10_spill] sm:$0xff] %v4389_v26 }
  0xde   : > { %v4393_v29 = vpop.f32.mrf.mxu1 }
  0xdf   : > { %7086 = vst [vmem:[#allocation11_spill] sm:$0xff] %v4393_v29 }
  0xe6   : > { %v4396_v31 = vpop.f32.mrf.mxu1 }
  0xe7   : > { %7087 = vst [vmem:[#allocation12_spill] sm:$0xff] %v4396_v31 }
 0x130   : > { %1348 = vxpose.xlu2.b32.start.end [1/1] (short) %v702_v36, 128 }
 0x149   : > { %v846_v37 = vpop.trf.xlu2 }
 0x14a   : > { %3700 = vmatmul.msk.f32.vlgmr.msra.gmra.mxu2 %vm7067_vm1, %v846_v37 }
 0x151   : > { %v847_v38 = vpop.trf.xlu2 }
 0x152   : > { %3701 = vmatmul.msk.f32.gmra.mxu2 %vm7067_vm1, %v847_v38 }
 0x159   : > { %v848_v39 = vpop.trf.xlu2 }
 0x15a   : > { %3702 = vmatmul.msk.f32.gmra.mxu2 %vm7067_vm1, %v848_v39 }
 0x161   : > { %v849_v40 = vpop.trf.xlu2 }
 0x162   : > { %3703 = vmatmul.msk.f32.gmra.mxu2 %vm7067_vm1, %v849_v40 }
 0x169   : > { %v850_v41 = vpop.trf.xlu2 }
 0x16a   : > { %3704 = vmatmul.msk.f32.gmra.mxu2 %vm7067_vm1, %v850_v41 }
 0x171   : > { %v851_v42 = vpop.trf.xlu2 }
 0x172   : > { %3705 = vmatmul.msk.f32.gmra.mxu2 %vm7067_vm1, %v851_v42 }
 0x179   : > { %v852_v43 = vpop.trf.xlu2 }
 0x17a   : > { %3706 = vmatmul.msk.f32.gmra.mxu2 %vm7067_vm1, %v852_v43 }
 0x181   : > { %v853_v45 = vpop.trf.xlu2 }
 0x182   : > { %3707 = vmatmul.msk.f32.gmra.mxu2 %vm7067_vm1, %v853_v45 }
 0x189   : > { %v854_v47 = vpop.trf.xlu2 }
 0x18a   : > { %3708 = vmatmul.msk.f32.gmra.mxu2 %vm7067_vm1, %v854_v47 }
 0x191   : > { %v855_v49 = vpop.trf.xlu2 }
 0x192   : > { %3709 = vmatmul.msk.f32.gmra.mxu2 %vm7067_vm1, %v855_v49  ;;  %3840 = vset.pattern.permute.xlu2 %v4140_v9 }
 0x199   : > { %v856_v51 = vpop.trf.xlu2 }
 0x19a   : > { %3710 = vmatmul.msk.f32.gmra.mxu2 %vm7067_vm1, %v856_v51 }
 0x1a1   : > { %v857_v53 = vpop.trf.xlu2 }
 0x1a2   : > { %3711 = vmatmul.msk.f32.gmra.mxu2 %vm7067_vm1, %v857_v53 }
 0x1a9   : > { %v858_v55 = vpop.trf.xlu2 }
 0x1aa   : > { %3712 = vmatmul.msk.f32.gmra.mxu2 %vm7067_vm1, %v858_v55 }
 0x1b1   : > { %v859_v56 = vpop.trf.xlu2 }
 0x1b2   : > { %3713 = vmatmul.msk.f32.gmra.mxu2 %vm7067_vm1, %v859_v56 }
 0x1b9   : > { %v860_v57 = vpop.trf.xlu2 }
 0x1ba   : > { %3714 = vmatmul.msk.f32.gmra.mxu2 %vm7067_vm1, %v860_v57 }
 0x1c1   : > { %v861_v58 = vpop.trf.xlu2 }
 0x1c2   : > { %3715 = vmatmul.msk.f32.gmra.mxu2 %vm7067_vm1, %v861_v58 }
 0x1c9   : > { %v1364_v59 = vpop.trf.xlu2 }
 0x1ca   : > { %3716 = vmatmul.msk.f32.vlgmr.msrb.gmra.mxu1 %vm7067_vm1, %v1364_v59 }
 0x1cd   : > { %v4341_v60 = vpop.f32.mrf.mxu2 }
 0x1ce   : > { %v4405_v41 = vadd.f32 %v4341_v60, %v4353_v5 }
 0x1d1   : > { %v1365_v61 = vpop.trf.xlu2 }
 0x1d2   : > { %3717 = vmatmul.msk.f32.gmra.mxu1 %vm7067_vm1, %v1365_v61 }
 0x1d5   : > { %v4344_v62 = vpop.f32.mrf.mxu2 }
 0x1d6   : > { %v4414_v44 = vadd.f32 %v4344_v62, %v4353_v5 }
 0x1d9   : > { %v1366_v63 = vpop.trf.xlu2 }
 0x1da   : > { %3718 = vmatmul.msk.f32.gmra.mxu1 %vm7067_vm1, %v1366_v63 }
 0x1dd   : > { %v934_v1 = vpop.f32.mrf.mxu2 }
 0x1de   : > { %v4376_v18 = vadd.f32 %v934_v1, %v4353_v5 }
 0x1e1   : > { %v1367_v3 = vpop.trf.xlu2 }
 0x1e2   : > { %3719 = vmatmul.msk.f32.gmra.mxu1 %vm7067_vm1, %v1367_v3 }
 0x1e5   : > { %v937_v6 = vpop.f32.mrf.mxu2 }
 0x1e6   : > { %v4356_v7 = vadd.f32 %v937_v6, %v4353_v5 }
 0x1e8   : > { %982 = vmax.xlane.f32.xlu1 %v4356_v7 }
 0x1e9   : > { %v1368_v8 = vpop.trf.xlu2 }
 0x1ea   : > { %3720 = vmatmul.msk.f32.gmra.mxu1 %vm7067_vm1, %v1368_v8 }
 0x1ed   : > { %v940_v9 = vpop.f32.mrf.mxu2 }
 0x1ee   : > { %v4361_v10 = vadd.f32 %v940_v9, %v4353_v5 }
 0x1f0   : > { %984 = vmax.xlane.f32.xlu1 %v4361_v10 }
 0x1f1   : > { %v1369_v11 = vpop.trf.xlu2 }
 0x1f2   : > { %3721 = vmatmul.msk.f32.gmra.mxu1 %vm7067_vm1, %v1369_v11 }
 0x1f5   : > { %v943_v12 = vpop.f32.mrf.mxu2 }
 0x1f6   : > { %v4366_v13 = vadd.f32 %v943_v12, %v4353_v5 }
 0x1f8   : > { %986 = vmax.xlane.f32.xlu1 %v4366_v13 }
 0x1f9   : > { %v1370_v14 = vpop.trf.xlu2 }
 0x1fa   : > { %3722 = vmatmul.msk.f32.gmra.mxu1 %vm7067_vm1, %v1370_v14 }
 0x1fd   : > { %v946_v15 = vpop.f32.mrf.mxu2 }
 0x1fe   : > { %v4371_v16 = vadd.f32 %v946_v15, %v4353_v5 }
 0x200   : > { %988 = vmax.xlane.f32.xlu1 %v4371_v16 }
 0x201   : > { %v1371_v17 = vpop.trf.xlu2 }
 0x202   : > { %3723 = vmatmul.msk.f32.gmra.mxu1 %vm7067_vm1, %v1371_v17 }
 0x205   : > { %v949_v39 = vpop.f32.mrf.mxu2 }
 0x206   : > { %v4434_v52 = vadd.f32 %v949_v39, %v4353_v5 }
 0x208   : > { %980 = vmax.xlane.f32.xlu1 %v4376_v18 }
 0x209   : > { %v1372_v19 = vpop.trf.xlu2 }
 0x20a   : > { %3724 = vmatmul.msk.f32.gmra.mxu1 %vm7067_vm1, %v1372_v19 }
 0x20d   : > { %v952_v47 = vpop.f32.mrf.mxu2 }
 0x20e   : > { %v4445_v57 = vadd.f32 %v952_v47, %v4353_v5 }
 0x211   : > { %v1373_v21 = vpop.trf.xlu2 }
 0x212   : > { %3725 = vmatmul.msk.f32.gmra.mxu1 %vm7067_vm1, %v1373_v21 }
 0x215   : > { %v955_v51 = vpop.f32.mrf.mxu2 }
 0x216   : > { %v4453_v61 = vadd.f32 %v955_v51, %v4353_v5 }
 0x219   : > { %v1374_v23 = vpop.trf.xlu2 }
 0x21a   : > { %3726 = vmatmul.msk.f32.gmra.mxu1 %vm7067_vm1, %v1374_v23 }
 0x21d   : > { %v958_v55 = vpop.f32.mrf.mxu2 }
 0x21e   : > { %v4461_v0 = vadd.f32 %v958_v55, %v4353_v5 }
 0x221   : > { %v1375_v25 = vpop.trf.xlu2 }
 0x222   : > { %3727 = vmatmul.msk.f32.gmra.mxu1 %vm7067_vm1, %v1375_v25 }
 0x225   : > { %v961_v60 = vpop.f32.mrf.mxu2 }
 0x226   : > { %v4469_v4 = vadd.f32 %v961_v60, %v4353_v5 }
 0x229   : > { %v1376_v27 = vpop.trf.xlu2 }
 0x22a   : > { %3728 = vmatmul.msk.f32.gmra.mxu1 %vm7067_vm1, %v1376_v27 }
 0x22d   : > { %v964_v1 = vpop.f32.mrf.mxu2 }
 0x22e   : > { %v4477_v12 = vadd.f32 %v964_v1, %v4353_v5 }
 0x231   : > { %v1377_v28 = vpop.trf.xlu2 }
 0x232   : > { %3729 = vmatmul.msk.f32.gmra.mxu1 %vm7067_vm1, %v1377_v28 }
 0x235   : > { %v967_v8 = vpop.f32.mrf.mxu2 }
 0x236   : > { %v4490_v23 = vadd.f32 %v967_v8, %v4353_v5 }
 0x239   : > { %v1378_v30 = vpop.trf.xlu2 }
 0x23a   : > { %3730 = vmatmul.msk.f32.gmra.mxu1 %vm7067_vm1, %v1378_v30 }
 0x23d   : > { %v970_v15 = vpop.f32.mrf.mxu2 }
 0x23e   : > { %v4485_v21 = vadd.f32 %v970_v15, %v4353_v5 }
 0x241   : > { %v1379_v32 = vpop.trf.xlu2 }
 0x242   : > { %3731 = vmatmul.msk.f32.gmra.mxu1 %vm7067_vm1, %v1379_v32 }
 0x247   : > { %v1445_v33 = vpop.f32.mrf.mxu1 }
 0x248   : > { %v4426_v48 = vadd.f32 %v1445_v33, %v4353_v5 }
 0x24f   : > { %v1448_v34 = vpop.f32.mrf.mxu1 }
 0x250   : > { %v4437_v53 = vadd.f32 %v1448_v34, %v4353_v5  ;;  %v973_v34 = vpop.f32.mrf.mxu2 }
 0x257   : > { %v1451_v35 = vpop.f32.mrf.mxu1 }
 0x258   : > { %v4417_v45 = vadd.f32 %v1451_v35, %v4353_v5 }
 0x25b   : > { %v983_v9 = vpop.xlane.xlu1 %982 }
 0x25f   : > { %v1454_v36 = vpop.f32.mrf.mxu1 }
 0x260   : > { %v4429_v49 = vadd.f32 %v1454_v36, %v4353_v5  ;;  %v4502_v36 = vadd.f32 %v973_v34, %v4353_v5 }
 0x263   : > { %v985_v19 = vpop.xlane.xlu1 %984 }
 0x267   : > { %v1457_v37 = vpop.f32.mrf.mxu1 }
 0x268   : > { %v4400_v38 = vadd.f32 %v1457_v37, %v4353_v5 }
 0x26a   : > { %1501 = vmax.xlane.f32.xlu1 %v4400_v38 }
 0x26b   : > { %v987_v25 = vpop.xlane.xlu1 %986 }
 0x26f   : > { %v1460_v40 = vpop.f32.mrf.mxu1 }
 0x270   : > { %v4408_v42 = vadd.f32 %v1460_v40, %v4353_v5 }
 0x272   : > { %976 = vmax.xlane.f32.xlu1 %v4405_v41  ;;  %1503 = vmax.xlane.f32.xlu0 %v4408_v42 }
 0x273   : > { %v989_v30 = vpop.xlane.xlu1 %988 }
 0x277   : > { %v1463_v43 = vpop.f32.mrf.mxu1 }
 0x278   : > { %v4420_v46 = vadd.f32 %v1463_v43, %v4353_v5 }
 0x27a   : > { %1497 = vmax.xlane.f32.xlu1 %v4417_v45  ;;  %978 = vmax.xlane.f32.xlu0 %v4414_v44 }
 0x27b   : > { %1505 = vmax.xlane.f32.xlu2 %v4420_v46  ;;  %v981_v35 = vpop.xlane.xlu1 %980 }
 0x27c   : > { %v1010_v37 = vsub.f32 %v4376_v18, %v981_v35  ;;  %v1014_v35 = vsub.f32 %v4371_v16, %v989_v30 }
 0x27e   : > { %v1028_v47 = vmul.f32 1.442695, %v1010_v37 }
 0x27f   : > { %v1466_v50 = vpop.f32.mrf.mxu1 }
 0x280   : > { %v4442_v56 = vadd.f32 %v1466_v50, %v4353_v5  ;;  %v1011_v50 = vsub.f32 %v4356_v7, %v983_v9  ;;  %3841 = vpow2.f32 %v1028_v47 }
 0x282   : > { %1493 = vmax.xlane.f32.xlu1 %v4426_v48  ;;  %1499 = vmax.xlane.f32.xlu0 %v4429_v49  ;;  %v1030_v55 = vmul.f32 1.442695, %v1011_v50 }
 0x284   : > { %3843 = vpow2.f32 %v1030_v55 }
 0x286   : > { %v4516_v18 = vpop.eup %3841 }
 0x287   : > { %v1469_v54 = vpop.f32.mrf.mxu1  ;;  %7088 = vst [vmem:[#allocation13_spill] sm:$0xff] %v4516_v18 }
 0x288   : > { %v4450_v59 = vadd.f32 %v1469_v54, %v4353_v5 }
 0x28a   : > { %990 = vmax.xlane.f32.xlu1 %v4434_v52  ;;  %1495 = vmax.xlane.f32.xlu0 %v4437_v53 }
 0x28f   : > { %v1472_v58 = vpop.f32.mrf.mxu1 }
 0x290   : > { %v4458_v62 = vadd.f32 %v1472_v58, %v4353_v5 }
 0x292   : > { %992 = vmax.xlane.f32.xlu1 %v4445_v57  ;;  %1507 = vmax.xlane.f32.xlu0 %v4442_v56 }
 0x297   : > { %v1475_v63 = vpop.f32.mrf.mxu1 }
 0x298   : > { %v4466_v3 = vadd.f32 %v1475_v63, %v4353_v5  ;;  %v1012_v63 = vsub.f32 %v4361_v10, %v985_v19  ;;  %v1013_v10 = vsub.f32 %v4366_v13, %v987_v25  ;;  %v1036_v13 = vmul.f32 1.442695, %v1014_v35 }
 0x29a   : > { %994 = vmax.xlane.f32.xlu1 %v4453_v61  ;;  %1509 = vmax.xlane.f32.xlu0 %v4450_v59  ;;  %v1032_v8 = vmul.f32 1.442695, %v1012_v63 }
 0x29f   : > { %v1478_v6 = vpop.f32.mrf.mxu1 }
 0x2a0   : > { %v4474_v11 = vadd.f32 %v1478_v6, %v4353_v5 }
 0x2a2   : > { %996 = vmax.xlane.f32.xlu1 %v4461_v0  ;;  %1511 = vmax.xlane.f32.xlu0 %v4458_v62 }
 0x2a7   : > { %v1481_v14 = vpop.f32.mrf.mxu1 }
 0x2a8   : > { %v4482_v17 = vadd.f32 %v1481_v14, %v4353_v5  ;;  %v4525_v14 = vpop.eup %3843 }
 0x2a9   : > { %7089 = vst [vmem:[#allocation14_spill] sm:$0xff] %v4525_v14 }
 0x2aa   : > { %998 = vmax.xlane.f32.xlu1 %v4469_v4  ;;  %1513 = vmax.xlane.f32.xlu0 %v4466_v3 }
 0x2af   : > { %v1484_v27 = vpop.f32.mrf.mxu1 }
 0x2b0   : > { %v4494_v28 = vadd.f32 %v1484_v27, %v4353_v5 }
 0x2b2   : > { %1000 = vmax.xlane.f32.xlu1 %v4477_v12  ;;  %1515 = vmax.xlane.f32.xlu0 %v4474_v11 }
 0x2b7   : > { %v1487_v32 = vpop.f32.mrf.mxu1 }
 0x2b8   : > { %v4498_v33 = vadd.f32 %v1487_v32, %v4353_v5  ;;  %v1034_v32 = vmul.f32 1.442695, %v1013_v10 }
 0x2ba   : > { %1004 = vmax.xlane.f32.xlu1 %v4485_v21  ;;  %1517 = vmax.xlane.f32.xlu0 %v4482_v17 }
 0x2bf   : > { %v1490_v39 = vpop.f32.mrf.mxu1 }
 0x2c0   : > { %v4509_v43 = vadd.f32 %v1490_v39, %v4353_v5 }
 0x2c2   : > { %1002 = vmax.xlane.f32.xlu0 %v4490_v23 }
 0x2ca   : > { %1519 = vmax.xlane.f32.xlu0 %v4494_v28 }
 0x2d2   : > { %1521 = vmax.xlane.f32.xlu0 %v4498_v33 }
 0x2da   : > { %1006 = vmax.xlane.f32.xlu0 %v4502_v36 }
 0x2dd   : > { %v4506_v40 = vpop.xlane.xlu1 %1501 }
 0x2e2   : > { %1523 = vmax.xlane.f32.xlu0 %v4509_v43 }
 0x2e5   : > { %v4513_v51 = vpop.xlane.xlu1 %976  ;;  %v1504_v54 = vpop.xlane.xlu0 %1503 }
 0x2e6   : > { %v1530_v58 = vsub.f32 %v4408_v42, %v1504_v54 }
 0x2e8   : > { %v1551_v60 = vmul.f32 1.442695, %v1530_v58 }
 0x2ea   : > { %1060 = vadd.xlane.f32.xlu0 %v4516_v18  ;;  %3845 = vpow2.f32 %v1551_v60 }
 0x2eb   : > { %3847 = vpow2.f32 %v1032_v8 }
 0x2ed   : > { %v4520_v1 = vpop.xlane.xlu1 %1497  ;;  %v4522_v7 = vpop.xlane.xlu0 %978 }
 0x2ee   : > { %v1506_v6 = vpop.xlane.xlu2 %1505 }
 0x2ef   : > { %v1531_v9 = vsub.f32 %v4420_v46, %v1506_v6 }
 0x2f0   : > { %v4527_v42 = vpop.eup %3845 }
 0x2f1   : > { %7090 = vst [vmem:[#allocation15_spill] sm:$0xff] %v4527_v42  ;;  %v1553_v15 = vmul.f32 1.442695, %v1531_v9  ;;  %1583 = vadd.xlane.f32.xlu1 %v4527_v42  ;;  %v4536_v34 = vpop.eup %3847 }
 0x2f2   : > { %1062 = vadd.xlane.f32.xlu0 %v4525_v14  ;;  %7091 = vst [vmem:[#allocation16_spill] sm:$0xff] %v4536_v34 }
 0x2f3   : > { %3849 = vpow2.f32 %v1553_v15 }
 0x2f4   : > { %3851 = vpow2.f32 %v1034_v32 }
 0x2f5   : > { %v4532_v19 = vpop.xlane.xlu1 %1493  ;;  %v4534_v27 = vpop.xlane.xlu0 %1499  ;;  %3853 = vpow2.f32 %v1036_v13 }
 0x2f9   : > { %v4538_v46 = vpop.eup %3849 }
 0x2fa   : > { %7092 = vst [vmem:[#allocation17_spill] sm:$0xff] %v4538_v46  ;;  %1064 = vadd.xlane.f32.xlu0 %v4536_v34  ;;  %1585 = vadd.xlane.f32.xlu1 %v4538_v46  ;;  %v4545_v25 = vpop.eup %3851 }
 0x2fb   : > { %7093 = vst [vmem:[#allocation18_spill] sm:$0xff] %v4545_v25  ;;  %v4550_v16 = vpop.eup %3853 }
 0x2fc   : > { %7094 = vst [vmem:[#allocation19_spill] sm:$0xff] %v4550_v16 }
 0x2fd   : > { %v991_v37 = vpop.xlane.xlu1 %990  ;;  %v4543_v39 = vpop.xlane.xlu0 %1495 }
 0x2fe   : > { %v1015_v47 = vsub.f32 %v4434_v52, %v991_v37 }
 0x300   : > { %v1038_v55 = vmul.f32 1.442695, %v1015_v47 }
 0x302   : > { %1066 = vadd.xlane.f32.xlu0 %v4545_v25  ;;  %3855 = vpow2.f32 %v1038_v55 }
 0x305   : > { %v993_v50 = vpop.xlane.xlu1 %992  ;;  %v1508_v54 = vpop.xlane.xlu0 %1507 }
 0x306   : > { %v1532_v58 = vsub.f32 %v4442_v56, %v1508_v54  ;;  %v1016_v30 = vsub.f32 %v4445_v57, %v993_v50 }
 0x308   : > { %v1555_v60 = vmul.f32 1.442695, %v1532_v58  ;;  %v1040_v52 = vmul.f32 1.442695, %v1016_v30  ;;  %v4555_v9 = vpop.eup %3855 }
 0x309   : > { %7095 = vst [vmem:[#allocation20_spill] sm:$0xff] %v4555_v9 }
 0x30a   : > { %1068 = vadd.xlane.f32.xlu0 %v4550_v16  ;;  %3857 = vpow2.f32 %v1555_v60 }
 0x30b   : > { %3859 = vpow2.f32 %v1040_v52 }
 0x30d   : > { %v995_v63 = vpop.xlane.xlu1 %994  ;;  %v1510_v6 = vpop.xlane.xlu0 %1509 }
 0x30e   : > { %v1533_v8 = vsub.f32 %v4450_v59, %v1510_v6  ;;  %v1017_v56 = vsub.f32 %v4453_v61, %v995_v63 }
 0x310   : > { %v1557_v15 = vmul.f32 1.442695, %v1533_v8  ;;  %v4557_v10 = vpop.eup %3857  ;;  %v1042_v35 = vmul.f32 1.442695, %v1017_v56 }
 0x311   : > { %7096 = vst [vmem:[#allocation21_spill] sm:$0xff] %v4557_v10  ;;  %1587 = vadd.xlane.f32.xlu1 %v4557_v10  ;;  %v4563_v13 = vpop.eup %3859 }
 0x312   : > { %1070 = vadd.xlane.f32.xlu0 %v4555_v9  ;;  %3861 = vpow2.f32 %v1557_v15  ;;  %7097 = vst [vmem:[#allocation22_spill] sm:$0xff] %v4563_v13 }
 0x313   : > { %3863 = vpow2.f32 %v1042_v35 }
 0x315   : > { %v997_v57 = vpop.xlane.xlu1 %996  ;;  %v1512_v32 = vpop.xlane.xlu0 %1511 }
 0x316   : > { %v1534_v37 = vsub.f32 %v4458_v62, %v1512_v32  ;;  %v1018_v61 = vsub.f32 %v4461_v0, %v997_v57 }
 0x318   : > { %v1559_v59 = vmul.f32 1.442695, %v1534_v37  ;;  %v4565_v47 = vpop.eup %3861  ;;  %v1044_v58 = vmul.f32 1.442695, %v1018_v61 }
 0x319   : > { %7098 = vst [vmem:[#allocation23_spill] sm:$0xff] %v4565_v47  ;;  %1589 = vadd.xlane.f32.xlu1 %v4565_v47  ;;  %v4571_v60 = vpop.eup %3863 }
 0x31a   : > { %1072 = vadd.xlane.f32.xlu0 %v4563_v13  ;;  %3865 = vpow2.f32 %v1559_v59 }
 0x31d   : > { %v999_v50 = vpop.xlane.xlu1 %998  ;;  %v1514_v54 = vpop.xlane.xlu0 %1513 }
 0x31e   : > { %v1019_v55 = vsub.f32 %v4469_v4, %v999_v50  ;;  %v1535_v63 = vsub.f32 %v4466_v3, %v1514_v54 }
 0x320   : > { %v1046_v62 = vmul.f32 1.442695, %v1019_v55  ;;  %v4573_v30 = vpop.eup %3865  ;;  %v1561_v6 = vmul.f32 1.442695, %v1535_v63 }
 0x321   : > { %7099 = vst [vmem:[#allocation24_spill] sm:$0xff] %v4573_v30  ;;  %1591 = vadd.xlane.f32.xlu1 %v4573_v30 }
 0x322   : > { %3867 = vpow2.f32 %v1046_v62  ;;  %1074 = vadd.xlane.f32.xlu0 %v4571_v60 }
 0x323   : > { %3869 = vpow2.f32 %v1044_v58 }
 0x324   : > { %3871 = vpow2.f32 %v1561_v6 }
 0x325   : > { %v1516_v0 = vpop.xlane.xlu0 %1515  ;;  %v1001_v57 = vpop.xlane.xlu1 %1000 }
 0x326   : > { %v1536_v4 = vsub.f32 %v4474_v11, %v1516_v0  ;;  %v1020_v3 = vsub.f32 %v4477_v12, %v1001_v57 }
 0x328   : > { %v4578_v52 = vpop.eup %3867  ;;  %v1563_v56 = vmul.f32 1.442695, %v1536_v4  ;;  %v1048_v59 = vmul.f32 1.442695, %v1020_v3 }
 0x329   : > { %v4580_v8 = vpop.eup %3869 }
 0x32a   : > { %1076 = vadd.xlane.f32.xlu1 %v4580_v8  ;;  %1078 = vadd.xlane.f32.xlu0 %v4578_v52  ;;  %v4585_v32 = vpop.eup %3871  ;;  %3873 = vpow2.f32 %v1563_v56 }
 0x32b   : > { %7100 = vst [vmem:[#allocation25_spill] sm:$0xff] %v4585_v32 }
 0x32d   : > { %v1518_v15 = vpop.xlane.xlu0 %1517  ;;  %v1005_v12 = vpop.xlane.xlu1 %1004 }
 0x32e   : > { %v1537_v11 = vsub.f32 %v4482_v17, %v1518_v15 }
 0x330   : > { %v4590_v50 = vpop.eup %3873  ;;  %v1565_v58 = vmul.f32 1.442695, %v1537_v11 }
 0x331   : > { %7101 = vst [vmem:[#allocation26_spill] sm:$0xff] %v4590_v50 }
 0x332   : > { %1593 = vadd.xlane.f32.xlu1 %v4585_v32 }
 0x335   : > { %v1003_v35 = vpop.xlane.xlu0 %1002 }
 0x336   : > { %v1021_v37 = vsub.f32 %v4490_v23, %v1003_v35  ;;  %v1022_v23 = vsub.f32 %v4485_v21, %v1005_v12  ;;  %v1008_v12 = vsub.f32 %v4405_v41, %v4513_v51  ;;  %v1527_v51 = vsub.f32 %v4417_v45, %v4520_v1 }
 0x338   : > { %v1050_v61 = vmul.f32 1.442695, %v1021_v37  ;;  %v1052_v17 = vmul.f32 1.442695, %v1022_v23  ;;  %v1009_v37 = vsub.f32 %v4414_v44, %v4522_v7  ;;  %v1528_v44 = vsub.f32 %v4429_v49, %v4534_v27 }
 0x339   : > { %v1526_v49 = vsub.f32 %v4437_v53, %v4543_v39  ;;  %v1024_v27 = vmul.f32 1.442695, %v1008_v12  ;;  %v1525_v53 = vsub.f32 %v4426_v48, %v4532_v19  ;;  %v578_v39 = vld [vmem:[%s6995_s2 + $0x18] sm:$0xff]  ;;  %v718_v12 = vld [vmem:[%s6998_s5 + $0x28] sm:$0xff] }
 0x33a   : > { %3875 = vpow2.f32 %v1050_v61  ;;  %1595 = vadd.xlane.f32.xlu1 %v4590_v50  ;;  %v1026_v61 = vmul.f32 1.442695, %v1009_v37 }
 0x33b   : > { %3877 = vpow2.f32 %v1048_v59  ;;  %v1529_v59 = vsub.f32 %v4400_v38, %v4506_v40  ;;  %v1547_v40 = vmul.f32 1.442695, %v1528_v44  ;;  %v1543_v23 = vmul.f32 1.442695, %v1526_v49  ;;  %v680_v44 = vld [vmem:[%s6996_s3 + $0x18] sm:$0xff]  ;;  %v715_v49 = vld [vmem:[%s6998_s5 + $0x10] sm:$0xff] }
 0x33d   : > { %v1520_v54 = vpop.xlane.xlu0 %1519  ;;  %v1549_v11 = vmul.f32 1.442695, %v1529_v59 }
 0x33e   : > { %v1538_v55 = vsub.f32 %v4494_v28, %v1520_v54 }
 0x340   : > { %v4595_v62 = vpop.eup %3875  ;;  %v1567_v63 = vmul.f32 1.442695, %v1538_v55 }
 0x341   : > { %v4597_v0 = vpop.eup %3877  ;;  %1082 = vadd.xlane.f32.xlu0 %v4595_v62 }
 0x342   : > { %3879 = vpow2.f32 %v1567_v63  ;;  %1080 = vadd.xlane.f32.xlu1 %v4597_v0 }
 0x343   : > { %3881 = vpow2.f32 %v1565_v58 }
 0x344   : > { %3883 = vpow2.f32 %v1052_v17 }
 0x345   : > { %v1522_v6 = vpop.xlane.xlu0 %1521 }
 0x346   : > { %v1539_v15 = vsub.f32 %v4498_v33, %v1522_v6 }
 0x348   : > { %v4602_v4 = vpop.eup %3879  ;;  %v1569_v3 = vmul.f32 1.442695, %v1539_v15  ;;  %v1545_v15 = vmul.f32 1.442695, %v1527_v51 }
 0x349   : > { %7102 = vst [vmem:[#allocation27_spill] sm:$0xff] %v4602_v4  ;;  %v4604_v28 = vpop.eup %3881  ;;  %1599 = vadd.xlane.f32.xlu0 %v4602_v4 }
 0x34a   : > { %7103 = vst [vmem:[#allocation28_spill] sm:$0xff] %v4604_v28  ;;  %1597 = vadd.xlane.f32.xlu1 %v4604_v28  ;;  %v4610_v21 = vpop.eup %3883 }
 0x34d   : > { %v1007_v56 = vpop.xlane.xlu0 %1006 }
 0x34e   : > { %v1023_v57 = vsub.f32 %v4502_v36, %v1007_v56  ;;  %v1541_v56 = vmul.f32 1.442695, %v1525_v53 }
 0x350   : > { %v1054_v35 = vmul.f32 1.442695, %v1023_v57 }
 0x352   : > { %3885 = vpow2.f32 %v1054_v35  ;;  %1084 = vadd.xlane.f32.xlu1 %v4610_v21 }
 0x353   : > { %3887 = vpow2.f32 %v1569_v3 }
 0x354   : > { %3889 = vpow2.f32 %v1026_v61 }
 0x355   : > { %v1524_v33 = vpop.xlane.xlu0 %1523  ;;  %3891 = vpow2.f32 %v1549_v11  ;;  %v679_v11 = vld [vmem:[%s6996_s3 + $0x10] sm:$0xff] }
 0x356   : > { %v1540_v55 = vsub.f32 %v4509_v43, %v1524_v33  ;;  %v577_v43 = vld [vmem:[%s6995_s2 + $0x10] sm:$0xff] }
 0x357   : > { %3682 = vmatmul.msk.f32.gmra.mxu0 %vm587_vm0, %v577_v43 }
 0x358   : > { %v4617_v54 = vpop.eup %3885  ;;  %v1571_v38 = vmul.f32 1.442695, %v1540_v55  ;;  %v717_v55 = vld [vmem:[%s6998_s5 + $0x20] sm:$0xff] }
 0x359   : > { %v4619_v36 = vpop.eup %3887  ;;  %1086 = vadd.xlane.f32.xlu0 %v4617_v54 }
 0x35a   : > { %1601 = vadd.xlane.f32.xlu1 %v4619_v36  ;;  %v4626_v7 = vpop.eup %3889  ;;  %3893 = vpow2.f32 %v1571_v38 }
 0x35b   : > { %7104 = vst [vmem:[#allocation29_spill] sm:$0xff] %v4626_v7  ;;  %v4628_v58 = vpop.eup %3891  ;;  %3895 = vpow2.f32 %v1547_v40 }
 0x35c   : > { %7105 = vst [vmem:[#allocation30_spill] sm:$0xff] %v4628_v58  ;;  %3897 = vpow2.f32 %v1024_v27 }
 0x35d   : > { %v4633_v63 = vpop.xlane.xlu0 %1060  ;;  %3899 = vpow2.f32 %v1543_v23  ;;  %v716_v23 = vld [vmem:[%s6998_s5 + $0x18] sm:$0xff] }
 0x35e   : > { %3901 = vpow2.f32 %v1545_v15  ;;  %v1129_v5 = vand.u32 2147483648, %v4633_v63  ;;  %vm1123_vm3 = vweird.f32 %v4633_v63 }
 0x35f   : > { %3683 = vmatmul.msk.f32.gmra.mxu0 %vm587_vm0, %v578_v39  ;;  %3903 = vpow2.f32 %v1541_v56 }
 0x360   : > { %v4642_v6 = vpop.eup %3893  ;;  %3905 = vrcp.f32 %v4633_v63  ;;  %v1130_v42 = vor.u32 1.1754944e-38, %v1129_v5 }
 0x361   : > { %1058 = vadd.xlane.f32.xlu0 %v4626_v7  ;;  %v4644_v41 = vpop.eup %3895 }
 0x362   : > { %1581 = vadd.xlane.f32.xlu1 %v4628_v58  ;;  %7106 = vst [vmem:[#allocation31_spill] sm:$0xff] %v4644_v41  ;;  %v4658_v57 = vpop.eup %3897 }
 0x363   : > { %7108 = vst [vmem:[#allocation33_spill] sm:$0xff] %v4658_v57  ;;  %v4660_v3 = vpop.eup %3899 }
 0x364   : > { %7109 = vst [vmem:[#allocation34_spill] sm:$0xff] %v4660_v3  ;;  %v4664_v45 = vpop.xlane.xlu1 %1583  ;;  %v4668_v1 = vpop.eup %3901 }
 0x365   : > { %v4655_v17 = vpop.xlane.xlu0 %1062  ;;  %7110 = vst [vmem:[#allocation35_spill] sm:$0xff] %v4664_v45  ;;  %v4670_v19 = vpop.eup %3903  ;;  %v1691_v58 = vand.u32 2147483648, %v4664_v45 }
 0x366   : > { %7107 = vst [vmem:[#allocation32_spill] sm:$0xff] %v4655_v17  ;;  %v3906_v39 = vpop.eup %3905  ;;  %3907 = vrcp.f32 %v4655_v17  ;;  %v1144_v24 = vand.u32 2147483648, %v4655_v17  ;;  %vm1138_vm6 = vweird.f32 %v4655_v17 }
 0x367   : > { %7112 = vst [vmem:[#allocation37_spill] sm:$0xff] %v4668_v1  ;;  %v1119_v56 = vmul.f32 %v3906_v39, %v4633_v63  ;;  %3909 = vrcp.f32 %v4664_v45  ;;  %vm1124_vm4 = vweird.f32 %v3906_v39 }
 0x368   : > { %7113 = vst [vmem:[#allocation38_spill] sm:$0xff] %v4670_v19  ;;  %vm4771_vm7 = vmor %vm1123_vm3, %vm1124_vm4  ;;  %v4782_v34 = vor.u32 1.1754944e-38, %v1144_v24 }
 0x369   : > { %1603 = vadd.xlane.f32.xlu0 %v4642_v6 }
 0x36a   : > { %1579 = vadd.xlane.f32.xlu1 %v4644_v41  ;;  %7127 = vst [vmem:[#allocation48_spill] sm:$0xff] %v4782_v34 }
 0x36d   : > { %v4666_v48 = vpop.xlane.xlu0 %1064  ;;  %v4674_v35 = vpop.xlane.xlu1 %1585 }
 0x36e   : > { %7111 = vst [vmem:[#allocation36_spill] sm:$0xff] %v4666_v48  ;;  %3911 = vrcp.f32 %v4666_v48 }
 0x36f   : > { %7114 = vst [vmem:[#allocation39_spill] sm:$0xff] %v4674_v35 }
 0x371   : > { %1056 = vadd.xlane.f32.xlu0 %v4658_v57 }
 0x372   : > { %1575 = vadd.xlane.f32.xlu1 %v4660_v3 }
 0x375   : > { %v4676_v37 = vpop.xlane.xlu0 %1066 }
 0x376   : > { %7115 = vst [vmem:[#allocation40_spill] sm:$0xff] %v4676_v37  ;;  %3913 = vrcp.f32 %v4676_v37  ;;  %vm1168_vm9 = vweird.f32 %v4676_v37 }
 0x377   : > { %3915 = vrcp.f32 %v4674_v35 }
 0x379   : > { %1577 = vadd.xlane.f32.xlu0 %v4668_v1 }
 0x37a   : > { %1573 = vadd.xlane.f32.xlu1 %v4670_v19 }
 0x37d   : > { %v4680_v61 = vpop.xlane.xlu0 %1068 }
 0x37e   : > { %3917 = vrcp.f32 %v4680_v61  ;;  %vm1183_vm12 = vweird.f32 %v4680_v61 }
 0x384   : > { %v4678_v59 = vpop.xlane.xlu1 %1587 }
 0x385   : > { %7116 = vst [vmem:[#allocation41_spill] sm:$0xff] %v4678_v59  ;;  %v4693_v38 = vpop.xlane.xlu0 %1070 }
 0x386   : > { %3919 = vrcp.f32 %v4693_v38 }
 0x38c   : > { %v4685_v33 = vpop.xlane.xlu1 %1589 }
 0x38d   : > { %7117 = vst [vmem:[#allocation42_spill] sm:$0xff] %v4685_v33  ;;  %693 = vperm.xlu0 %3838, %v679_v11   ;;  %v4705_v27 = vpop.xlane.xlu0 %1072 }
 0x38e   : > { %3921 = vrcp.f32 %v4705_v27 }
 0x393   : > { %743 = vperm.xlu1 %3839, %v717_v55   ;;  %v1120_v55 = vsub.f32 1.0, %v1119_v56  ;;  %v1127_v56 = vand.u32 2147483647, %v4633_v63  ;;  %v4784_v63 = vor.u32 1.1754944e-38, %v1691_v58 }
 0x394   : > { %v4695_v40 = vpop.xlane.xlu1 %1591 }
 0x395   : > { %698 = vperm.xlu0 %3838, %v680_v44   ;;  %v4713_v53 = vpop.xlane.xlu0 %1074  ;;  %v4724_v44 = vpop.eup %3907  ;;  %v1121_v2 = vmul.f32 %v3906_v39, %v1120_v55  ;;  %vm4753_vm5 = vcmp.eq.f32.partialorder %v1127_v56, 8.507059e+37  ;;  %v1159_v56 = vand.u32 2147483648, %v4666_v48  ;;  %7128 = vst [vmem:[#allocation49_spill] sm:$0xff] %v4784_v63 }
 0x396   : > { %7118 = vst [vmem:[#allocation43_spill] sm:$0xff] %v4724_v44  ;;  %3923 = vrcp.f32 %v4713_v53  ;;  %vm1139_vm8 = vweird.f32 %v4724_v44 }
 0x397   : > { %v1122_v55 = vadd.f32 %v3906_v39, %v1121_v2  ;;  %3925 = vrcp.f32 %v4678_v59  ;;  %v4791_v10 = vor.u32 1.1754944e-38, %v1159_v56  ;;  %vm4825_vm10 = vmor %vm1138_vm6, %vm1139_vm8 }
 0x398   : > { %3927 = vrcp.f32 %v4685_v33 }
 0x399   : > { %v1126_v5 = vsel %vm4771_vm7, %v3906_v39, %v1122_v55  ;;  %7129 = vst [vmem:[#allocation50_spill] sm:$0xff] %v4791_v10  ;;  %v1189_v39 = vand.u32 2147483648, %v4680_v61  ;;  %v1234_v10 = vand.u32 2147483648, %v4713_v53  ;;  %vm1228_vm7 = vweird.f32 %v4713_v53 }
 0x39b   : > { %748 = vperm.xlu1 %3839, %v718_v12  }
 0x39d   : > { %v4703_v43 = vpop.xlane.xlu1 %1076  ;;  %733 = vperm.xlu0 %3838, %v715_v49   ;;  %v4721_v11 = vpop.xlane.xlu0 %1078 }
 0x39e   : > { %v4730_v49 = vpop.eup %3909  ;;  %3929 = vrcp.f32 %v4703_v43 }
 0x39f   : > { %7119 = vst [vmem:[#allocation44_spill] sm:$0xff] %v4730_v49  ;;  %v4734_v31 = vpop.eup %3911  ;;  %v1681_v22 = vmul.f32 %v4730_v49, %v4664_v45 }
 0x3a0   : > { %v4737_v29 = vpop.eup %3913  ;;  %v1149_v2 = vmul.f32 %v4734_v31, %v4666_v48 }
 0x3a1   : > { %7120 = vst [vmem:[#allocation45_spill] sm:$0xff] %v4737_v29  ;;  %v4740_v26 = vpop.eup %3915  ;;  %v1164_v41 = vmul.f32 %v4737_v29, %v4676_v37  ;;  %v1682_v7 = vsub.f32 1.0, %v1681_v22  ;;  %vm1169_vm11 = vweird.f32 %v4737_v29 }
 0x3a2   : > { %7121 = vst [vmem:[#allocation46_spill] sm:$0xff] %v4740_v26  ;;  %v4748_v1 = vpop.eup %3917  ;;  %v1150_v32 = vsub.f32 1.0, %v1149_v2  ;;  %v1174_v2 = vand.u32 2147483648, %v4676_v37  ;;  %vm4879_vm14 = vmor %vm1168_vm9, %vm1169_vm11  ;;  %vm1243_vm9 = vweird.f32 %v4703_v43 }
 0x3a3   : > { %7122 = vst [vmem:[#allocation47_spill] sm:$0xff] %v4748_v1  ;;  %v1179_v14 = vmul.f32 %v4748_v1, %v4680_v61  ;;  %v1165_v47 = vsub.f32 1.0, %v1164_v41  ;;  %v4786_v30 = vpop.eup %3919  ;;  %v4795_v41 = vsel %vm4753_vm5, %v1130_v42, %v1126_v5  ;;  %v1683_v24 = vmul.f32 %v4730_v49, %v1682_v7 }
 0x3a4   : > { %7130 = vst [vmem:[#allocation51_spill] sm:$0xff] %v4795_v41  ;;  %v4803_v55 = vpop.eup %3921  ;;  %v1151_v56 = vmul.f32 %v4734_v31, %v1150_v32  ;;  %v1204_v41 = vand.u32 2147483648, %v4693_v38  ;;  %vm1184_vm13 = vweird.f32 %v4748_v1 }
 0x3a5   : > { %v4710_v51 = vpop.xlane.xlu1 %1593  ;;  %738 = vperm.xlu0 %3838, %v716_v23   ;;  %v1134_v23 = vmul.f32 %v4724_v44, %v4655_v17  ;;  %v1180_v58 = vsub.f32 1.0, %v1179_v14  ;;  %v1166_v42 = vmul.f32 %v4737_v29, %v1165_v47  ;;  %v4830_v47 = vadd.f32 %v4730_v49, %v1683_v24  ;;  %v4832_v22 = vpop.eup %3923  ;;  %vm4916_vm15 = vmor %vm1183_vm12, %vm1184_vm13 }
 0x3a6   : > { %v1209_v14 = vmul.f32 %v4803_v55, %v4705_v27  ;;  %v4842_v5 = vpop.eup %3925  ;;  %v4855_v34 = vadd.f32 %v4734_v31, %v1151_v56  ;;  %v7150_v17 = vmov 0  ;;  %vm1229_vm3 = vweird.f32 %v4832_v22 }
 0x3a7   : > { %v1135_v3 = vsub.f32 1.0, %v1134_v23  ;;  %v1696_v23 = vmul.f32 %v4740_v26, %v4674_v35  ;;  %7135 = vst [vmem:[#allocation54_spill] sm:$0xff] %v4830_v47  ;;  %v1181_v32 = vmul.f32 %v4748_v1, %v1180_v58  ;;  %v4846_v24 = vadd.f32 %v4737_v29, %v1166_v42  ;;  %v4849_v58 = vpop.eup %3927 }
 0x3a8   : > { %7136 = vst [vmem:[#allocation55_spill] sm:$0xff] %v4842_v5  ;;  %v4852_v47 = vor.u32 1.1754944e-38, %v1174_v2  ;;  %v1224_v42 = vmul.f32 %v4832_v22, %v4713_v53  ;;  %v1210_v2 = vsub.f32 1.0, %v1209_v14  ;;  %v4887_v14 = vmul.f32 %v4842_v5, %v4678_v59 }
 0x3a9   : > { %v1136_v18 = vmul.f32 %v4724_v44, %v1135_v3  ;;  %v1697_v25 = vsub.f32 1.0, %v1696_v23  ;;  %v1194_v23 = vmul.f32 %v4786_v30, %v4693_v38  ;;  %7137 = vst [vmem:[#allocation56_spill] sm:$0xff] %v4846_v24  ;;  %v4870_v56 = vadd.f32 %v4748_v1, %v1181_v32 }
 0x3aa   : > { %7138 = vst [vmem:[#allocation57_spill] sm:$0xff] %v4849_v58  ;;  %v4901_v59 = vor.u32 1.1754944e-38, %v1204_v41  ;;  %v7151_v17 = vsel %vm4916_vm15, 4294967295, %v7150_v17  ;;  %v1211_v41 = vmul.f32 %v4803_v55, %v1210_v2  ;;  %v579_v2 = vld [vmem:[%s6995_s2 + $0x20] sm:$0xff] }
 0x3ab   : > { %v4800_v3 = vadd.f32 %v4724_v44, %v1136_v18  ;;  %v1698_v7 = vmul.f32 %v4740_v26, %v1697_v25  ;;  %v7132_v25 = vmov 0  ;;  %v1195_v63 = vsub.f32 1.0, %v1194_v23  ;;  %7139 = vst [vmem:[#allocation58_spill] sm:$0xff] %v4852_v47  ;;  %v4860_v23 = vpop.eup %3929  ;;  %3684 = vmatmul.msk.f32.gmra.mxu0 %vm587_vm0, %v579_v2 }
 0x3ac   : > { %v7133_v25 = vsel %vm4825_vm10, 4294967295, %v7132_v25  ;;  %7140 = vst [vmem:[#allocation59_spill] sm:$0xff] %v4855_v34  ;;  %v1225_v34 = vsub.f32 1.0, %v1224_v42  ;;  %v1239_v47 = vmul.f32 %v4860_v23, %v4703_v43  ;;  %v4955_v2 = vadd.f32 %v4803_v55, %v1211_v41 }
 0x3ad   : > { %v4715_v15 = vpop.xlane.xlu1 %1595  ;;  %7131 = vst [vmem:[#allocation52_spill] sm:$0xff] %v4800_v3  ;;  %v4858_v46 = vadd.f32 %v4740_v26, %v1698_v7  ;;  %v4873_v7 = vor.u32 1.1754944e-38, %v1189_v39  ;;  %v1196_v32 = vmul.f32 %v4786_v30, %v1195_v63  ;;  %v1219_v39 = vand.u32 2147483648, %v4705_v27 }
 0x3ae   : > { %7134 = vst [vmem:[#allocation53_spill] sm:$0xff] %v7133_v25  ;;  %v7144_v25 = vmov 0  ;;  %v4907_v63 = vmul.f32 %v4849_v58, %v4685_v33  ;;  %v1226_v5 = vmul.f32 %v4832_v22, %v1225_v34  ;;  %vm1244_vm5 = vweird.f32 %v4860_v23 }
 0x3af   : > { %7141 = vst [vmem:[#allocation60_spill] sm:$0xff] %v4858_v46  ;;  %v7145_v25 = vsel %vm4879_vm14, 4294967295, %v7144_v25  ;;  %v4936_v9 = vor.u32 1.1754944e-38, %v1219_v39  ;;  %v4939_v42 = vadd.f32 %v4786_v30, %v1196_v32  ;;  %v1240_v39 = vsub.f32 1.0, %v1239_v47 }
 0x3b0   : > { %7142 = vst [vmem:[#allocation61_spill] sm:$0xff] %v4870_v56  ;;  %v4970_v56 = vadd.f32 %v4832_v22, %v1226_v5 }
 0x3b1   : > { %7143 = vst [vmem:[#allocation62_spill] sm:$0xff] %v4873_v7  ;;  %v1241_v41 = vmul.f32 %v4860_v23, %v1240_v39 }
 0x3b2   : > { %7146 = vst [vmem:[#allocation63_spill] sm:$0xff] %v7145_v25 }
 0x3b3   : > { %7147 = vst [vmem:[#allocation64_spill] sm:$0xff] %v4887_v14  ;;  %v4949_v14 = vor.u32 1.1754944e-38, %v1234_v10 }
 0x3b4   : > { %v4744_v19 = vpop.xlane.xlu0 %1082  ;;  %7148 = vst [vmem:[#allocation65_spill] sm:$0xff] %v4901_v59 }
 0x3b5   : > { %v4727_v12 = vpop.xlane.xlu1 %1080  ;;  %3931 = vrcp.f32 %v4744_v19  ;;  %7149 = vst [vmem:[#allocation66_spill] sm:$0xff] %v4907_v63  ;;  %v1294_v37 = vand.u32 2147483648, %v4744_v19 }
 0x3b6   : > { %7152 = vst [vmem:[#allocation67_spill] sm:$0xff] %v7151_v17 }
 0x3bb   : > { %v4867_v44 = vpop.eup %3931 }
 0x3bc   : > { %v4808_v20 = vpop.xlane.xlu0 %1599  ;;  %v1284_v33 = vmul.f32 %v4867_v44, %v4744_v19  ;;  %vm1289_vm2 = vweird.f32 %v4867_v44 }
 0x3bd   : > { %v4762_v57 = vpop.xlane.xlu1 %1597 }
 0x3be   : > { %v1285_v28 = vsub.f32 1.0, %v1284_v33 }
 0x3c5   : > { %v4814_v18 = vpop.xlane.xlu1 %1084 }
 0x3c6   : > { %3933 = vrcp.f32 %v4814_v18  ;;  %vm1303_vm8 = vweird.f32 %v4814_v18 }
 0x3c7   : > { %3935 = vrcp.f32 %v4721_v11 }
 0x3c8   : > { %3937 = vrcp.f32 %v4727_v12 }
 0x3cc   : > { %v4883_v46 = vpop.eup %3933  ;;  %v4890_v3 = vpop.xlane.xlu0 %1086 }
 0x3cd   : > { %v1299_v16 = vmul.f32 %v4883_v46, %v4814_v18  ;;  %3939 = vrcp.f32 %v4890_v3  ;;  %v4903_v45 = vpop.eup %3935  ;;  %v4931_v49 = vpop.xlane.xlu1 %1601  ;;  %vm1304_vm4 = vweird.f32 %v4883_v46  ;;  %vm1318_vm11 = vweird.f32 %v4890_v3 }
 0x3ce   : > { %v4928_v29 = vpop.eup %3937  ;;  %3941 = vrcp.f32 %v4695_v40  ;;  %v1254_v24 = vmul.f32 %v4903_v45, %v4721_v11  ;;  %vm4996_vm12 = vmor %vm1303_vm8, %vm1304_vm4 }
 0x3cf   : > { %v1300_v50 = vsub.f32 1.0, %v1299_v16  ;;  %v1264_v16 = vand.u32 2147483648, %v4721_v11  ;;  %v1269_v26 = vmul.f32 %v4928_v29, %v4727_v12  ;;  %3943 = vrcp.f32 %v4931_v49  ;;  %vm5076_vm4 = vmor %vm1243_vm9, %vm1244_vm5 }
 0x3d0   : > { %v1255_v47 = vsub.f32 1.0, %v1254_v24  ;;  %3945 = vrcp.f32 %v4710_v51  ;;  %v1286_v24 = vmul.f32 %v4867_v44, %v1285_v28  ;;  %v580_v28 = vld [vmem:[%s6995_s2 + $0x28] sm:$0xff]  ;;  %vm1214_vm5 = vweird.f32 %v4803_v55 }
 0x3d1   : > { %v1301_v13 = vmul.f32 %v4883_v46, %v1300_v50  ;;  %v4964_v33 = vor.u32 1.1754944e-38, %v1264_v16  ;;  %3947 = vrcp.f32 %v4808_v20  ;;  %v1270_v10 = vsub.f32 1.0, %v1269_v26  ;;  %3685 = vmatmul.msk.f32.gmra.mxu0 %vm587_vm0, %v580_v28 }
 0x3d2   : > { %v1324_v16 = vand.u32 2147483648, %v4890_v3  ;;  %v1256_v1 = vmul.f32 %v4903_v45, %v1255_v47  ;;  %3949 = vrcp.f32 %v4762_v57  ;;  %v1309_v26 = vand.u32 2147483648, %v4814_v18 }
 0x3d3   : > { %v3940_v32 = vpop.eup %3939  ;;  %v1302_v5 = vadd.f32 %v4883_v46, %v1301_v13  ;;  %3951 = vrcp.f32 %v4715_v15  ;;  %v1271_v59 = vmul.f32 %v4928_v29, %v1270_v10  ;;  %v7158_v47 = vand.u32 2147483647, %v4721_v11 }
 0x3d4   : > { %v1314_v25 = vmul.f32 %v3940_v32, %v4890_v3  ;;  %v4959_v35 = vpop.xlane.xlu0 %1058  ;;  %v4973_v34 = vpop.eup %3941  ;;  %vm1319_vm6 = vweird.f32 %v3940_v32  ;;  %v1325_v58 = vor.u32 1.1754944e-38, %v1324_v16  ;;  %v1310_v16 = vor.u32 1.1754944e-38, %v1309_v26 }
 0x3d5   : > { %7153 = vst [vmem:[#allocation68_spill] sm:$0xff] %v4959_v35  ;;  %v4982_v7 = vpop.eup %3943  ;;  %vm1320_vm13 = vmor %vm1318_vm11, %vm1319_vm6  ;;  %v1306_v10 = vsel %vm4996_vm12, %v4883_v46, %v1302_v5  ;;  %vm1288_vm11 = vweird.f32 %v4744_v19  ;;  %v1292_v35 = vand.u32 2147483647, %v4744_v19  ;;  %v581_v19 = vld [vmem:[%s6995_s2 + $0x30] sm:$0xff]  ;;  %vm1213_vm9 = vweird.f32 %v4705_v27 }
 0x3d6   : > { %v1315_v50 = vsub.f32 1.0, %v1314_v25  ;;  %v1322_v25 = vand.u32 2147483647, %v4890_v3  ;;  %v5002_v17 = vpop.eup %3945  ;;  %vm5029_vm12 = vmor %vm1288_vm11, %vm1289_vm2  ;;  %vm1274_vm2 = vweird.f32 %v4928_v29  ;;  %vm1273_vm11 = vweird.f32 %v4727_v12 }
 0x3d7   : > { %v5009_v3 = vpop.eup %3947  ;;  %vm1293_vm1 = vcmp.eq.f32.partialorder %v1292_v35, 8.507059e+37  ;;  %v7170_v35 = vand.u32 2147483648, %v4703_v43 }
 0x3d8   : > { %v1316_v39 = vmul.f32 %v3940_v32, %v1315_v50  ;;  %v1307_v50 = vand.u32 2147483647, %v4814_v18  ;;  %v1816_v18 = vmul.f32 %v4982_v7, %v4931_v49  ;;  %vm1323_vm8 = vcmp.eq.f32.partialorder %v1322_v25, 8.507059e+37  ;;  %v5023_v48 = vpop.eup %3949 }
 0x3d9   : > { %3686 = vmatmul.msk.f32.gmra.mxu0 %vm587_vm0, %v581_v19 }
 0x3da   : > { %v1317_v13 = vadd.f32 %v3940_v32, %v1316_v39  ;;  %v1287_v39 = vadd.f32 %v4867_v44, %v1286_v24  ;;  %vm1308_vm6 = vcmp.eq.f32.partialorder %v1307_v50, 8.507059e+37  ;;  %v1817_v5 = vsub.f32 1.0, %v1816_v18 }
 0x3db   : > { %v1311_v25 = vsel %vm1308_vm6, %v1310_v16, %v1306_v10  ;;  %v7161_v50 = vand.u32 2147483647, %v4703_v43  ;;  %v1786_v18 = vmul.f32 %v5023_v48, %v4762_v57 }
 0x3dc   : > { %v5013_v63 = vpop.xlane.xlu0 %1603  ;;  %v1321_v28 = vsel %vm1320_vm13, %v3940_v32, %v1317_v13  ;;  %v1801_v32 = vmul.f32 %v5009_v3, %v4808_v20  ;;  %vm1259_vm13 = vweird.f32 %v4903_v45  ;;  %v1291_v26 = vsel %vm5029_vm12, %v4867_v44, %v1287_v39  ;;  %vm5064_vm12 = vmor %vm1228_vm7, %vm1229_vm3 }
 0x3dd   : > { %3953 = vrcp.f32 %v5013_v63  ;;  %v1326_v24 = vsel %vm1323_vm8, %v1325_v58, %v1321_v28  ;;  %v5038_v58 = vpop.eup %3951  ;;  %v1272_v13 = vadd.f32 %v4928_v29, %v1271_v59  ;;  %vm5047_vm8 = vcmp.eq.f32.partialorder %v7158_v47, 8.507059e+37  ;;  %vm5083_vm3 = vmor %vm1273_vm11, %vm1274_vm2 }
 0x3de   : > { %v1327_v4 = vmul.f32 %v4617_v54, %v1326_v24  ;;  %v1242_v54 = vadd.f32 %v4860_v23, %v1241_v41  ;;  %vm5053_vm6 = vcmp.eq.f32.partialorder %v7161_v50, 8.507059e+37  ;;  %v1279_v44 = vand.u32 2147483648, %v4727_v12 }
 0x3df   : > { %v1257_v59 = vadd.f32 %v4903_v45, %v1256_v1  ;;  %v1312_v10 = vmul.f32 %v4610_v21, %v1311_v25  ;;  %v1802_v16 = vsub.f32 1.0, %v1801_v32  ;;  %v1231_v25 = vsel %vm5064_vm12, %v4832_v22, %v4970_v56 }
 0x3e0   : > { %1328 = vmatpush.xpose.msra.mxu3 %v1327_v4  ;;  %v1295_v4 = vor.u32 1.1754944e-38, %v1294_v37  ;;  %v1277_v37 = vand.u32 2147483647, %v4727_v12  ;;  %v1250_v12 = vor.u32 1.1754944e-38, %v7170_v35  ;;  %v5096_v32 = vmul.f32 %v5002_v17, %v4710_v51 }
 0x3e1   : > { %v1818_v19 = vmul.f32 %v4982_v7, %v1817_v5  ;;  %v1276_v43 = vsel %vm5083_vm3, %v4928_v29, %v1272_v13  ;;  %v5113_v50 = vmul.f32 %v5038_v58, %v4715_v15  ;;  %v1280_v5 = vor.u32 1.1754944e-38, %v1279_v44 }
 0x3e2   : > { %v1296_v46 = vsel %vm1293_vm1, %v1295_v4, %v1291_v26  ;;  %vm7171_vm1 = vweird.f32 %v4721_v11  ;;  %v1246_v29 = vsel %vm5076_vm4, %v4860_v23, %v1242_v54  ;;  %v1787_v11 = vsub.f32 1.0, %v1786_v18 }
 0x3e3   : > { %v3954_v24 = vpop.eup %3953  ;;  %vm5107_vm7 = vmor %vm7171_vm1, %vm1259_vm13  ;;  %vm1278_vm13 = vcmp.eq.f32.partialorder %v1277_v37, 8.507059e+37  ;;  %v1803_v21 = vmul.f32 %v5009_v3, %v1802_v16  ;;  %v1841_v44 = vand.u32 2147483648, %v5013_v63  ;;  %vm1821_vm2 = vweird.f32 %v4982_v7 }
 0x3e4   : > { %v1831_v26 = vmul.f32 %v3954_v24, %v5013_v63  ;;  %1329 = vmatpush.xpose.msra.mxu3 %v1312_v10  ;;  %v1261_v4 = vsel %vm5107_vm7, %v4903_v45, %v1257_v59  ;;  %v1297_v10 = vmul.f32 %v4595_v62, %v1296_v46  ;;  %v1281_v35 = vsel %vm1278_vm13, %v1280_v5, %v1276_v43  ;;  %v582_v45 = vld [vmem:[%s6995_s2 + $0x38] sm:$0xff]  ;;  %v5146_v46 = vpop.xlane.xlu1 %1581  ;;  %v5172_v5 = vpop.xlane.xlu0 %1056 }
 0x3e5   : > { %vm1836_vm4 = vweird.f32 %v3954_v24  ;;  %v1839_v54 = vand.u32 2147483647, %v5013_v63  ;;  %v1819_v62 = vadd.f32 %v4982_v7, %v1818_v19  ;;  %v7174_v59 = vand.u32 2147483647, %v4713_v53  ;;  %3687 = vmatmul.msk.f32.gmra.mxu0 %vm587_vm0, %v582_v45  ;;  %v583_v45 = vld [vmem:[%s6995_s2 + $0x40] sm:$0xff] }
 0x3e6   : > { %v1832_v13 = vsub.f32 1.0, %v1831_v26  ;;  %v1266_v37 = vsel %vm5047_vm8, %v4964_v33, %v1261_v4  ;;  %v1251_v1 = vsel %vm5053_vm6, %v1250_v12, %v1246_v29  ;;  %vm1820_vm1 = vweird.f32 %v4931_v49  ;;  %v7200_v33 = vld [vmem:[#allocation40_spill] sm:$0xff] }
 0x3e7   : > { %vm5134_vm3 = vcmp.eq.f32.partialorder %v7174_v59, 8.507059e+37  ;;  %v1826_v16 = vand.u32 2147483648, %v4931_v49  ;;  %vm1198_vm7 = vweird.f32 %v4693_v38  ;;  %v1282_v53 = vmul.f32 %v4597_v0, %v1281_v35  ;;  %vm5152_vm11 = vmor %vm1820_vm1, %vm1821_vm2 }
 0x3e8   : > { %v1833_v23 = vmul.f32 %v3954_v24, %v1832_v13  ;;  %1330 = vmatpush.xpose.msra.mxu3 %v1297_v10  ;;  %vm1835_vm13 = vweird.f32 %v5013_v63  ;;  %v1824_v41 = vand.u32 2147483647, %v4931_v49  ;;  %v7179_v28 = vand.u32 2147483647, %v4705_v27 }
 0x3e9   : > { %v1772_v0 = vsub.f32 1.0, %v5113_v50  ;;  %v1788_v63 = vmul.f32 %v5023_v48, %v1787_v11  ;;  %vm1837_vm6 = vmor %vm1835_vm13, %vm1836_vm4  ;;  %v1842_v26 = vor.u32 1.1754944e-38, %v1841_v44  ;;  %vm1806_vm2 = vweird.f32 %v5009_v3  ;;  %v7216_v44 = vld [vmem:[#allocation46_spill] sm:$0xff] }
 0x3ea   : > { %v1834_v19 = vadd.f32 %v3954_v24, %v1833_v23  ;;  %vm5159_vm8 = vcmp.eq.f32.partialorder %v7179_v28, 8.507059e+37  ;;  %vm1840_vm1 = vcmp.eq.f32.partialorder %v1839_v54, 8.507059e+37  ;;  %v1823_v49 = vsel %vm5152_vm11, %v4982_v7, %v1819_v62  ;;  %vm5183_vm11 = vmor %vm1213_vm9, %vm1214_vm5  ;;  %v584_v7 = vld [vmem:[%s6995_s2 + $0x48] sm:$0xff]  ;;  %v585_v28 = vld [vmem:[%s6995_s2 + $0x50] sm:$0xff] }
 0x3eb   : > { %v1804_v47 = vadd.f32 %v5009_v3, %v1803_v21  ;;  %v1267_v50 = vmul.f32 %v4578_v52, %v1266_v37  ;;  %v1827_v29 = vor.u32 1.1754944e-38, %v1826_v16  ;;  %v1811_v11 = vand.u32 2147483648, %v4808_v20  ;;  %v7198_v16 = vld [vmem:[#allocation68_spill] sm:$0xff] }
 0x3ec   : > { %1331 = vmatpush.xpose.msra.mxu3 %v1282_v53  ;;  %v1838_v43 = vsel %vm1837_vm6, %v3954_v24, %v1834_v19  ;;  %vm1825_vm4 = vcmp.eq.f32.partialorder %v1824_v41, 8.507059e+37  ;;  %vm1805_vm13 = vweird.f32 %v4808_v20  ;;  %v1809_v24 = vand.u32 2147483647, %v4808_v20  ;;  %v5256_v39 = vpop.xlane.xlu1 %1579  ;;  %v7199_v53 = vld [vmem:[#allocation27_spill] sm:$0xff] }
 0x3ed   : > { %v1843_v4 = vsel %vm1840_vm1, %v1842_v26, %v1838_v43  ;;  %v7184_v52 = vand.u32 2147483647, %v4693_v38  ;;  %v1741_v20 = vmul.f32 %v4973_v34, %v4695_v40  ;;  %v1757_v27 = vsub.f32 1.0, %v5096_v32  ;;  %vm5204_vm5 = vmor %vm1805_vm13, %vm1806_vm2  ;;  %3688 = vmatmul.msk.f32.gmra.mxu0 %vm587_vm0, %v583_v45  ;;  %v5279_v26 = vpop.xlane.xlu0 %1577 }
 0x3ee   : > { %v1844_v13 = vmul.f32 %v4642_v6, %v1843_v4  ;;  %v7187_v6 = vand.u32 2147483647, %v4680_v61  ;;  %v1828_v35 = vsel %vm1825_vm4, %v1827_v29, %v1823_v49  ;;  %v1216_v61 = vsel %vm5183_vm11, %v4803_v55, %v4955_v2  ;;  %v7207_v49 = vld [vmem:[#allocation65_spill] sm:$0xff]  ;;  %v7211_v4 = vld [vmem:[#allocation47_spill] sm:$0xff] }
 0x3ef   : > { %vm5189_vm6 = vcmp.eq.f32.partialorder %v7184_v52, 8.507059e+37  ;;  %v1773_v23 = vmul.f32 %v5038_v58, %v1772_v0  ;;  %v1808_v32 = vsel %vm5204_vm5, %v5009_v3, %v1804_v47  ;;  %v1789_v54 = vadd.f32 %v5023_v48, %v1788_v63  ;;  %v7206_v0 = vld [vmem:[#allocation57_spill] sm:$0xff] }
 0x3f0   : > { %vm5195_vm1 = vcmp.eq.f32.partialorder %v7187_v6, 8.507059e+37  ;;  %1332 = vmatpush.xpose.msra.mxu3 %v1267_v50  ;;  %1845 = vmatpush.xpose.msrb.mxu0 %v1844_v13  ;;  %vm1791_vm9 = vweird.f32 %v5023_v48  ;;  %v1252_v62 = vmul.f32 %v4580_v8, %v1251_v1  ;;  %v1236_v55 = vsel %vm5134_vm3, %v4949_v14, %v1231_v25  ;;  %v7212_v29 = vld [vmem:[#allocation61_spill] sm:$0xff]  ;;  %v7214_v13 = vld [vmem:[#allocation62_spill] sm:$0xff]  ;;  %v7240_v50 = vld [vmem:[#allocation35_spill] sm:$0xff] }
 0x3f1   : > { %v1812_v2 = vor.u32 1.1754944e-38, %v1811_v11  ;;  %v1796_v59 = vand.u32 2147483648, %v4762_v57  ;;  %v1829_v3 = vmul.f32 %v4619_v36, %v1828_v35  ;;  %vm1810_vm2 = vcmp.eq.f32.partialorder %v1809_v24, 8.507059e+37 }
 0x3f2   : > { %vm1790_vm4 = vweird.f32 %v4762_v57  ;;  %v1794_v37 = vand.u32 2147483647, %v4762_v57  ;;  %vm7192_vm13 = vweird.f32 %v4786_v30  ;;  %v1742_v22 = vsub.f32 1.0, %v1741_v20  ;;  %v7215_v20 = vld [vmem:[#allocation22_spill] sm:$0xff] }
 0x3f3   : > { %vm5238_vm11 = vmor %vm1198_vm7, %vm7192_vm13  ;;  %v1813_v56 = vsel %vm1810_vm2, %v1812_v2, %v1808_v32  ;;  %v1221_v36 = vsel %vm5159_vm8, %v4936_v9, %v1216_v61  ;;  %vm1154_vm3 = vweird.f32 %v4734_v31  ;;  %v1758_v38 = vmul.f32 %v5002_v17, %v1757_v27  ;;  %v7217_v61 = vld [vmem:[#allocation28_spill] sm:$0xff] }
 0x3f4   : > { %vm5246_vm12 = vmor %vm1790_vm4, %vm1791_vm9  ;;  %v1201_v57 = vsel %vm5238_vm11, %v4786_v30, %v4939_v42  ;;  %1333 = vmatpush.xpose.msra.mxu3 %v1252_v62  ;;  %1846 = vmatpush.xpose.msrb.mxu0 %v1829_v3  ;;  %v1774_v25 = vadd.f32 %v5038_v58, %v1773_v23  ;;  %vm1776_vm7 = vweird.f32 %v5038_v58  ;;  %v1237_v18 = vmul.f32 %v4571_v60, %v1236_v55  ;;  %v7197_v42 = vld [vmem:[#allocation36_spill] sm:$0xff]  ;;  %v7204_v60 = vld [vmem:[#allocation66_spill] sm:$0xff]  ;;  %v647_v55 = vpop.f32.mrf.mxu0 }
 0x3f5   : > { %v1793_v9 = vsel %vm5246_vm12, %v5023_v48, %v1789_v54  ;;  %v1797_v1 = vor.u32 1.1754944e-38, %v1796_v59  ;;  %vm1775_vm8 = vweird.f32 %v4715_v15  ;;  %v1781_v30 = vand.u32 2147483648, %v4715_v15  ;;  %3689 = vmatmul.msk.f32.gmra.mxu0 %vm587_vm0, %v584_v7  ;;  %v7218_v23 = vld [vmem:[#allocation64_spill] sm:$0xff]  ;;  %v7220_v54 = vld [vmem:[#allocation55_spill] sm:$0xff] }
 0x3f6   : > { %vm1153_vm5 = vweird.f32 %v7197_v42  ;;  %3955 = vrcp.f32 %v7198_v16  ;;  %v1814_v19 = vmul.f32 %v7199_v53, %v1813_v56  ;;  %vm1795_vm9 = vcmp.eq.f32.partialorder %v1794_v37, 8.507059e+37  ;;  %vm5286_vm4 = vmor %vm1775_vm8, %vm1776_vm7  ;;  %v7223_v3 = vld [vmem:[#allocation39_spill] sm:$0xff] }
 0x3f7   : > { %v1779_v48 = vand.u32 2147483647, %v4715_v15  ;;  %v7201_v41 = vand.u32 2147483647, %v7200_v33  ;;  %v7205_v12 = vsub.f32 1.0, %v7204_v60  ;;  %v1798_v43 = vsel %vm1795_vm9, %v1797_v1, %v1793_v9  ;;  %v7233_v60 = vld [vmem:[#allocation45_spill] sm:$0xff] }
 0x3f8   : > { %v1206_v47 = vsel %vm5189_vm6, %v7207_v49, %v1201_v57  ;;  %v7213_v11 = vsel %vm4916_vm15, %v7211_v4, %v7212_v29  ;;  %v1743_v52 = vmul.f32 %v4973_v34, %v1742_v22  ;;  %1334 = vmatpush.xpose.msra.mxu3 %v1237_v18  ;;  %1847 = vmatpush.xpose.msrb.mxu0 %v1814_v19  ;;  %vm1761_vm15 = vweird.f32 %v5002_v17  ;;  %v7229_v18 = vld [vmem:[#allocation26_spill] sm:$0xff] }
 0x3f9   : > { %vm5272_vm2 = vcmp.eq.f32.partialorder %v7201_v41, 8.507059e+37  ;;  %v1728_v63 = vmul.f32 %v7206_v0, %v7205_v12  ;;  %v1191_v24 = vsel %vm5195_vm1, %v7214_v13, %v7213_v11  ;;  %v1778_v10 = vsel %vm5286_vm4, %v5038_v58, %v1774_v25  ;;  %v5346_v25 = vpop.xlane.xlu1 %1575  ;;  %v7234_v12 = vld [vmem:[#allocation56_spill] sm:$0xff]  ;;  %v7236_v49 = vld [vmem:[#allocation58_spill] sm:$0xff] }
 0x3fa   : > { %v1759_v6 = vadd.f32 %v5002_v17, %v1758_v38  ;;  %v1222_v27 = vmul.f32 %v7215_v20, %v1221_v36  ;;  %v1782_v21 = vor.u32 1.1754944e-38, %v1781_v30  ;;  %vm1760_vm6 = vweird.f32 %v4710_v51  ;;  %v7227_v36 = vld [vmem:[#allocation20_spill] sm:$0xff]  ;;  %v7241_v11 = vld [vmem:[#allocation42_spill] sm:$0xff] }
 0x3fb   : > { %v1766_v35 = vand.u32 2147483648, %v4710_v51  ;;  %vm1701_vm1 = vweird.f32 %v7216_v44  ;;  %3957 = vrcp.f32 %v5146_v46  ;;  %v1799_v45 = vmul.f32 %v7217_v61, %v1798_v43  ;;  %vm5321_vm11 = vmor %vm1760_vm6, %vm1761_vm15  ;;  %v7260_v30 = vld [vmem:[#allocation18_spill] sm:$0xff]  ;;  %v7273_v61 = vld [vmem:[#allocation51_spill] sm:$0xff] }
 0x3fc   : > { %vm1780_vm13 = vcmp.eq.f32.partialorder %v1779_v48, 8.507059e+37  ;;  %v1764_v58 = vand.u32 2147483647, %v4710_v51  ;;  %v7219_v32 = vsub.f32 1.0, %v7218_v23  ;;  %3959 = vrcp.f32 %v5172_v5  ;;  %v5327_v51 = vpop.eup %3955  ;;  %1335 = vmatpush.xpose.msra.mxu3 %v1222_v27 }
 0x3fd   : > { %v1783_v2 = vsel %vm1780_vm13, %v1782_v21, %v1778_v10  ;;  %vm1731_vm12 = vweird.f32 %v7206_v0  ;;  %vm1700_vm7 = vweird.f32 %v7223_v3  ;;  %1848 = vmatpush.xpose.msrb.mxu0 %v1799_v45  ;;  %v1763_v37 = vsel %vm5321_vm11, %v5002_v17, %v1759_v6  ;;  %v7228_v17 = vld [vmem:[#allocation44_spill] sm:$0xff]  ;;  %vm5353_vm13 = vmor %vm1153_vm5, %vm1154_vm3  ;;  %v7246_v6 = vld [vmem:[#allocation19_spill] sm:$0xff] }
 0x3fe   : > { %v1713_v62 = vmul.f32 %v7220_v54, %v7219_v32  ;;  %v1744_v8 = vadd.f32 %v4973_v34, %v1743_v52  ;;  %vm1745_vm8 = vweird.f32 %v4695_v40  ;;  %vm1746_vm9 = vweird.f32 %v4973_v34  ;;  %v7252_v45 = vld [vmem:[#allocation25_spill] sm:$0xff]  ;;  %3690 = vmatmul.msk.f32.gmra.mxu0 %vm587_vm0, %v585_v28 }
 0x3ff   : > { %v7224_v22 = vand.u32 2147483647, %v7197_v42  ;;  %v1207_v14 = vmul.f32 %v7227_v36, %v1206_v47  ;;  %v1767_v57 = vor.u32 1.1754944e-38, %v1766_v35  ;;  %v1749_v38 = vand.u32 2147483647, %v4695_v40  ;;  %v694_v48 = vpop.permute.xlu0 %693  ;;  %vm5372_vm3 = vmor %vm1745_vm8, %vm1746_vm9  ;;  %v7239_v47 = vld [vmem:[#allocation59_spill] sm:$0xff]  ;;  %v650_v36 = vpop.f32.mrf.mxu0 }
 0x400   : > { %v1751_v9 = vand.u32 2147483648, %v4695_v40  ;;  %vm1686_vm15 = vweird.f32 %v7228_v17  ;;  %3961 = vrcp.f32 %v5256_v39  ;;  %v1784_v1 = vmul.f32 %v7229_v18, %v1783_v2  ;;  %v7259_v18 = vld [vmem:[#allocation60_spill] sm:$0xff] }
 0x401   : > { %vm5337_vm4 = vcmp.eq.f32.partialorder %v7224_v22, 8.507059e+37  ;;  %vm1765_vm6 = vcmp.eq.f32.partialorder %v1764_v58, 8.507059e+37  ;;  %v1729_v53 = vadd.f32 %v7206_v0, %v1728_v63  ;;  %v1104_v19 = vmul.f32 %v5327_v51, %v7198_v16  ;;  %v5384_v4 = vpop.eup %3957  ;;  %1336 = vmatpush.xpose.msra.mxu3 %v1207_v14  ;;  %v7256_v14 = vld [vmem:[#allocation50_spill] sm:$0xff] }
 0x402   : > { %v1768_v33 = vsel %vm1765_vm6, %v1767_v57, %v1763_v37  ;;  %v7235_v43 = vsel %vm4879_vm14, %v7233_v60, %v7234_v12  ;;  %v1156_v15 = vsel %vm5353_vm13, %v4734_v31, %v7239_v47  ;;  %vm1685_vm5 = vweird.f32 %v7240_v50  ;;  %1849 = vmatpush.xpose.msrb.mxu0 %v1784_v1  ;;  %v7242_v31 = vld [vmem:[#allocation32_spill] sm:$0xff]  ;;  %v5397_v10 = vpop.eup %3959  ;;  %vm5433_vm13 = vmor %vm1700_vm7, %vm1701_vm1 }
 0x403   : > { %v1176_v42 = vsel %vm5272_vm2, %v7236_v49, %v7235_v43  ;;  %v703_v29 = vadd.f32 %v694_v48, %v647_v55  ;;  %v1748_v40 = vsel %vm5372_vm3, %v4973_v34, %v1744_v8  ;;  %vm1730_vm14 = vweird.f32 %v7241_v11  ;;  %vm5471_vm1 = vmor %vm1685_vm5, %vm1686_vm15 }
 0x404   : > { %v1736_v13 = vand.u32 2147483648, %v7241_v11  ;;  %v7243_v7 = vand.u32 2147483647, %v7242_v31  ;;  %v1192_v20 = vmul.f32 %v7246_v6, %v1191_v24  ;;  %v1752_v27 = vor.u32 1.1754944e-38, %v1751_v9  ;;  %vm5402_vm11 = vmor %vm1730_vm14, %vm1731_vm12  ;;  %v7267_v31 = vld [vmem:[#allocation43_spill] sm:$0xff] }
 0x405   : > { %v1734_v34 = vand.u32 2147483647, %v7241_v11  ;;  %vm1716_vm8 = vweird.f32 %v7220_v54  ;;  %v7249_v35 = vand.u32 2147483647, %v7223_v3  ;;  %1865 = vxpose.xlu1.b32.start.end [1/1] (short) %v703_v29, 128  ;;  %v1769_v24 = vmul.f32 %v7252_v45, %v1768_v33 }
 0x406   : > { %vm5393_vm2 = vcmp.eq.f32.partialorder %v7243_v7, 8.507059e+37  ;;  %vm1750_vm6 = vcmp.eq.f32.partialorder %v1749_v38, 8.507059e+37  ;;  %v1733_v58 = vsel %vm5402_vm11, %v7206_v0, %v1729_v53  ;;  %v1714_v23 = vadd.f32 %v7220_v54, %v1713_v62  ;;  %v5423_v59 = vpop.eup %3961  ;;  %1337 = vmatpush.xpose.msra.mxu3 %v1192_v20  ;;  %v7253_v0 = vld [vmem:[#allocation41_spill] sm:$0xff]  ;;  %v7268_v7 = vld [vmem:[#allocation52_spill] sm:$0xff] }
 0x407   : > { %vm5410_vm9 = vcmp.eq.f32.partialorder %v7249_v35, 8.507059e+37  ;;  %v1105_v32 = vsub.f32 1.0, %v1104_v19  ;;  %v1666_v55 = vmul.f32 %v5384_v4, %v5146_v46  ;;  %3963 = vrcp.f32 %v5279_v26  ;;  %1850 = vmatpush.xpose.msrb.mxu0 %v1769_v24  ;;  %v7261_v19 = vld [vmem:[#allocation24_spill] sm:$0xff]  ;;  %v699_v43 = vpop.permute.xlu0 %698 }
 0x408   : > { %v1753_v2 = vsel %vm1750_vm6, %v1752_v27, %v1748_v40  ;;  %v1089_v37 = vmul.f32 %v5397_v10, %v5172_v5  ;;  %v1737_v8 = vor.u32 1.1754944e-38, %v1736_v13  ;;  %vm1715_vm12 = vweird.f32 %v7253_v0  ;;  %v7265_v40 = vld [vmem:[#allocation16_spill] sm:$0xff]  ;;  %v7271_v27 = vld [vmem:[#allocation54_spill] sm:$0xff] }
 0x409   : > { %v1721_v62 = vand.u32 2147483648, %v7253_v0  ;;  %v1161_v57 = vsel %vm5337_vm4, %v7256_v14, %v1156_v15  ;;  %vm1735_vm3 = vcmp.eq.f32.partialorder %v1734_v34, 8.507059e+37  ;;  %vm5442_vm14 = vmor %vm1715_vm12, %vm1716_vm8  ;;  %v1719_v9 = vand.u32 2147483647, %v7253_v0  ;;  %v7270_v20 = vld [vmem:[#allocation48_spill] sm:$0xff]  ;;  %v7272_v34 = vld [vmem:[#allocation23_spill] sm:$0xff] }
 0x40a   : > { %v1703_v1 = vsel %vm5433_vm13, %v7216_v44, %v7259_v18  ;;  %v1177_v53 = vmul.f32 %v7260_v30, %v1176_v42  ;;  %v1754_v48 = vmul.f32 %v7261_v19, %v1753_v2  ;;  %v1738_v56 = vsel %vm1735_vm3, %v1737_v8, %v1733_v58  ;;  %v586_v44 = vld [vmem:[%s6995_s2 + $0x58] sm:$0xff]  ;;  %v5463_v42 = vpop.xlane.xlu1 %1573  ;;  %v7276_v0 = vld [vmem:[#allocation14_spill] sm:$0xff] }
 0x40b   : > { %v1718_v33 = vsel %vm5442_vm14, %v7220_v54, %v1714_v23  ;;  %v1106_v41 = vmul.f32 %v5327_v51, %v1105_v32  ;;  %v1667_v60 = vsub.f32 1.0, %v1666_v55  ;;  %v1651_v12 = vmul.f32 %v5423_v59, %v5256_v39  ;;  %3691 = vmatmul.msk.f32.gmra.mxu0 %vm587_vm0, %v586_v44  ;;  %v7274_v55 = vld [vmem:[#allocation13_spill] sm:$0xff] }
 0x40c   : > { %3965 = vrcp.f32 %v5346_v25  ;;  %v1090_v49 = vsub.f32 1.0, %v1089_v37  ;;  %v704_v63 = vadd.f32 %v699_v43, %v650_v36  ;;  %1338 = vmatpush.xpose.msra.mxu3 %v1177_v53  ;;  %1851 = vmatpush.xpose.msrb.mxu0 %v1754_v48  ;;  %v1722_v54 = vor.u32 1.1754944e-38, %v1721_v62  ;;  %v7277_v36 = vld [vmem:[#allocation49_spill] sm:$0xff] }
 0x40d   : > { %v7262_v47 = vand.u32 2147483648, %v7223_v3  ;;  %v5475_v29 = vpop.eup %3963  ;;  %v1162_v11 = vmul.f32 %v7265_v40, %v1161_v57  ;;  %v7269_v6 = vsel %vm4825_vm10, %v7267_v31, %v7268_v7  ;;  %vm1720_vm7 = vcmp.eq.f32.partialorder %v1719_v9, 8.507059e+37  ;;  %v7278_v57 = vld [vmem:[#allocation21_spill] sm:$0xff] }
 0x40e   : > { %v1146_v3 = vsel %vm5393_vm2, %v7270_v20, %v7269_v6  ;;  %v1688_v21 = vsel %vm5471_vm1, %v7228_v17, %v7271_v27  ;;  %2382 = vxpose.xlu0.b32.start.end [1/1] (short) %v704_v63, 128  ;;  %v1739_v35 = vmul.f32 %v7272_v34, %v1738_v56  ;;  %v1723_v45 = vsel %vm1720_vm7, %v1722_v54, %v1718_v33  ;;  %v7279_v9 = vld [vmem:[#allocation17_spill] sm:$0xff]  ;;  %v7287_v6 = vld [vmem:[#allocation15_spill] sm:$0xff]  ;;  %v7300_v54 = vld [vmem:[#allocation8_spill] sm:$0xff] }
 0x40f   : > { %v1707_v15 = vor.u32 1.1754944e-38, %v7262_v47  ;;  %vm1109_vm4 = vweird.f32 %v5327_v51  ;;  %v1668_v52 = vmul.f32 %v5384_v4, %v1667_v60  ;;  %v1652_v58 = vsub.f32 1.0, %v1651_v12  ;;  %v7286_v31 = vld [vmem:[#allocation29_spill] sm:$0xff] }
 0x410   : > { %3967 = vrcp.f32 %v5463_v42  ;;  %v1107_v23 = vadd.f32 %v5327_v51, %v1106_v41  ;;  %v1091_v17 = vmul.f32 %v5397_v10, %v1090_v49  ;;  %v1636_v32 = vmul.f32 %v5475_v29, %v5279_v26  ;;  %1339 = vmatpush.xpose.msra.mxu3 %v1162_v11  ;;  %1852 = vmatpush.xpose.msrb.mxu0 %v1739_v35  ;;  %v734_v35 = vpop.permute.xlu0 %733 }
 0x411   : > { %v1708_v24 = vsel %vm5410_vm9, %v1707_v15, %v1703_v1  ;;  %v1132_v2 = vmul.f32 %v7274_v55, %v7273_v61  ;;  %v7275_v37 = vand.u32 2147483647, %v7240_v50  ;;  %v1147_v62 = vmul.f32 %v7276_v0, %v1146_v3  ;;  %v7292_v55 = vld [vmem:[#allocation7_spill] sm:$0xff] }
 0x412   : > { %v5505_v8 = vpop.eup %3965  ;;  %vm1108_vm15 = vweird.f32 %v7198_v16  ;;  %v1114_v22 = vand.u32 2147483648, %v7198_v16  ;;  %v1724_v38 = vmul.f32 %v7278_v57, %v1723_v45  ;;  %v1709_v18 = vmul.f32 %v7279_v9, %v1708_v24  ;;  %v7296_v9 = vld [vmem:[#allocation31_spill] sm:$0xff] }
 0x413   : > { %vm1690_vm10 = vcmp.eq.f32.partialorder %v7275_v37, 8.507059e+37  ;;  %vm5515_vm5 = vmor %vm1108_vm15, %vm1109_vm4  ;;  %v1112_v50 = vand.u32 2147483647, %v7198_v16  ;;  %v1676_v30 = vand.u32 2147483648, %v5146_v46  ;;  %v1653_v53 = vmul.f32 %v5423_v59, %v1652_v58  ;;  %v744_v58 = vpop.permute.xlu1 %743 }
 0x414   : > { %v1693_v14 = vsel %vm1690_vm10, %v7277_v36, %v1688_v21  ;;  %v1111_v19 = vsel %vm5515_vm5, %v5327_v51, %v1107_v23  ;;  %v1669_v48 = vadd.f32 %v5384_v4, %v1668_v52  ;;  %vm1671_vm2 = vweird.f32 %v5384_v4  ;;  %1340 = vmatpush.xpose.msra.mxu3 %v1147_v62  ;;  %1853 = vmatpush.xpose.msrb.mxu0 %v1724_v38  ;;  %v7290_v23 = vld [vmem:[#allocation33_spill] sm:$0xff] }
 0x415   : > { %v1621_v56 = vmul.f32 %v5505_v8, %v5346_v25  ;;  %v1637_v33 = vsub.f32 1.0, %v1636_v32  ;;  %v1092_v16 = vadd.f32 %v5397_v10, %v1091_v17  ;;  %vm1094_vm11 = vweird.f32 %v5397_v10  ;;  %v7291_v32 = vld [vmem:[#allocation30_spill] sm:$0xff] }
 0x416   : > { %v5531_v41 = vpop.eup %3967  ;;  %v1115_v60 = vor.u32 1.1754944e-38, %v1114_v22  ;;  %v1099_v12 = vand.u32 2147483648, %v5172_v5  ;;  %vm1670_vm8 = vweird.f32 %v5146_v46  ;;  %v1674_v51 = vand.u32 2147483647, %v5146_v46 }
 0x417   : > { %vm1113_vm9 = vcmp.eq.f32.partialorder %v1112_v50, 8.507059e+37  ;;  %vm1093_vm6 = vweird.f32 %v5172_v5  ;;  %v1097_v43 = vand.u32 2147483647, %v5172_v5  ;;  %vm5540_vm12 = vmor %vm1670_vm8, %vm1671_vm2  ;;  %v1677_v49 = vor.u32 1.1754944e-38, %v1676_v30 }
 0x418   : > { %v1116_v63 = vsel %vm1113_vm9, %v1115_v60, %v1111_v19  ;;  %vm5544_vm13 = vmor %vm1093_vm6, %vm1094_vm11  ;;  %v1673_v46 = vsel %vm5540_vm12, %v5384_v4, %v1669_v48  ;;  %v1654_v47 = vadd.f32 %v5423_v59, %v1653_v53  ;;  %vm1656_vm3 = vweird.f32 %v5423_v59  ;;  %1341 = vmatpush.xpose.msra.mxu3 %v1132_v2  ;;  %1854 = vmatpush.xpose.msrb.mxu0 %v1709_v18  ;;  %v7297_v48 = vld [vmem:[#allocation37_spill] sm:$0xff]  ;;  %v7298_v60 = vld [vmem:[#allocation34_spill] sm:$0xff] }
 0x419   : > { %v1622_v5 = vsub.f32 1.0, %v1621_v56  ;;  %v1638_v15 = vmul.f32 %v5475_v29, %v1637_v33  ;;  %v1606_v28 = vmul.f32 %v5531_v41, %v5463_v42  ;;  %v1096_v40 = vsel %vm5544_vm13, %v5397_v10, %v1092_v16 }
 0x41a   : > { %v1100_v11 = vor.u32 1.1754944e-38, %v1099_v12  ;;  %vm1655_vm14 = vweird.f32 %v5256_v39  ;;  %v1659_v4 = vand.u32 2147483647, %v5256_v39  ;;  %v1661_v13 = vand.u32 2147483648, %v5256_v39 }
 0x41b   : > { %v1117_v7 = vmul.f32 %v7286_v31, %v1116_v63  ;;  %v1694_v20 = vmul.f32 %v7287_v6, %v1693_v14  ;;  %vm1098_vm1 = vcmp.eq.f32.partialorder %v1097_v43, 8.507059e+37  ;;  %vm1675_vm7 = vcmp.eq.f32.partialorder %v1674_v51, 8.507059e+37  ;;  %vm5566_vm4 = vmor %vm1655_vm14, %vm1656_vm3  ;;  %v739_v43 = vpop.permute.xlu0 %738  ;;  %v749_v44 = vpop.permute.xlu1 %748 }
 0x41c   : > { %v1101_v10 = vsel %vm1098_vm1, %v1100_v11, %v1096_v40  ;;  %v1678_v27 = vsel %vm1675_vm7, %v1677_v49, %v1673_v46  ;;  %v1658_v21 = vsel %vm5566_vm4, %v5423_v59, %v1654_v47  ;;  %v1623_v39 = vmul.f32 %v5505_v8, %v1622_v5  ;;  %v7299_v49 = vld [vmem:[#allocation38_spill] sm:$0xff] }
 0x41d   : > { %v1607_v34 = vsub.f32 1.0, %v1606_v28  ;;  %1342 = vmatpush.xpose.msra.mxu3 %v1117_v7  ;;  %1855 = vmatpush.xpose.msrb.mxu0 %v1694_v20  ;;  %v1639_v45 = vadd.f32 %v5475_v29, %v1638_v15  ;;  %vm1641_vm10 = vweird.f32 %v5475_v29  ;;  %vm1660_vm15 = vcmp.eq.f32.partialorder %v1659_v4, 8.507059e+37  ;;  %v7301_v47 = vld [vmem:[#allocation10_spill] sm:$0xff] }
 0x41e   : > { %v1662_v24 = vor.u32 1.1754944e-38, %v1661_v13  ;;  %v1646_v52 = vand.u32 2147483648, %v5279_v26  ;;  %v1102_v17 = vmul.f32 %v7290_v23, %v1101_v10  ;;  %v1679_v61 = vmul.f32 %v7291_v32, %v1678_v27 }
 0x41f   : > { %vm1640_vm5 = vweird.f32 %v5279_v26  ;;  %v1644_v59 = vand.u32 2147483647, %v5279_v26  ;;  %v809_v2 = vadd.f32 %v7292_v55, %v734_v35  ;;  %v1608_v62 = vmul.f32 %v5531_v41, %v1607_v34  ;;  %v7295_v26 = vld [vmem:[#allocation9_spill] sm:$0xff] }
 0x420   : > { %v1663_v37 = vsel %vm1660_vm15, %v1662_v24, %v1658_v21  ;;  %vm5582_vm2 = vmor %vm1640_vm5, %vm1641_vm10  ;;  %v1624_v36 = vadd.f32 %v5505_v8, %v1623_v39  ;;  %vm1626_vm11 = vweird.f32 %v5505_v8  ;;  %v815_v14 = vadd.f32 %v7295_v26, %v744_v58 }
 0x421   : > { %1343 = vmatpush.xpose.msra.mxu3 %v1102_v17  ;;  %1856 = vmatpush.xpose.msrb.mxu0 %v1679_v61  ;;  %v1643_v22 = vsel %vm5582_vm2, %v5475_v29, %v1639_v45  ;;  %v1647_v57 = vor.u32 1.1754944e-38, %v1646_v52  ;;  %v1631_v38 = vand.u32 2147483648, %v5346_v25  ;;  %v1664_v18 = vmul.f32 %v7296_v9, %v1663_v37 }
 0x422   : > { %vm1645_vm8 = vcmp.eq.f32.partialorder %v1644_v59, 8.507059e+37  ;;  %vm1625_vm9 = vweird.f32 %v5346_v25  ;;  %v1629_v1 = vand.u32 2147483647, %v5346_v25  ;;  %v1609_v30 = vadd.f32 %v5531_v41, %v1608_v62 }
 0x423   : > { %v1648_v50 = vsel %vm1645_vm8, %v1647_v57, %v1643_v22  ;;  %vm1627_vm6 = vmor %vm1625_vm9, %vm1626_vm11  ;;  %vm1611_vm12 = vweird.f32 %v5531_v41  ;;  %v1632_v53 = vor.u32 1.1754944e-38, %v1631_v38  ;;  %v1616_v19 = vand.u32 2147483648, %v5463_v42 }
 0x424   : > { %1344 = vmatmul.f32.vlgmr.msra.gmra.mxu3 %v815_v14  ;;  %v1628_v29 = vsel %vm1627_vm6, %v5505_v8, %v1624_v36  ;;  %v1649_v56 = vmul.f32 %v7297_v48, %v1648_v50  ;;  %vm1630_vm13 = vcmp.eq.f32.partialorder %v1629_v1, 8.507059e+37  ;;  %vm1610_vm3 = vweird.f32 %v5463_v42 }
 0x425   : > { %1960 = vmatpush.msrb.mxu3 %v809_v2  ;;  %1857 = vmatpush.xpose.msrb.mxu0 %v1664_v18  ;;  %v1614_v25 = vand.u32 2147483647, %v5463_v42  ;;  %v1633_v33 = vsel %vm1630_vm13, %v1632_v53, %v1628_v29  ;;  %vm1612_vm14 = vmor %vm1610_vm3, %vm1611_vm12  ;;  %v1617_v8 = vor.u32 1.1754944e-38, %v1616_v19  ;;  %v812_v46 = vadd.f32 %v7300_v54, %v739_v43 }
 0x426   : > { %v1613_v16 = vsel %vm1612_vm14, %v5531_v41, %v1609_v30  ;;  %v1634_v12 = vmul.f32 %v7298_v60, %v1633_v33  ;;  %v818_v42 = vadd.f32 %v7301_v47, %v749_v44  ;;  %vm7302_vm7 = vcmask 64512  }
 0x427   : > { %vm1615_vm1 = vcmp.eq.f32.partialorder %v1614_v25, 8.507059e+37  ;;  %vm7303_vm4 = vmmov %vm7302_vm7 }
 0x428   : > { %v1618_v51 = vsel %vm1615_vm1, %v1617_v8, %v1613_v16  ;;  %vm7304_vm10 = vmmov %vm7303_vm4  ;;  %v5620_v20 = vpop.f32.mrf.mxu0 }
 0x429   : > { %1858 = vmatpush.xpose.msrb.mxu0 %v1649_v56  ;;  %v1619_v63 = vmul.f32 %v7299_v49, %v1618_v51  ;;  %vm7305_vm15 = vmmov %vm7303_vm4  ;;  %7313 = vst [vmem:[#allocation36_spill] sm:$0xff] %v5620_v20 }
 0x42a   : > { %vm7306_vm5 = vmmov %vm7303_vm4 }
 0x42b   : > { %vm7307_vm2 = vmmov %vm7303_vm4 }
 0x42c   : > { %vm7308_vm11 = vmmov %vm7307_vm2 }
 0x42d   : > { %1859 = vmatpush.xpose.msrb.mxu0 %v1634_v12  ;;  %vm7309_vm8 = vmmov %vm7307_vm2 }
 0x42e   : > { %vm7310_vm9 = vmmov %vm7307_vm2 }
 0x42f   : > { %vm7311_vm6 = vmmov %vm7307_vm2 }
 0x430   : > { %vm7312_vm12 = vmmov %vm7307_vm2 }
 0x431   : > { %1860 = vmatpush.xpose.msrb.mxu0 %v1619_v63  ;;  %vm7314_vm13 = vmmov %vm7307_vm2 }
 0x432   : > { %vm7315_vm3 = vmmov %vm7307_vm2 }
 0x433   : > { %vm7317_vm14 = vmmov %vm7307_vm2 }
 0x434   : > { %1861 = vmatmul.f32.vlgmr.msrb.gmra.mxu0 %v818_v42  ;;  %vm7318_vm1 = vmmov %vm7307_vm2 }
 0x435   : > { %2477 = vmatpush.msra.mxu0 %v812_v46 }
 0x44e   : > { %v5624_v27 = vpop.f32.mrf.mxu0 }
 0x44f   : > { %7316 = vst [vmem:[#allocation68_spill] sm:$0xff] %v5624_v27 }
 0x456   : > { %v5628_v45 = vpop.f32.mrf.mxu0 }
 0x457   : > { %7319 = vst [vmem:[#allocation27_spill] sm:$0xff] %v5628_v45 }
 0x462   : > { %v5634_v58 = vpop.f32.mrf.mxu0 }
 0x463   : > { %7324 = vst [vmem:[#allocation40_spill] sm:$0xff] %v5634_v58  ;;  %v3052_v58 = vld [vmem:[%s7002_s9 + $0x18] sm:$0xff] }
 0x46a   : > { %v5638_v32 = vpop.f32.mrf.mxu0 }
 0x46b   : > { %7327 = vst [vmem:[#allocation66_spill] sm:$0xff] %v5638_v32 }
 0x472   : > { %v5642_v55 = vpop.f32.mrf.mxu0 }
 0x473   : > { %7330 = vst [vmem:[#allocation57_spill] sm:$0xff] %v5642_v55 }
 0x47b   : > { %v5648_v22 = vpop.f32.mrf.mxu0 }
 0x47c   : > { %7335 = vst [vmem:[#allocation65_spill] sm:$0xff] %v5648_v22 }
 0x488   : > { %v5652_v14 = vpop.f32.mrf.mxu0 }
 0x489   : > { %7338 = vst [vmem:[#allocation67_spill] sm:$0xff] %v5652_v14 }
 0x4a7   : > { %v5655_v38 = vpop.f32.mrf.mxu3 }
 0x4a8   : > { %7339 = vst [vmem:[#allocation47_spill] sm:$0xff] %v5655_v38 }
 0x4a9   : > { %v1881_v5 = vpop.trf.xlu1 }
 0x4aa   : > { %3732 = vmatmul.msk.f32.vlgmr.msrb.gmra.mxu3 %vm7302_vm7, %v1881_v5  ;;  %vm7320_vm7 = vmmov %vm7318_vm1 }
 0x4b1   : > { %v1882_v41 = vpop.trf.xlu1  ;;  %v5657_v9 = vpop.f32.mrf.mxu0 }
 0x4b2   : > { %v2398_v15 = vpop.trf.xlu0  ;;  %3733 = vmatmul.msk.f32.gmra.mxu3 %vm7303_vm4, %v1882_v41  ;;  %vm7321_vm4 = vmmov %vm7318_vm1  ;;  %7340 = vst [vmem:[#allocation61_spill] sm:$0xff] %v5657_v9  ;;  %v7341_v41 = vld [vmem:[#allocation6_spill] sm:$0xff] }
 0x4b3   : > { %3748 = vmatmul.msk.f32.vlgmr.msra.gmra.mxu0 %vm7304_vm10, %v2398_v15  ;;  %vm7322_vm10 = vmmov %vm7318_vm1 }
 0x4b9   : > { %v1883_v28 = vpop.trf.xlu1 }
 0x4ba   : > { %v2399_v40 = vpop.trf.xlu0  ;;  %3734 = vmatmul.msk.f32.gmra.mxu3 %vm7305_vm15, %v1883_v28  ;;  %vm7323_vm15 = vmmov %vm7318_vm1 }
 0x4bb   : > { %3749 = vmatmul.msk.f32.gmra.mxu0 %vm7306_vm5, %v2399_v40  ;;  %vm7325_vm5 = vmmov %vm7318_vm1 }
 0x4c1   : > { %v1884_v11 = vpop.trf.xlu1 }
 0x4c2   : > { %v2400_v4 = vpop.trf.xlu0  ;;  %3735 = vmatmul.msk.f32.gmra.mxu3 %vm7307_vm2, %v1884_v11  ;;  %vm7326_vm2 = vmmov %vm7318_vm1 }
 0x4c3   : > { %3750 = vmatmul.msk.f32.gmra.mxu0 %vm7308_vm11, %v2400_v4  ;;  %vm7328_vm11 = vmmov %vm7318_vm1 }
 0x4c9   : > { %v1885_v13 = vpop.trf.xlu1 }
 0x4ca   : > { %v2401_v31 = vpop.trf.xlu0  ;;  %3736 = vmatmul.msk.f32.gmra.mxu3 %vm7309_vm8, %v1885_v13  ;;  %vm7329_vm8 = vmmov %vm7318_vm1 }
 0x4cb   : > { %3751 = vmatmul.msk.f32.gmra.mxu0 %vm7310_vm9, %v2401_v31  ;;  %vm7331_vm9 = vmmov %vm7318_vm1 }
 0x4d1   : > { %v1886_v7 = vpop.trf.xlu1 }
 0x4d2   : > { %v2402_v6 = vpop.trf.xlu0  ;;  %3737 = vmatmul.msk.f32.gmra.mxu3 %vm7311_vm6, %v1886_v7  ;;  %vm7332_vm6 = vmmov %vm7318_vm1 }
 0x4d3   : > { %3752 = vmatmul.msk.f32.gmra.mxu0 %vm7312_vm12, %v2402_v6  ;;  %vm7333_vm12 = vmmov %vm7318_vm1 }
 0x4d9   : > { %v1887_v3 = vpop.trf.xlu1 }
 0x4da   : > { %v2403_v10 = vpop.trf.xlu0  ;;  %3738 = vmatmul.msk.f32.gmra.mxu3 %vm7314_vm13, %v1887_v3  ;;  %vm7334_vm13 = vmmov %vm7318_vm1 }
 0x4db   : > { %3753 = vmatmul.msk.f32.gmra.mxu0 %vm7315_vm3, %v2403_v10  ;;  %vm7336_vm3 = vmmov %vm7318_vm1 }
 0x4e1   : > { %v1888_v21 = vpop.trf.xlu1 }
 0x4e2   : > { %v2404_v39 = vpop.trf.xlu0  ;;  %3739 = vmatmul.msk.f32.gmra.mxu3 %vm7317_vm14, %v1888_v21  ;;  %vm7337_vm14 = vmmov %vm7318_vm1 }
 0x4e3   : > { %3754 = vmatmul.msk.f32.gmra.mxu0 %vm7318_vm1, %v2404_v39 }
 0x4e9   : > { %v1889_v34 = vpop.trf.xlu1 }
 0x4ea   : > { %v2405_v35 = vpop.trf.xlu0  ;;  %3740 = vmatmul.msk.f32.gmra.mxu3 %vm7320_vm7, %v1889_v34  ;;  %vm7342_vm7 = vmmov %vm7318_vm1 }
 0x4eb   : > { %3755 = vmatmul.msk.f32.gmra.mxu0 %vm7321_vm4, %v2405_v35  ;;  %vm7343_vm4 = vmmov %vm7318_vm1 }
 0x4f1   : > { %v1890_v24 = vpop.trf.xlu1 }
 0x4f2   : > { %v2406_v52 = vpop.trf.xlu0  ;;  %3741 = vmatmul.msk.f32.gmra.mxu3 %vm7322_vm10, %v1890_v24 }
 0x4f3   : > { %3756 = vmatmul.msk.f32.gmra.mxu0 %vm7323_vm15, %v2406_v52 }
 0x4f9   : > { %v1891_v23 = vpop.trf.xlu1 }
 0x4fa   : > { %v2407_v17 = vpop.trf.xlu0  ;;  %3742 = vmatmul.msk.f32.gmra.mxu3 %vm7325_vm5, %v1891_v23 }
 0x4fb   : > { %3757 = vmatmul.msk.f32.gmra.mxu0 %vm7326_vm2, %v2407_v17 }
 0x501   : > { %v1892_v61 = vpop.trf.xlu1 }
 0x502   : > { %v2408_v59 = vpop.trf.xlu0  ;;  %3743 = vmatmul.msk.f32.gmra.mxu3 %vm7328_vm11, %v1892_v61 }
 0x503   : > { %3758 = vmatmul.msk.f32.gmra.mxu0 %vm7329_vm8, %v2408_v59 }
 0x509   : > { %v1893_v2 = vpop.trf.xlu1 }
 0x50a   : > { %v2409_v37 = vpop.trf.xlu0  ;;  %3744 = vmatmul.msk.f32.gmra.mxu3 %vm7331_vm9, %v1893_v2 }
 0x50b   : > { %3759 = vmatmul.msk.f32.gmra.mxu0 %vm7332_vm6, %v2409_v37 }
 0x511   : > { %v1894_v0 = vpop.trf.xlu1 }
 0x512   : > { %v2410_v62 = vpop.trf.xlu0  ;;  %3745 = vmatmul.msk.f32.gmra.mxu3 %vm7333_vm12, %v1894_v0 }
 0x513   : > { %3760 = vmatmul.msk.f32.gmra.mxu0 %vm7334_vm13, %v2410_v62 }
 0x519   : > { %v1895_v36 = vpop.trf.xlu1 }
 0x51a   : > { %v2411_v26 = vpop.trf.xlu0  ;;  %3746 = vmatmul.msk.f32.gmra.mxu3 %vm7336_vm3, %v1895_v36 }
 0x51b   : > { %3761 = vmatmul.msk.f32.gmra.mxu0 %vm7337_vm14, %v2411_v26 }
 0x521   : > { %v1896_v23 = vpop.trf.xlu1 }
 0x522   : > { %v2412_v57 = vpop.trf.xlu0  ;;  %3747 = vmatmul.msk.f32.gmra.mxu3 %vm7343_vm4, %v1896_v23 }
 0x523   : > { %3762 = vmatmul.msk.f32.gmra.mxu0 %vm7318_vm1, %v2412_v57 }
 0x52a   : > { %v2413_v35 = vpop.trf.xlu0 }
 0x52b   : > { %3763 = vmatmul.msk.f32.gmra.mxu0 %vm7342_vm7, %v2413_v35 }
 0x52d   : > { %v1962_v18 = vpop.f32.mrf.mxu3 }
 0x52e   : > { %v5682_v11 = vadd.f32 %v1962_v18, %v7341_v41 }
 0x530   : > { %v2479_v1 = vpop.f32.mrf.mxu0 }
 0x531   : > { %v5715_v24 = vadd.f32 %v2479_v1, %v7341_v41 }
 0x535   : > { %v5659_v50 = vpop.f32.mrf.mxu3 }
 0x538   : > { %v2482_v29 = vpop.f32.mrf.mxu0 }
 0x539   : > { %v5706_v39 = vadd.f32 %v2482_v29, %v7341_v41 }
 0x53d   : > { %v5661_v30 = vpop.f32.mrf.mxu3 }
 0x540   : > { %v2485_v53 = vpop.f32.mrf.mxu0 }
 0x541   : > { %v5698_v10 = vadd.f32 %v2485_v53, %v7341_v41 }
 0x545   : > { %v5663_v19 = vpop.f32.mrf.mxu3 }
 0x548   : > { %v5665_v48 = vpop.f32.mrf.mxu0 }
 0x54d   : > { %v5667_v56 = vpop.f32.mrf.mxu3 }
 0x54e   : > { %v5765_v53 = vadd.f32 %v5667_v56, %v7341_v41 }
 0x550   : > { %v5669_v25 = vpop.f32.mrf.mxu0 }
 0x555   : > { %v5671_v33 = vpop.f32.mrf.mxu3 }
 0x556   : > { %v5752_v57 = vadd.f32 %v5671_v33, %v7341_v41 }
 0x558   : > { %v5673_v16 = vpop.f32.mrf.mxu0 }
 0x559   : > { %v5782_v56 = vadd.f32 %v5673_v16, %v7341_v41  ;;  %v5797_v16 = vadd.f32 %v5659_v50, %v7341_v41 }
 0x55d   : > { %v1980_v8 = vpop.f32.mrf.mxu3 }
 0x55e   : > { %v5743_v36 = vadd.f32 %v1980_v8, %v7341_v41 }
 0x560   : > { %v5675_v60 = vpop.f32.mrf.mxu0 }
 0x561   : > { %v5772_v33 = vadd.f32 %v5675_v60, %v7341_v41  ;;  %v5787_v60 = vadd.f32 %v5661_v30, %v7341_v41  ;;  %v5802_v30 = vadd.f32 %v5665_v48, %v7341_v41 }
 0x565   : > { %v1983_v12 = vpop.f32.mrf.mxu3 }
 0x566   : > { %v1984_v0 = vadd.f32 %v1983_v12, %v7341_v41 }
 0x568   : > { %v2500_v51 = vpop.f32.mrf.mxu0 }
 0x569   : > { %v5758_v1 = vadd.f32 %v2500_v51, %v7341_v41  ;;  %v5777_v51 = vadd.f32 %v5663_v19, %v7341_v41  ;;  %v5792_v19 = vadd.f32 %v5669_v25, %v7341_v41 }
 0x56d   : > { %v1986_v43 = vpop.f32.mrf.mxu3 }
 0x56e   : > { %v1987_v2 = vadd.f32 %v1986_v43, %v7341_v41 }
 0x570   : > { %v2503_v44 = vpop.f32.mrf.mxu0 }
 0x571   : > { %v5747_v26 = vadd.f32 %v2503_v44, %v7341_v41 }
 0x575   : > { %v1989_v49 = vpop.f32.mrf.mxu3 }
 0x576   : > { %v5728_v61 = vadd.f32 %v1989_v49, %v7341_v41 }
 0x578   : > { %v2506_v63 = vpop.f32.mrf.mxu0 }
 0x579   : > { %v2507_v62 = vadd.f32 %v2506_v63, %v7341_v41 }
 0x57d   : > { %v1992_v54 = vpop.f32.mrf.mxu3 }
 0x57e   : > { %v5718_v52 = vadd.f32 %v1992_v54, %v7341_v41 }
 0x580   : > { %v2509_v46 = vpop.f32.mrf.mxu0 }
 0x581   : > { %v5737_v37 = vadd.f32 %v2509_v46, %v7341_v41 }
 0x585   : > { %v1995_v47 = vpop.f32.mrf.mxu3 }
 0x586   : > { %v5701_v21 = vadd.f32 %v1995_v47, %v7341_v41 }
 0x588   : > { %v2512_v42 = vpop.f32.mrf.mxu0 }
 0x589   : > { %v5732_v59 = vadd.f32 %v2512_v42, %v7341_v41 }
 0x58d   : > { %v1998_v5 = vpop.f32.mrf.mxu3 }
 0x58e   : > { %v5678_v15 = vadd.f32 %v1998_v5, %v7341_v41 }
 0x590   : > { %v2515_v28 = vpop.f32.mrf.mxu0  ;;  %2034 = vmax.xlane.f32.xlu1 %v5678_v15 }
 0x591   : > { %v5724_v17 = vadd.f32 %v2515_v28, %v7341_v41 }
 0x595   : > { %v2001_v40 = vpop.f32.mrf.mxu3 }
 0x596   : > { %v5685_v4 = vadd.f32 %v2001_v40, %v7341_v41 }
 0x598   : > { %v2518_v13 = vpop.f32.mrf.mxu0  ;;  %2010 = vmax.xlane.f32.xlu1 %v5682_v11  ;;  %2036 = vmax.xlane.f32.xlu2 %v5685_v4 }
 0x599   : > { %v5709_v34 = vadd.f32 %v2518_v13, %v7341_v41 }
 0x59d   : > { %v2004_v31 = vpop.f32.mrf.mxu3 }
 0x59e   : > { %v5690_v7 = vadd.f32 %v2004_v31, %v7341_v41 }
 0x5a0   : > { %v2521_v6 = vpop.f32.mrf.mxu0  ;;  %2038 = vmax.xlane.f32.xlu0 %v5690_v7 }
 0x5a1   : > { %v5693_v3 = vadd.f32 %v2521_v6, %v7341_v41 }
 0x5a3   : > { %2555 = vmax.xlane.f32.xlu2 %v5693_v3 }
 0x5a5   : > { %v2007_v50 = vpop.f32.mrf.mxu3 }
 0x5a6   : > { %v5813_v48 = vadd.f32 %v2007_v50, %v7341_v41 }
 0x5a8   : > { %2531 = vmax.xlane.f32.xlu0 %v5698_v10  ;;  %v2524_v25 = vpop.f32.mrf.mxu0 }
 0x5a9   : > { %v5806_v5 = vadd.f32 %v2524_v25, %v7341_v41 }
 0x5ab   : > { %2032 = vmax.xlane.f32.xlu2 %v5701_v21 }
 0x5b0   : > { %2529 = vmax.xlane.f32.xlu0 %v5706_v39 }
 0x5b3   : > { %2553 = vmax.xlane.f32.xlu2 %v5709_v34 }
 0x5b8   : > { %2527 = vmax.xlane.f32.xlu0 %v5715_v24 }
 0x5bb   : > { %2030 = vmax.xlane.f32.xlu2 %v5718_v52 }
 0x5c3   : > { %2551 = vmax.xlane.f32.xlu2 %v5724_v17 }
 0x5cb   : > { %2028 = vmax.xlane.f32.xlu2 %v5728_v61 }
 0x5d3   : > { %2549 = vmax.xlane.f32.xlu2 %v5732_v59 }
 0x5db   : > { %2026 = vmax.xlane.f32.xlu2 %v1987_v2 }
 0x5e3   : > { %2547 = vmax.xlane.f32.xlu2 %v5737_v37 }
 0x5eb   : > { %2024 = vmax.xlane.f32.xlu2 %v1984_v0 }
 0x5f3   : > { %2545 = vmax.xlane.f32.xlu2 %v2507_v62 }
 0x5fb   : > { %2022 = vmax.xlane.f32.xlu2 %v5743_v36 }
 0x603   : > { %2543 = vmax.xlane.f32.xlu2 %v5747_v26 }
 0x60b   : > { %2020 = vmax.xlane.f32.xlu2 %v5752_v57  ;;  %v5755_v18 = vpop.xlane.xlu2 %2036 }
 0x613   : > { %2541 = vmax.xlane.f32.xlu2 %v5758_v1 }
 0x616   : > { %v5761_v29 = vpop.xlane.xlu2 %2555 }
 0x61b   : > { %2018 = vmax.xlane.f32.xlu2 %v5765_v53 }
 0x61e   : > { %v5768_v8 = vpop.xlane.xlu2 %2032 }
 0x623   : > { %2539 = vmax.xlane.f32.xlu2 %v5772_v33 }
 0x626   : > { %v2554_v12 = vpop.xlane.xlu2 %2553 }
 0x62b   : > { %2016 = vmax.xlane.f32.xlu2 %v5777_v51 }
 0x62e   : > { %v2031_v43 = vpop.xlane.xlu2 %2030 }
 0x62f   : > { %v2052_v6 = vsub.f32 %v5718_v52, %v2031_v43 }
 0x633   : > { %2537 = vmax.xlane.f32.xlu2 %v5782_v56 }
 0x636   : > { %v2552_v44 = vpop.xlane.xlu2 %2551 }
 0x63b   : > { %2014 = vmax.xlane.f32.xlu2 %v5787_v60 }
 0x63e   : > { %v2029_v49 = vpop.xlane.xlu2 %2028 }
 0x643   : > { %2535 = vmax.xlane.f32.xlu2 %v5792_v19 }
 0x646   : > { %v2550_v63 = vpop.xlane.xlu2 %2549 }
 0x647   : > { %v2570_v41 = vsub.f32 %v5732_v59, %v2550_v63  ;;  %v2053_v59 = vsub.f32 %v5701_v21, %v5768_v8 }
 0x64b   : > { %2012 = vmax.xlane.f32.xlu2 %v5797_v16 }
 0x64e   : > { %v2027_v54 = vpop.xlane.xlu2 %2026 }
 0x64f   : > { %v2050_v46 = vsub.f32 %v1987_v2, %v2027_v54  ;;  %v2078_v2 = vmul.f32 1.442695, %v2052_v6  ;;  %v2080_v6 = vmul.f32 1.442695, %v2053_v59 }
 0x651   : > { %v2074_v47 = vmul.f32 1.442695, %v2050_v46 }
 0x653   : > { %3969 = vpow2.f32 %v2074_v47  ;;  %2533 = vmax.xlane.f32.xlu2 %v5802_v30  ;;  %v2571_v47 = vsub.f32 %v5724_v17, %v2552_v44  ;;  %v2051_v17 = vsub.f32 %v5728_v61, %v2029_v49  ;;  %v2573_v61 = vsub.f32 %v5693_v3, %v5761_v29 }
 0x655   : > { %v2076_v63 = vmul.f32 1.442695, %v2051_v17  ;;  %v2603_v49 = vmul.f32 1.442695, %v2573_v61 }
 0x656   : > { %v2548_v42 = vpop.xlane.xlu2 %2547 }
 0x657   : > { %v2569_v21 = vsub.f32 %v5737_v37, %v2548_v42 }
 0x659   : > { %v5808_v28 = vpop.eup %3969 }
 0x65a   : > { %2106 = vadd.xlane.f32.xlu1 %v5808_v28 }
 0x65b   : > { %2557 = vmax.xlane.f32.xlu2 %v5806_v5 }
 0x65e   : > { %v2025_v40 = vpop.xlane.xlu2 %2024 }
 0x65f   : > { %v2049_v13 = vsub.f32 %v1984_v0, %v2025_v40  ;;  %v2599_v0 = vmul.f32 1.442695, %v2571_v47  ;;  %v2597_v40 = vmul.f32 1.442695, %v2570_v41 }
 0x661   : > { %v2072_v31 = vmul.f32 1.442695, %v2049_v13  ;;  %v2572_v13 = vsub.f32 %v5709_v34, %v2554_v12  ;;  %v2035_v12 = vpop.xlane.xlu1 %2034 }
 0x662   : > { %v2054_v8 = vsub.f32 %v5678_v15, %v2035_v12  ;;  %v2055_v15 = vsub.f32 %v5685_v4, %v5755_v18 }
 0x663   : > { %3971 = vpow2.f32 %v2072_v31  ;;  %2040 = vmax.xlane.f32.xlu2 %v5813_v48 }
 0x664   : > { %v2082_v47 = vmul.f32 1.442695, %v2054_v8 }
 0x666   : > { %v2546_v35 = vpop.xlane.xlu2 %2545 }
 0x667   : > { %v2568_v23 = vsub.f32 %v2507_v62, %v2546_v35 }
 0x669   : > { %v5817_v54 = vpop.eup %3971  ;;  %v2593_v46 = vmul.f32 1.442695, %v2568_v23 }
 0x66b   : > { %3973 = vpow2.f32 %v2593_v46  ;;  %2104 = vadd.xlane.f32.xlu2 %v5817_v54 }
 0x66c   : > { %3975 = vpow2.f32 %v2078_v2  ;;  %v2595_v2 = vmul.f32 1.442695, %v2569_v21 }
 0x66d   : > { %3977 = vpow2.f32 %v2599_v0 }
 0x66e   : > { %v2023_v25 = vpop.xlane.xlu2 %2022 }
 0x66f   : > { %v2048_v50 = vsub.f32 %v5743_v36, %v2023_v25  ;;  %v2601_v36 = vmul.f32 1.442695, %v2572_v13  ;;  %v2039_v13 = vpop.xlane.xlu0 %2038 }
 0x670   : > { %v2056_v4 = vsub.f32 %v5690_v7, %v2039_v13 }
 0x671   : > { %v5823_v52 = vpop.eup %3973  ;;  %v2070_v62 = vmul.f32 1.442695, %v2048_v50  ;;  %v2084_v50 = vmul.f32 1.442695, %v2055_v15 }
 0x672   : > { %7344 = vst [vmem:[#allocation62_spill] sm:$0xff] %v5823_v52  ;;  %v5825_v43 = vpop.eup %3975  ;;  %2625 = vadd.xlane.f32.xlu1 %v5823_v52  ;;  %v2086_v17 = vmul.f32 1.442695, %v2056_v4 }
 0x673   : > { %3979 = vpow2.f32 %v2070_v62  ;;  %2110 = vadd.xlane.f32.xlu2 %v5825_v43  ;;  %v5835_v31 = vpop.eup %3977 }
 0x674   : > { %3981 = vpow2.f32 %v2597_v40 }
 0x675   : > { %3983 = vpow2.f32 %v2601_v36 }
 0x676   : > { %v5833_v44 = vpop.xlane.xlu2 %2543  ;;  %3985 = vpow2.f32 %v2076_v63 }
 0x677   : > { %3987 = vpow2.f32 %v2080_v6 }
 0x678   : > { %3989 = vpow2.f32 %v2603_v49 }
 0x679   : > { %v5837_v34 = vpop.eup %3979  ;;  %3991 = vpow2.f32 %v2595_v2 }
 0x67a   : > { %v5839_v35 = vpop.eup %3981  ;;  %2631 = vadd.xlane.f32.xlu1 %v5835_v31  ;;  %2102 = vadd.xlane.f32.xlu0 %v5837_v34  ;;  %3993 = vpow2.f32 %v2082_v47 }
 0x67b   : > { %2629 = vadd.xlane.f32.xlu2 %v5839_v35  ;;  %v5848_v46 = vpop.eup %3983 }
 0x67c   : > { %v5850_v3 = vpop.eup %3985 }
 0x67d   : > { %v5852_v29 = vpop.eup %3987 }
 0x67e   : > { %v2021_v23 = vpop.xlane.xlu2 %2020  ;;  %v5861_v25 = vpop.eup %3989 }
 0x67f   : > { %v2047_v41 = vsub.f32 %v5752_v57, %v2021_v23  ;;  %v5863_v40 = vpop.eup %3991 }
 0x680   : > { %7345 = vst [vmem:[#allocation22_spill] sm:$0xff] %v5863_v40  ;;  %v5865_v62 = vpop.eup %3993 }
 0x681   : > { %v2068_v37 = vmul.f32 1.442695, %v2047_v41 }
 0x682   : > { %2633 = vadd.xlane.f32.xlu1 %v5848_v46  ;;  %2108 = vadd.xlane.f32.xlu0 %v5850_v3 }
 0x683   : > { %2112 = vadd.xlane.f32.xlu2 %v5852_v29  ;;  %3995 = vpow2.f32 %v2068_v37 }
 0x686   : > { %v2542_v42 = vpop.xlane.xlu2 %2541 }
 0x687   : > { %v2566_v0 = vsub.f32 %v5758_v1, %v2542_v42 }
 0x689   : > { %v2589_v57 = vmul.f32 1.442695, %v2566_v0  ;;  %v5873_v1 = vpop.eup %3995  ;;  %v2011_v0 = vpop.xlane.xlu1 %2010 }
 0x68a   : > { %2635 = vadd.xlane.f32.xlu1 %v5861_v25  ;;  %2627 = vadd.xlane.f32.xlu0 %v5863_v40  ;;  %v2042_v13 = vsub.f32 %v5682_v11, %v2011_v0 }
 0x68b   : > { %3997 = vpow2.f32 %v2589_v57  ;;  %2114 = vadd.xlane.f32.xlu2 %v5865_v62 }
 0x68c   : > { %3999 = vpow2.f32 %v2084_v50 }
 0x68d   : > { %4001 = vpow2.f32 %v2086_v17  ;;  %v2058_v17 = vmul.f32 1.442695, %v2042_v13 }
 0x68e   : > { %v5871_v18 = vpop.xlane.xlu2 %2018 }
 0x691   : > { %v5875_v59 = vpop.eup %3997 }
 0x692   : > { %7346 = vst [vmem:[#allocation46_spill] sm:$0xff] %v5875_v59  ;;  %v5877_v36 = vpop.eup %3999  ;;  %2100 = vadd.xlane.f32.xlu1 %v5873_v1  ;;  %2621 = vadd.xlane.f32.xlu0 %v5875_v59 }
 0x693   : > { %2116 = vadd.xlane.f32.xlu2 %v5877_v36  ;;  %v5883_v12 = vpop.eup %4001 }
 0x696   : > { %v2540_v63 = vpop.xlane.xlu2 %2539 }
 0x697   : > { %v2565_v6 = vsub.f32 %v5772_v33, %v2540_v63  ;;  %v5895_v33 = vpop.xlane.xlu0 %2531 }
 0x699   : > { %v2587_v7 = vmul.f32 1.442695, %v2565_v6 }
 0x69b   : > { %4003 = vpow2.f32 %v2587_v7  ;;  %2118 = vadd.xlane.f32.xlu2 %v5883_v12 }
 0x69e   : > { %v2017_v61 = vpop.xlane.xlu2 %2016 }
 0x69f   : > { %v2045_v21 = vsub.f32 %v5777_v51, %v2017_v61  ;;  %v2530_v51 = vpop.xlane.xlu0 %2529 }
 0x6a0   : > { %v2560_v11 = vsub.f32 %v5706_v39, %v2530_v51 }
 0x6a1   : > { %v5887_v8 = vpop.eup %4003  ;;  %v2064_v49 = vmul.f32 1.442695, %v2045_v21 }
 0x6a2   : > { %7347 = vst [vmem:[#allocation28_spill] sm:$0xff] %v5887_v8  ;;  %2619 = vadd.xlane.f32.xlu1 %v5887_v8 }
 0x6a3   : > { %4005 = vpow2.f32 %v2064_v49 }
 0x6a6   : > { %v5890_v23 = vpop.xlane.xlu2 %2537 }
 0x6a7   : > { %v2528_v63 = vpop.xlane.xlu0 %2527 }
 0x6a9   : > { %v5892_v2 = vpop.eup %4005 }
 0x6aa   : > { %2096 = vadd.xlane.f32.xlu0 %v5892_v2 }
 0x6ae   : > { %v2015_v47 = vpop.xlane.xlu2 %2014 }
 0x6af   : > { %v2044_v41 = vsub.f32 %v5787_v60, %v2015_v47  ;;  %v2559_v60 = vsub.f32 %v5715_v24, %v2528_v63  ;;  %v2577_v47 = vmul.f32 1.442695, %v2560_v11  ;;  %v2906_v63 = vld [vmem:[%s7000_s7 + $0x18] sm:$0xff] }
 0x6b1   : > { %v2062_v15 = vmul.f32 1.442695, %v2044_v41 }
 0x6b3   : > { %4007 = vpow2.f32 %v2062_v15 }
 0x6b6   : > { %v2536_v37 = vpop.xlane.xlu2 %2535 }
 0x6b7   : > { %v2563_v42 = vsub.f32 %v5792_v19, %v2536_v37  ;;  %v2575_v19 = vmul.f32 1.442695, %v2559_v60 }
 0x6b9   : > { %v5899_v50 = vpop.eup %4007  ;;  %v2583_v57 = vmul.f32 1.442695, %v2563_v42 }
 0x6ba   : > { %2094 = vadd.xlane.f32.xlu1 %v5899_v50 }
 0x6bb   : > { %4009 = vpow2.f32 %v2583_v57 }
 0x6bc   : > { %4011 = vpow2.f32 %v2058_v17 }
 0x6bd   : > { %4013 = vpow2.f32 %v2575_v19 }
 0x6be   : > { %v2013_v4 = vpop.xlane.xlu2 %2012 }
 0x6c1   : > { %v5903_v6 = vpop.eup %4009 }
 0x6c2   : > { %7348 = vst [vmem:[#allocation64_spill] sm:$0xff] %v5903_v6  ;;  %2615 = vadd.xlane.f32.xlu0 %v5903_v6  ;;  %v5908_v21 = vpop.eup %4011 }
 0x6c3   : > { %v5913_v15 = vpop.eup %4013 }
 0x6c4   : > { %7349 = vst [vmem:[#allocation55_spill] sm:$0xff] %v5913_v15 }
 0x6c6   : > { %v2534_v7 = vpop.xlane.xlu2 %2533 }
 0x6c7   : > { %v2562_v61 = vsub.f32 %v5802_v30, %v2534_v7 }
 0x6c9   : > { %v2581_v49 = vmul.f32 1.442695, %v2562_v61  ;;  %v2043_v61 = vsub.f32 %v5797_v16, %v2013_v4  ;;  %v3053_v16 = vld [vmem:[%s7002_s9 + $0x20] sm:$0xff] }
 0x6ca   : > { %2090 = vadd.xlane.f32.xlu0 %v5908_v21 }
 0x6cb   : > { %4015 = vpow2.f32 %v2581_v49  ;;  %v2903_v49 = vld [vmem:[%s7000_s7] sm:$0xff] }
 0x6cc   : > { %4017 = vpow2.f32 %v2577_v47  ;;  %v2561_v47 = vsub.f32 %v5698_v10, %v5895_v33  ;;  %v3056_v10 = vld [vmem:[%s7002_s9 + $0x38] sm:$0xff]  ;;  %v3054_v33 = vld [vmem:[%s7002_s9 + $0x28] sm:$0xff] }
 0x6ce   : > { %v2558_v41 = vpop.xlane.xlu2 %2557  ;;  %v2579_v4 = vmul.f32 1.442695, %v2561_v47 }
 0x6cf   : > { %v2574_v24 = vsub.f32 %v5806_v5, %v2558_v41  ;;  %v2567_v5 = vsub.f32 %v5747_v26, %v5833_v44  ;;  %v2564_v26 = vsub.f32 %v5782_v56, %v5890_v23  ;;  %v2904_v44 = vld [vmem:[%s7000_s7 + $0x8] sm:$0xff]  ;;  %v2060_v23 = vmul.f32 1.442695, %v2043_v61  ;;  %v3051_v41 = vld [vmem:[%s7002_s9 + $0x10] sm:$0xff] }
 0x6d0   : > { %v3050_v56 = vld [vmem:[%s7002_s9 + $0x8] sm:$0xff] }
 0x6d1   : > { %v5915_v37 = vpop.eup %4015  ;;  %v2605_v42 = vmul.f32 1.442695, %v2574_v24  ;;  %v2591_v13 = vmul.f32 1.442695, %v2567_v5  ;;  %v719_v5 = vld [vmem:[%s6998_s5 + $0x30] sm:$0xff] }
 0x6d2   : > { %7350 = vst [vmem:[#allocation39_spill] sm:$0xff] %v5915_v37  ;;  %2613 = vadd.xlane.f32.xlu1 %v5915_v37  ;;  %2607 = vadd.xlane.f32.xlu0 %v5913_v15  ;;  %v5920_v51 = vpop.eup %4017 }
 0x6d3   : > { %4019 = vpow2.f32 %v2605_v42  ;;  %7351 = vst [vmem:[#allocation20_spill] sm:$0xff] %v5920_v51 }
 0x6d6   : > { %v2041_v39 = vpop.xlane.xlu2 %2040 }
 0x6d7   : > { %v2057_v30 = vsub.f32 %v5813_v48, %v2041_v39  ;;  %v2046_v48 = vsub.f32 %v5765_v53, %v5871_v18  ;;  %v2585_v53 = vmul.f32 1.442695, %v2564_v26  ;;  %v720_v18 = vld [vmem:[%s6998_s5 + $0x38] sm:$0xff] }
 0x6d9   : > { %v5922_v0 = vpop.eup %4019  ;;  %v2088_v57 = vmul.f32 1.442695, %v2057_v30  ;;  %v2066_v60 = vmul.f32 1.442695, %v2046_v48 }
 0x6da   : > { %2637 = vadd.xlane.f32.xlu2 %v5922_v0  ;;  %2609 = vadd.xlane.f32.xlu1 %v5920_v51 }
 0x6db   : > { %4021 = vpow2.f32 %v2088_v57 }
 0x6dc   : > { %4023 = vpow2.f32 %v2591_v13 }
 0x6dd   : > { %4025 = vpow2.f32 %v2066_v60 }
 0x6de   : > { %4027 = vpow2.f32 %v2585_v53  ;;  %v5979_v39 = vpop.xlane.xlu2 %2104 }
 0x6df   : > { %4029 = vpow2.f32 %v2060_v23 }
 0x6e0   : > { %4031 = vpow2.f32 %v2579_v4 }
 0x6e1   : > { %v5928_v17 = vpop.eup %4021 }
 0x6e2   : > { %2120 = vadd.xlane.f32.xlu2 %v5928_v17  ;;  %v5936_v19 = vpop.eup %4023 }
 0x6e3   : > { %7352 = vst [vmem:[#allocation44_spill] sm:$0xff] %v5936_v19  ;;  %v5947_v7 = vpop.eup %4025 }
 0x6e4   : > { %v5957_v11 = vpop.eup %4027 }
 0x6e5   : > { %7353 = vst [vmem:[#allocation26_spill] sm:$0xff] %v5957_v11  ;;  %v5968_v24 = vpop.eup %4029 }
 0x6e6   : > { %2924 = vperm.xlu0 %3838, %v2906_v63   ;;  %v5977_v42 = vpop.eup %4031  ;;  %v5982_v30 = vpop.xlane.xlu2 %2110 }
 0x6e7   : > { %7354 = vst [vmem:[#allocation63_spill] sm:$0xff] %v5977_v42  ;;  %v5993_v63 = vpop.xlane.xlu1 %2106 }
 0x6ea   : > { %2623 = vadd.xlane.f32.xlu2 %v5936_v19 }
 0x6ed   : > { %v6001_v53 = vpop.xlane.xlu0 %2102 }
 0x6ee   : > { %2914 = vperm.xlu0 %3838, %v2904_v44   ;;  %v5984_v57 = vpop.xlane.xlu2 %2629 }
 0x6ef   : > { %v5997_v26 = vpop.xlane.xlu1 %2625 }
 0x6f2   : > { %2098 = vadd.xlane.f32.xlu2 %v5947_v7 }
 0x6f3   : > { %758 = vperm.xlu1 %3839, %v720_v18  }
 0x6f6   : > { %3064 = vperm.xlu0 %3838, %v3050_v56   ;;  %v5989_v13 = vpop.xlane.xlu2 %2112  ;;  %v2905_v56 = vld [vmem:[%s7000_s7 + $0x10] sm:$0xff] }
 0x6f7   : > { %v6003_v18 = vpop.xlane.xlu1 %2631 }
 0x6fa   : > { %2617 = vadd.xlane.f32.xlu2 %v5957_v11 }
 0x6fb   : > { %2909 = vperm.xlu1 %3839, %v2903_v49   ;;  %v6014_v49 = vpop.xlane.xlu0 %2108 }
 0x6fe   : > { %3079 = vperm.xlu0 %3838, %v3053_v16   ;;  %v5991_v48 = vpop.xlane.xlu2 %2114 }
 0x6ff   : > { %v6019_v16 = vpop.xlane.xlu1 %2633  ;;  %vm2307_vm7 = vweird.f32 %v5991_v48 }
 0x702   : > { %2092 = vadd.xlane.f32.xlu2 %v5968_v24 }
 0x703   : > { %3069 = vperm.xlu1 %3839, %v3051_v41   ;;  %v6036_v32 = vpop.xlane.xlu0 %2627 }
 0x706   : > { %3094 = vperm.xlu0 %3838, %v3056_v10   ;;  %v5995_v60 = vpop.xlane.xlu2 %2116  ;;  %v3049_v10 = vld [vmem:[%s7002_s9] sm:$0xff] }
 0x707   : > { %v6046_v20 = vpop.xlane.xlu1 %2635  ;;  %vm2322_vm13 = vweird.f32 %v5995_v60 }
 0x70a   : > { %2611 = vadd.xlane.f32.xlu2 %v5977_v42 }
 0x70b   : > { %3084 = vperm.xlu1 %3839, %v3054_v33   ;;  %v6079_v40 = vpop.xlane.xlu0 %2621 }
 0x70e   : > { %v5999_v44 = vpop.xlane.xlu2 %2118 }
 0x70f   : > { %4033 = vrcp.f32 %v5999_v44  ;;  %vm2337_vm5 = vweird.f32 %v5999_v44  ;;  %v2343_v6 = vand.u32 2147483648, %v5999_v44 }
 0x710   : > { %4035 = vrcp.f32 %v5995_v60 }
 0x711   : > { %4037 = vrcp.f32 %v5991_v48 }
 0x712   : > { %4039 = vrcp.f32 %v5989_v13 }
 0x715   : > { %v6012_v23 = vpop.eup %4033 }
 0x716   : > { %v6017_v47 = vpop.eup %4035  ;;  %v2333_v4 = vmul.f32 %v6012_v23, %v5999_v44  ;;  %vm2338_vm10 = vweird.f32 %v6012_v23 }
 0x717   : > { %v2318_v33 = vmul.f32 %v6017_v47, %v5995_v60  ;;  %vm6059_vm11 = vmor %vm2337_vm5, %vm2338_vm10  ;;  %vm2323_vm9 = vweird.f32 %v6017_v47 }
 0x718   : > { %vm6088_vm3 = vmor %vm2322_vm13, %vm2323_vm9  ;;  %vm2277_vm9 = vweird.f32 %v5982_v30 }
 0x719   : > { %v2319_v45 = vsub.f32 1.0, %v2318_v33 }
 0x71b   : > { %v2320_v15 = vmul.f32 %v6017_v47, %v2319_v45  ;;  %v2341_v45 = vand.u32 2147483647, %v5999_v44  ;;  %v3055_v44 = vld [vmem:[%s7002_s9 + $0x30] sm:$0xff] }
 0x71d   : > { %vm2342_vm12 = vcmp.eq.f32.partialorder %v2341_v45, 8.507059e+37  ;;  %v2313_v45 = vand.u32 2147483648, %v5991_v48 }
 0x722   : > { %753 = vperm.xlu2 %3840, %v719_v5   ;;  %v6029_v5 = vpop.eup %4037 }
 0x723   : > { %v6032_v14 = vpop.eup %4039  ;;  %v2303_v55 = vmul.f32 %v6029_v5, %v5991_v48  ;;  %vm2308_vm14 = vweird.f32 %v6029_v5 }
 0x724   : > { %vm6112_vm4 = vmor %vm2307_vm7, %vm2308_vm14  ;;  %vm2293_vm10 = vweird.f32 %v6032_v14  ;;  %vm2262_vm14 = vweird.f32 %v6014_v49  ;;  %vm2247_vm7 = vweird.f32 %v5993_v63 }
 0x72a   : > { %2919 = vperm.xlu2 %3840, %v2905_v56   ;;  %v2334_v56 = vsub.f32 1.0, %v2333_v4  ;;  %v2288_v4 = vmul.f32 %v6032_v14, %v5989_v13 }
 0x72c   : > { %v2335_v27 = vmul.f32 %v6012_v23, %v2334_v56  ;;  %v2304_v56 = vsub.f32 1.0, %v2303_v55  ;;  %v2289_v8 = vsub.f32 1.0, %v2288_v4 }
 0x72e   : > { %v2336_v37 = vadd.f32 %v6012_v23, %v2335_v27  ;;  %v2305_v27 = vmul.f32 %v6029_v5, %v2304_v56  ;;  %v2328_v56 = vand.u32 2147483648, %v5995_v60 }
 0x730   : > { %v2329_v55 = vor.u32 1.1754944e-38, %v2328_v56  ;;  %v2314_v56 = vor.u32 1.1754944e-38, %v2313_v45  ;;  %v2281_v45 = vand.u32 2147483647, %v5982_v30 }
 0x732   : > { %3059 = vperm.xlu2 %3840, %v3049_v10  }
 0x73a   : > { %3074 = vperm.xlu2 %3840, %v3052_v58  }
 0x742   : > { %3089 = vperm.xlu2 %3840, %v3055_v44  }
 0x74d   : > { %v6006_v61 = vpop.xlane.xlu2 %2637 }
 0x755   : > { %v2121_v41 = vpop.xlane.xlu2 %2120 }
 0x756   : > { %4041 = vrcp.f32 %v2121_v41  ;;  %v2358_v51 = vand.u32 2147483648, %v2121_v41  ;;  %v2356_v58 = vand.u32 2147483647, %v2121_v41  ;;  %vm2352_vm2 = vweird.f32 %v2121_v41 }
 0x757   : > { %4043 = vrcp.f32 %v5982_v30 }
 0x758   : > { %4045 = vrcp.f32 %v5993_v63  ;;  %v2359_v59 = vor.u32 1.1754944e-38, %v2358_v51  ;;  %vm2357_vm6 = vcmp.eq.f32.partialorder %v2356_v58, 8.507059e+37  ;;  %v2344_v51 = vor.u32 1.1754944e-38, %v2343_v6  ;;  %v6093_v6 = vpop.xlane.xlu1 %2100 }
 0x759   : > { %4047 = vrcp.f32 %v6014_v49  ;;  %v2306_v58 = vadd.f32 %v6029_v5, %v2305_v27 }
 0x75a   : > { %4049 = vrcp.f32 %v5979_v39 }
 0x75b   : > { %4051 = vrcp.f32 %v6001_v53 }
 0x75c   : > { %v4042_v22 = vpop.eup %4041  ;;  %4053 = vrcp.f32 %v6093_v6 }
 0x75d   : > { %v2348_v10 = vmul.f32 %v4042_v22, %v2121_v41  ;;  %v6048_v38 = vpop.xlane.xlu2 %2623  ;;  %v6050_v9 = vpop.eup %4043  ;;  %vm2353_vm15 = vweird.f32 %v4042_v22  ;;  %v2321_v41 = vadd.f32 %v6017_v47, %v2320_v15  ;;  %v2326_v15 = vand.u32 2147483647, %v5995_v60 }
 0x75e   : > { %vm2354_vm8 = vmor %vm2352_vm2, %vm2353_vm15  ;;  %vm2292_vm15 = vweird.f32 %v5989_v13 }
 0x75f   : > { %v2349_v33 = vsub.f32 1.0, %v2348_v10  ;;  %v2273_v10 = vmul.f32 %v6050_v9, %v5982_v30  ;;  %v2325_v60 = vsel %vm6088_vm3, %v6017_v47, %v2321_v41  ;;  %vm2327_vm1 = vcmp.eq.f32.partialorder %v2326_v15, 8.507059e+37  ;;  %v6124_v15 = vpop.xlane.xlu0 %2096  ;;  %vm6130_vm2 = vmor %vm2292_vm15, %vm2293_vm10 }
 0x760   : > { %v2330_v27 = vsel %vm2327_vm1, %v2329_v55, %v2325_v60  ;;  %v6135_v60 = vpop.xlane.xlu1 %2619  ;;  %vm2282_vm3 = vcmp.eq.f32.partialorder %v2281_v45, 8.507059e+37  ;;  %v2251_v45 = vand.u32 2147483647, %v5993_v63 }
 0x761   : > { %v2350_v42 = vmul.f32 %v4042_v22, %v2349_v33  ;;  %v6064_v33 = vpop.eup %4045 }
 0x762   : > { %v6068_v19 = vpop.eup %4047 }
 0x763   : > { %v2351_v11 = vadd.f32 %v4042_v22, %v2350_v42  ;;  %v2340_v42 = vsel %vm6059_vm11, %v6012_v23, %v2336_v37  ;;  %v2274_v37 = vsub.f32 1.0, %v2273_v10  ;;  %v2243_v10 = vmul.f32 %v6064_v33, %v5993_v63  ;;  %v6108_v44 = vpop.eup %4049 }
 0x764   : > { %v2345_v23 = vsel %vm2342_vm12, %v2344_v51, %v2340_v42  ;;  %v2311_v42 = vand.u32 2147483647, %v5991_v48  ;;  %vm2278_vm11 = vweird.f32 %v6050_v9  ;;  %vm2248_vm12 = vweird.f32 %v6064_v33 }
 0x765   : > { %v2355_v52 = vsel %vm2354_vm8, %v4042_v22, %v2351_v11  ;;  %v2258_v11 = vmul.f32 %v6068_v19, %v6014_v49  ;;  %v2275_v47 = vmul.f32 %v6050_v9, %v2274_v37  ;;  %v2244_v48 = vsub.f32 1.0, %v2243_v10 }
 0x766   : > { %v2360_v4 = vsel %vm2357_vm6, %v2359_v59, %v2355_v52  ;;  %v2290_v59 = vmul.f32 %v6032_v14, %v2289_v8  ;;  %v2346_v8 = vmul.f32 %v5883_v12, %v2345_v23  ;;  %v2310_v12 = vsel %vm6112_vm4, %v6029_v5, %v2306_v58  ;;  %vm6152_vm6 = vmor %vm2277_vm9, %vm2278_vm11 }
 0x767   : > { %v2361_v22 = vmul.f32 %v5928_v17, %v2360_v4  ;;  %v6095_v17 = vpop.xlane.xlu2 %2098  ;;  %v2259_v4 = vsub.f32 1.0, %v2258_v11  ;;  %v2331_v37 = vmul.f32 %v5877_v36, %v2330_v27  ;;  %vm2312_vm5 = vcmp.eq.f32.partialorder %v2311_v42, 8.507059e+37  ;;  %vm6192_vm4 = vmor %vm2247_vm7, %vm2248_vm12 }
 0x768   : > { %v2291_v51 = vadd.f32 %v6032_v14, %v2290_v59  ;;  %v2296_v11 = vand.u32 2147483647, %v5989_v13  ;;  %v2228_v5 = vmul.f32 %v6108_v44, %v5979_v39  ;;  %v2315_v23 = vsel %vm2312_vm5, %v2314_v56, %v2310_v12 }
 0x769   : > { %2362 = vmatpush.xpose.msrb.mxu2 %v2361_v22  ;;  %v2298_v22 = vand.u32 2147483648, %v5989_v13  ;;  %v2260_v59 = vmul.f32 %v6068_v19, %v2259_v4  ;;  %v2276_v58 = vadd.f32 %v6050_v9, %v2275_v47  ;;  %v6142_v13 = vpop.eup %4051  ;;  %v2245_v10 = vmul.f32 %v6064_v33, %v2244_v48 }
 0x76a   : > { %v2295_v36 = vsel %vm6130_vm2, %v6032_v14, %v2291_v51  ;;  %v2316_v27 = vmul.f32 %v5865_v62, %v2315_v23  ;;  %vm2297_vm8 = vcmp.eq.f32.partialorder %v2296_v11, 8.507059e+37  ;;  %v2229_v14 = vsub.f32 1.0, %v2228_v5  ;;  %v6157_v4 = vpop.eup %4053 }
 0x76b   : > { %v2299_v55 = vor.u32 1.1754944e-38, %v2298_v22  ;;  %4055 = vrcp.f32 %v6095_v17  ;;  %v2213_v12 = vmul.f32 %v6142_v13, %v6001_v53  ;;  %v2280_v62 = vsel %vm6152_vm6, %v6050_v9, %v2276_v58  ;;  %v6169_v22 = vpop.xlane.xlu0 %2615 }
 0x76c   : > { %vm2263_vm13 = vweird.f32 %v6068_v19  ;;  %v2268_v48 = vand.u32 2147483648, %v6014_v49  ;;  %v2246_v56 = vadd.f32 %v6064_v33, %v2245_v10  ;;  %4057 = vrcp.f32 %v6124_v15 }
 0x76d   : > { %2363 = vmatpush.xpose.msrb.mxu2 %v2346_v8  ;;  %v2283_v8 = vand.u32 2147483648, %v5982_v30  ;;  %v2300_v47 = vsel %vm2297_vm8, %v2299_v55, %v2295_v36  ;;  %v2261_v30 = vadd.f32 %v6068_v19, %v2260_v59  ;;  %v2266_v9 = vand.u32 2147483647, %v6014_v49  ;;  %vm6177_vm1 = vmor %vm2262_vm14, %vm2263_vm13  ;;  %v6181_v36 = vpop.xlane.xlu1 %2094 }
 0x76e   : > { %v2230_v11 = vmul.f32 %v6108_v44, %v2229_v14  ;;  %v2198_v5 = vmul.f32 %v6157_v4, %v6093_v6  ;;  %v2214_v59 = vsub.f32 1.0, %v2213_v12  ;;  %v2253_v49 = vand.u32 2147483648, %v5993_v63 }
 0x76f   : > { %v6147_v42 = vpop.xlane.xlu2 %2617  ;;  %v2284_v51 = vor.u32 1.1754944e-38, %v2283_v8  ;;  %v2269_v10 = vor.u32 1.1754944e-38, %v2268_v48  ;;  %vm2267_vm10 = vcmp.eq.f32.partialorder %v2266_v9, 8.507059e+37  ;;  %vm2233_vm15 = vweird.f32 %v6108_v44 }
 0x770   : > { %4059 = vrcp.f32 %v6181_v36  ;;  %v2215_v12 = vmul.f32 %v6142_v13, %v2214_v59  ;;  %vm2252_vm5 = vcmp.eq.f32.partialorder %v2251_v45, 8.507059e+37  ;;  %vm2232_vm2 = vweird.f32 %v5979_v39 }
 0x771   : > { %2364 = vmatpush.xpose.msrb.mxu2 %v2331_v37  ;;  %v2301_v37 = vmul.f32 %v5852_v29, %v2300_v47  ;;  %v2285_v23 = vsel %vm2282_vm3, %v2284_v51, %v2280_v62  ;;  %v2265_v29 = vsel %vm6177_vm1, %v6068_v19, %v2261_v30  ;;  %v6188_v58 = vpop.eup %4055  ;;  %v2250_v19 = vsel %vm6192_vm4, %v6064_v33, %v2246_v56  ;;  %vm6217_vm11 = vmor %vm2232_vm2, %vm2233_vm15 }
 0x772   : > { %v2286_v8 = vmul.f32 %v5825_v43, %v2285_v23  ;;  %v2270_v14 = vsel %vm2267_vm10, %v2269_v10, %v2265_v29  ;;  %v2231_v47 = vadd.f32 %v6108_v44, %v2230_v11  ;;  %v6204_v41 = vpop.eup %4057  ;;  %v2183_v43 = vmul.f32 %v6188_v58, %v6095_v17 }
 0x773   : > { %v2254_v62 = vor.u32 1.1754944e-38, %v2253_v49  ;;  %v2238_v33 = vand.u32 2147483648, %v5979_v39  ;;  %v2236_v30 = vand.u32 2147483647, %v5979_v39  ;;  %v2271_v51 = vmul.f32 %v5850_v3, %v2270_v14  ;;  %v6228_v11 = vpop.xlane.xlu0 %2090 }
 0x774   : > { %v2168_v9 = vmul.f32 %v6204_v41, %v6124_v15  ;;  %v2235_v39 = vsel %vm6217_vm11, %v6108_v44, %v2231_v47  ;;  %v2184_v3 = vsub.f32 1.0, %v2183_v43  ;;  %v2216_v23 = vadd.f32 %v6142_v13, %v2215_v12 }
 0x775   : > { %2365 = vmatpush.xpose.msrb.mxu2 %v2316_v27  ;;  %v2199_v27 = vsub.f32 1.0, %v2198_v5  ;;  %v2255_v48 = vsel %vm2252_vm5, %v2254_v62, %v2250_v19  ;;  %v2239_v5 = vor.u32 1.1754944e-38, %v2238_v33  ;;  %vm2218_vm8 = vweird.f32 %v6142_v13 }
 0x776   : > { %v6232_v52 = vpop.eup %4059  ;;  %vm2237_vm9 = vcmp.eq.f32.partialorder %v2236_v30, 8.507059e+37  ;;  %v2223_v59 = vand.u32 2147483648, %v6001_v53  ;;  %v2256_v29 = vmul.f32 %v5808_v28, %v2255_v48  ;;  %vm2217_vm6 = vweird.f32 %v6001_v53 }
 0x777   : > { %v6209_v63 = vpop.xlane.xlu2 %2092  ;;  %v2240_v49 = vsel %vm2237_vm9, %v2239_v5, %v2235_v39  ;;  %v2221_v44 = vand.u32 2147483647, %v6001_v53  ;;  %v2169_v10 = vsub.f32 1.0, %v2168_v9  ;;  %vm6239_vm12 = vmor %vm2217_vm6, %vm2218_vm8  ;;  %vm2203_vm13 = vweird.f32 %v6157_v4 }
 0x778   : > { %4061 = vrcp.f32 %v6209_v63  ;;  %v2185_v28 = vmul.f32 %v6188_v58, %v2184_v3  ;;  %v2220_v53 = vsel %vm6239_vm12, %v6142_v13, %v2216_v23  ;;  %vm2202_vm3 = vweird.f32 %v6093_v6 }
 0x779   : > { %2366 = vmatpush.xpose.msrb.mxu2 %v2301_v37  ;;  %v2200_v37 = vmul.f32 %v6157_v4, %v2199_v27  ;;  %4063 = vrcp.f32 %v6228_v11  ;;  %v2224_v27 = vor.u32 1.1754944e-38, %v2223_v59  ;;  %v2208_v14 = vand.u32 2147483648, %v6093_v6  ;;  %vm6258_vm1 = vmor %vm2202_vm3, %vm2203_vm13 }
 0x77a   : > { %4065 = vrcp.f32 %v6006_v61  ;;  %v2241_v47 = vmul.f32 %v5817_v54, %v2240_v49  ;;  %vm2222_vm14 = vcmp.eq.f32.partialorder %v2221_v44, 8.507059e+37  ;;  %v2206_v43 = vand.u32 2147483647, %v6093_v6 }
 0x77b   : > { %v2201_v45 = vadd.f32 %v6157_v4, %v2200_v37  ;;  %4067 = vrcp.f32 %v6046_v20  ;;  %v2170_v13 = vmul.f32 %v6204_v41, %v2169_v10  ;;  %v2225_v62 = vsel %vm2222_vm14, %v2224_v27, %v2220_v53 }
 0x77c   : > { %v2186_v54 = vadd.f32 %v6188_v58, %v2185_v28  ;;  %vm2188_vm7 = vweird.f32 %v6188_v58  ;;  %4069 = vrcp.f32 %v6019_v16  ;;  %v2209_v6 = vor.u32 1.1754944e-38, %v2208_v14 }
 0x77d   : > { %2367 = vmatpush.xpose.msrb.mxu2 %v2286_v8  ;;  %v2153_v8 = vmul.f32 %v6232_v52, %v6181_v36  ;;  %v2205_v33 = vsel %vm6258_vm1, %v6157_v4, %v2201_v45  ;;  %v2193_v56 = vand.u32 2147483648, %v6095_v17  ;;  %v2226_v4 = vmul.f32 %v5837_v34, %v2225_v62 }
 0x77e   : > { %v6252_v19 = vpop.eup %4061  ;;  %vm2207_vm4 = vcmp.eq.f32.partialorder %v2206_v43, 8.507059e+37  ;;  %vm2187_vm10 = vweird.f32 %v6095_v17  ;;  %v2191_v9 = vand.u32 2147483647, %v6095_v17  ;;  %4071 = vrcp.f32 %v6003_v18 }
 0x77f   : > { %v2154_v30 = vsub.f32 1.0, %v2153_v8  ;;  %v6271_v48 = vpop.eup %4063  ;;  %v2210_v39 = vsel %vm2207_vm4, %v2209_v6, %v2205_v33  ;;  %vm6281_vm15 = vmor %vm2187_vm10, %vm2188_vm7  ;;  %v2171_v5 = vadd.f32 %v6204_v41, %v2170_v13  ;;  %vm2173_vm5 = vweird.f32 %v6204_v41 }
 0x780   : > { %v6275_v37 = vpop.eup %4065  ;;  %v2123_v59 = vmul.f32 %v6271_v48, %v6228_v11  ;;  %v2190_v17 = vsel %vm6281_vm15, %v6188_v58, %v2186_v54  ;;  %v2194_v44 = vor.u32 1.1754944e-38, %v2193_v56  ;;  %vm2172_vm2 = vweird.f32 %v6124_v15 }
 0x781   : > { %2368 = vmatpush.xpose.msrb.mxu2 %v2271_v51  ;;  %v2138_v51 = vmul.f32 %v6252_v19, %v6209_v63  ;;  %v6287_v23 = vpop.eup %4067  ;;  %v2155_v34 = vmul.f32 %v6232_v52, %v2154_v30  ;;  %v2865_v49 = vmul.f32 %v6275_v37, %v6006_v61  ;;  %v2178_v10 = vand.u32 2147483648, %v6124_v15  ;;  %vm6300_vm8 = vmor %vm2172_vm2, %vm2173_vm5 }
 0x782   : > { %v2211_v55 = vmul.f32 %v5873_v1, %v2210_v39  ;;  %vm2192_vm11 = vcmp.eq.f32.partialorder %v2191_v9, 8.507059e+37  ;;  %v2176_v8 = vand.u32 2147483647, %v6124_v15  ;;  %v6305_v28 = vpop.eup %4069  ;;  %v2850_v58 = vmul.f32 %v6287_v23, %v6046_v20 }
 0x783   : > { %v2195_v53 = vsel %vm2192_vm11, %v2194_v44, %v2190_v17  ;;  %v2175_v27 = vsel %vm6300_vm8, %v6204_v41, %v2171_v5  ;;  %v2124_v14 = vsub.f32 1.0, %v2123_v59  ;;  %vm2158_vm9 = vweird.f32 %v6232_v52  ;;  %v6347_v17 = vpop.xlane.xlu2 %2611 }
 0x784   : > { %v6315_v12 = vpop.eup %4071  ;;  %v2866_v15 = vsub.f32 1.0, %v2865_v49  ;;  %v2179_v43 = vor.u32 1.1754944e-38, %v2178_v10  ;;  %v2163_v13 = vand.u32 2147483648, %v6181_v36  ;;  %v2196_v62 = vmul.f32 %v5947_v7, %v2195_v53 }
 0x785   : > { %2369 = vmatpush.xpose.msrb.mxu2 %v2256_v29  ;;  %v2139_v29 = vsub.f32 1.0, %v2138_v51  ;;  %vm2177_vm6 = vcmp.eq.f32.partialorder %v2176_v8, 8.507059e+37  ;;  %vm2157_vm12 = vweird.f32 %v6181_v36  ;;  %v2161_v41 = vand.u32 2147483647, %v6181_v36 }
 0x786   : > { %4073 = vrcp.f32 %v5984_v57  ;;  %v2835_v33 = vmul.f32 %v6305_v28, %v6019_v16  ;;  %v2851_v30 = vsub.f32 1.0, %v2850_v58  ;;  %v2180_v51 = vsel %vm2177_vm6, %v2179_v43, %v2175_v27  ;;  %vm6324_vm13 = vmor %vm2157_vm12, %vm2158_vm9 }
 0x787   : > { %v2140_v1 = vmul.f32 %v6252_v19, %v2139_v29  ;;  %v2125_v6 = vmul.f32 %v6271_v48, %v2124_v14  ;;  %vm2143_vm3 = vweird.f32 %v6252_v19  ;;  %v2820_v56 = vmul.f32 %v6315_v12, %v6003_v18  ;;  %v7391_v29 = vld [vmem:[#allocation11_spill] sm:$0xff] }
 0x788   : > { %v2164_v9 = vor.u32 1.1754944e-38, %v2163_v13  ;;  %v2148_v39 = vand.u32 2147483648, %v6209_v63  ;;  %v2181_v3 = vmul.f32 %v5892_v2, %v2180_v51  ;;  %vm2162_vm14 = vcmp.eq.f32.partialorder %v2161_v41, 8.507059e+37 }
 0x789   : > { %2370 = vmatpush.xpose.msrb.mxu2 %v2241_v47  ;;  %v2156_v47 = vadd.f32 %v6232_v52, %v2155_v34  ;;  %v2141_v36 = vadd.f32 %v6252_v19, %v2140_v1  ;;  %vm2142_vm1 = vweird.f32 %v6209_v63  ;;  %v2146_v5 = vand.u32 2147483647, %v6209_v63 }
 0x78a   : > { %v2852_v34 = vmul.f32 %v6287_v23, %v2851_v30  ;;  %4075 = vrcp.f32 %v6036_v32  ;;  %vm6343_vm7 = vmor %vm2142_vm1, %vm2143_vm3  ;;  %v2126_v49 = vadd.f32 %v6271_v48, %v2125_v6  ;;  %vm2127_vm4 = vweird.f32 %v6228_v11 }
 0x78b   : > { %v2160_v7 = vsel %vm6324_vm13, %v6232_v52, %v2156_v47  ;;  %v2836_v52 = vsub.f32 1.0, %v2835_v33  ;;  %v2145_v2 = vsel %vm6343_vm7, %v6252_v19, %v2141_v36  ;;  %vm2128_vm10 = vweird.f32 %v6271_v48 }
 0x78c   : > { %v2165_v59 = vsel %vm2162_vm14, %v2164_v9, %v2160_v7  ;;  %v6355_v63 = vpop.eup %4073  ;;  %vm2870_vm15 = vweird.f32 %v6275_v37  ;;  %v2149_v10 = vor.u32 1.1754944e-38, %v2148_v39  ;;  %v2875_v45 = vand.u32 2147483648, %v6006_v61  ;;  %vm6368_vm11 = vmor %vm2127_vm4, %vm2128_vm10  ;;  %v754_v9 = vpop.permute.xlu2 %753 }
 0x78d   : > { %2371 = vmatpush.xpose.msrb.mxu2 %v2226_v4  ;;  %v2867_v4 = vmul.f32 %v6275_v37, %v2866_v15  ;;  %v2166_v8 = vmul.f32 %v5899_v50, %v2165_v59  ;;  %vm2147_vm5 = vcmp.eq.f32.partialorder %v2146_v5, 8.507059e+37  ;;  %v2131_v19 = vand.u32 2147483647, %v6228_v11 }
 0x78e   : > { %4077 = vrcp.f32 %v5997_v26  ;;  %vm2869_vm2 = vweird.f32 %v6006_v61  ;;  %v2873_v58 = vand.u32 2147483647, %v6006_v61  ;;  %v2150_v53 = vsel %vm2147_vm5, %v2149_v10, %v2145_v2 }
 0x78f   : > { %v2868_v44 = vadd.f32 %v6275_v37, %v2867_v4  ;;  %v2821_v14 = vsub.f32 1.0, %v2820_v56  ;;  %v2805_v50 = vmul.f32 %v6355_v63, %v5984_v57  ;;  %v2837_v1 = vmul.f32 %v6305_v28, %v2836_v52  ;;  %vm6377_vm8 = vmor %vm2869_vm2, %vm2870_vm15 }
 0x790   : > { %v2130_v61 = vsel %vm6368_vm11, %v6271_v48, %v2126_v49  ;;  %v2853_v13 = vadd.f32 %v6287_v23, %v2852_v34  ;;  %vm2855_vm9 = vweird.f32 %v6287_v23  ;;  %v2876_v41 = vor.u32 1.1754944e-38, %v2875_v45 }
 0x791   : > { %2372 = vmatpush.xpose.msrb.mxu2 %v2211_v55  ;;  %v2133_v55 = vand.u32 2147483648, %v6228_v11  ;;  %v6384_v11 = vpop.eup %4075  ;;  %v2872_v43 = vsel %vm6377_vm8, %v6275_v37, %v2868_v44  ;;  %v2151_v33 = vmul.f32 %v5968_v24, %v2150_v53  ;;  %vm2132_vm6 = vcmp.eq.f32.partialorder %v2131_v19, 8.507059e+37 }
 0x792   : > { %vm2854_vm12 = vweird.f32 %v6046_v20  ;;  %vm2874_vm13 = vcmp.eq.f32.partialorder %v2873_v58, 8.507059e+37  ;;  %v2858_v30 = vand.u32 2147483647, %v6046_v20  ;;  %v2822_v51 = vmul.f32 %v6315_v12, %v2821_v14  ;;  %v7403_v58 = vld [vmem:[#allocation62_spill] sm:$0xff] }
 0x793   : > { %v2134_v15 = vor.u32 1.1754944e-38, %v2133_v55  ;;  %v2790_v37 = vmul.f32 %v6384_v11, %v6036_v32  ;;  %4079 = vrcp.f32 %v6048_v38  ;;  %v2877_v54 = vsel %vm2874_vm13, %v2876_v41, %v2872_v43  ;;  %vm6399_vm3 = vmor %vm2854_vm12, %vm2855_vm9 }
 0x794   : > { %v6403_v24 = vpop.eup %4077  ;;  %v2806_v7 = vsub.f32 1.0, %v2805_v50  ;;  %v2838_v36 = vadd.f32 %v6305_v28, %v2837_v1  ;;  %vm2840_vm14 = vweird.f32 %v6305_v28  ;;  %vm2839_vm1 = vweird.f32 %v6019_v16 }
 0x795   : > { %2373 = vmatpush.xpose.msrb.mxu2 %v2196_v62  ;;  %v2860_v62 = vand.u32 2147483648, %v6046_v20  ;;  %v2135_v48 = vsel %vm2132_vm6, %v2134_v15, %v2130_v61  ;;  %v2857_v20 = vsel %vm6399_vm3, %v6287_v23, %v2853_v13  ;;  %v2845_v56 = vand.u32 2147483648, %v6019_v16  ;;  %vm6418_vm4 = vmor %vm2839_vm1, %vm2840_vm14 }
 0x796   : > { %v2136_v39 = vmul.f32 %v5908_v21, %v2135_v48  ;;  %4081 = vrcp.f32 %v6079_v40  ;;  %vm2859_vm7 = vcmp.eq.f32.partialorder %v2858_v30, 8.507059e+37  ;;  %v2843_v5 = vand.u32 2147483647, %v6019_v16  ;;  %v6472_v48 = vpop.xlane.xlu1 %2613 }
 0x797   : > { %v2861_v4 = vor.u32 1.1754944e-38, %v2860_v62  ;;  %v2775_v23 = vmul.f32 %v6403_v24, %v5997_v26  ;;  %v2791_v52 = vsub.f32 1.0, %v2790_v37  ;;  %vm2825_vm10 = vweird.f32 %v6315_v12 }
 0x798   : > { %v2807_v21 = vmul.f32 %v6355_v63, %v2806_v7  ;;  %v821_v2 = vadd.f32 %v7391_v29, %v754_v9  ;;  %v2823_v16 = vadd.f32 %v6315_v12, %v2822_v51  ;;  %vm2824_vm15 = vweird.f32 %v6003_v18 }
 0x799   : > { %2374 = vmatpush.xpose.msrb.mxu2 %v2181_v3  ;;  %v2878_v3 = vmul.f32 %v5922_v0, %v2877_v54  ;;  %v2862_v34 = vsel %vm2859_vm7, %v2861_v4, %v2857_v20  ;;  %v2842_v0 = vsel %vm6418_vm4, %v6305_v28, %v2838_v36  ;;  %v6429_v49 = vpop.eup %4079  ;;  %v2830_v44 = vand.u32 2147483648, %v6003_v18  ;;  %vm6439_vm2 = vmor %vm2824_vm15, %vm2825_vm10 }
 0x79a   : > { %v2846_v10 = vor.u32 1.1754944e-38, %v2845_v56  ;;  %4083 = vrcp.f32 %v6135_v60  ;;  %v2863_v55 = vmul.f32 %v5861_v25, %v2862_v34  ;;  %vm2844_vm5 = vcmp.eq.f32.partialorder %v2843_v5, 8.507059e+37 }
 0x79b   : > { %v2828_v45 = vand.u32 2147483647, %v6003_v18  ;;  %v2792_v28 = vmul.f32 %v6384_v11, %v2791_v52  ;;  %v2760_v27 = vmul.f32 %v6429_v49, %v6048_v38  ;;  %v2827_v25 = vsel %vm6439_vm2, %v6315_v12, %v2823_v16 }
 0x79c   : > { %v2847_v19 = vsel %vm2844_vm5, %v2846_v10, %v2842_v0  ;;  %v6443_v53 = vpop.eup %4081  ;;  %v2808_v18 = vadd.f32 %v6355_v63, %v2807_v21  ;;  %vm2810_vm11 = vweird.f32 %v6355_v63  ;;  %v2831_v14 = vor.u32 1.1754944e-38, %v2830_v44  ;;  %v7400_v21 = vld [vmem:[#allocation22_spill] sm:$0xff] }
 0x79d   : > { %2375 = vmatpush.xpose.msrb.mxu2 %v2166_v8  ;;  %v2776_v8 = vsub.f32 1.0, %v2775_v23  ;;  %v2815_v50 = vand.u32 2147483648, %v5984_v57  ;;  %vm2809_vm8 = vweird.f32 %v5984_v57  ;;  %v2848_v1 = vmul.f32 %v5848_v46, %v2847_v19 }
 0x79e   : > { %vm2829_vm9 = vcmp.eq.f32.partialorder %v2828_v45, 8.507059e+37  ;;  %v2813_v47 = vand.u32 2147483647, %v5984_v57  ;;  %v2745_v15 = vmul.f32 %v6443_v53, %v6079_v40  ;;  %4085 = vrcp.f32 %v6147_v42  ;;  %vm6460_vm6 = vmor %vm2809_vm8, %vm2810_vm11  ;;  %v6516_v16 = vpop.xlane.xlu1 %2609 }
 0x79f   : > { %v2777_v61 = vmul.f32 %v6403_v24, %v2776_v8  ;;  %v2832_v12 = vsel %vm2829_vm9, %v2831_v14, %v2827_v25  ;;  %v2761_v62 = vsub.f32 1.0, %v2760_v27  ;;  %v2812_v46 = vsel %vm6460_vm6, %v6355_v63, %v2808_v18  ;;  %v6539_v14 = vpop.xlane.xlu0 %2607 }
 0x7a0   : > { %v6464_v13 = vpop.eup %4083  ;;  %v2793_v57 = vadd.f32 %v6384_v11, %v2792_v28  ;;  %vm2795_vm12 = vweird.f32 %v6384_v11  ;;  %v2816_v41 = vor.u32 1.1754944e-38, %v2815_v50  ;;  %vm2794_vm13 = vweird.f32 %v6036_v32 }
 0x7a1   : > { %2376 = vmatpush.xpose.msrb.mxu2 %v2151_v33  ;;  %v2800_v33 = vand.u32 2147483648, %v6036_v32  ;;  %v2833_v30 = vmul.f32 %v5835_v31, %v2832_v12  ;;  %vm2814_vm3 = vcmp.eq.f32.partialorder %v2813_v47, 8.507059e+37  ;;  %v2798_v51 = vand.u32 2147483647, %v6036_v32  ;;  %vm6480_vm14 = vmor %vm2794_vm13, %vm2795_vm12 }
 0x7a2   : > { %v2746_v37 = vsub.f32 1.0, %v2745_v15  ;;  %v2730_v63 = vmul.f32 %v6464_v13, %v6135_v60  ;;  %4087 = vrcp.f32 %v6169_v22  ;;  %v2817_v54 = vsel %vm2814_vm3, %v2816_v41, %v2812_v46 }
 0x7a3   : > { %v2762_v7 = vmul.f32 %v6429_v49, %v2761_v62  ;;  %v2797_v31 = vsel %vm6480_vm14, %v6384_v11, %v2793_v57  ;;  %v2778_v32 = vadd.f32 %v6403_v24, %v2777_v61  ;;  %vm2780_vm1 = vweird.f32 %v6403_v24  ;;  %v7406_v62 = vld [vmem:[#allocation44_spill] sm:$0xff]  ;;  %v7416_v57 = vld [vmem:[#allocation63_spill] sm:$0xff] }
 0x7a4   : > { %v6490_v20 = vpop.eup %4085  ;;  %vm2779_vm7 = vweird.f32 %v5997_v26  ;;  %v2785_v36 = vand.u32 2147483648, %v5997_v26  ;;  %v2801_v56 = vor.u32 1.1754944e-38, %v2800_v33  ;;  %4089 = vrcp.f32 %v6472_v48 }
 0x7a5   : > { %2377 = vmatpush.xpose.msrb.mxu2 %v2136_v39  ;;  %v2818_v4 = vmul.f32 %v5839_v35, %v2817_v54  ;;  %vm2799_vm4 = vcmp.eq.f32.partialorder %v2798_v51, 8.507059e+37  ;;  %v2783_v9 = vand.u32 2147483647, %v5997_v26  ;;  %v2747_v11 = vmul.f32 %v6443_v53, %v2746_v37  ;;  %vm6498_vm10 = vmor %vm2779_vm7, %vm2780_vm1 }
 0x7a6   : > { %v2731_v39 = vsub.f32 1.0, %v2730_v63  ;;  %v2715_v23 = vmul.f32 %v6490_v20, %v6147_v42  ;;  %v2782_v52 = vsel %vm6498_vm10, %v6403_v24, %v2778_v32  ;;  %v2763_v35 = vadd.f32 %v6429_v49, %v2762_v7  ;;  %v7409_v7 = vld [vmem:[#allocation46_spill] sm:$0xff] }
 0x7a7   : > { %vm2765_vm15 = vweird.f32 %v6429_v49  ;;  %v2786_v34 = vor.u32 1.1754944e-38, %v2785_v36  ;;  %v2770_v59 = vand.u32 2147483648, %v6048_v38  ;;  %vm2764_vm5 = vweird.f32 %v6048_v38 }
 0x7a8   : > { %2378 = vmatmul.f32.vlgmr.msrb.gmra.mxu2 %v821_v2  ;;  %v6509_v26 = vpop.eup %4087  ;;  %vm2784_vm2 = vcmp.eq.f32.partialorder %v2783_v9, 8.507059e+37  ;;  %v2768_v2 = vand.u32 2147483647, %v6048_v38  ;;  %v2732_v0 = vmul.f32 %v6464_v13, %v2731_v39  ;;  %4091 = vrcp.f32 %v6347_v17  ;;  %vm6519_vm11 = vmor %vm2764_vm5, %vm2765_vm15 }
 0x7a9   : > { %2879 = vmatpush.xpose.msra.mxu2 %v2878_v3  ;;  %v2802_v3 = vsel %vm2799_vm4, %v2801_v56, %v2797_v31  ;;  %v2787_v24 = vsel %vm2784_vm2, %v2786_v34, %v2782_v52  ;;  %vm2750_vm8 = vweird.f32 %v6443_v53  ;;  %v2716_v45 = vsub.f32 1.0, %v2715_v23  ;;  %v7412_v23 = vld [vmem:[#allocation28_spill] sm:$0xff] }
 0x7aa   : > { %v2803_v29 = vmul.f32 %v7400_v21, %v2802_v3  ;;  %v6524_v10 = vpop.eup %4089  ;;  %v2767_v38 = vsel %vm6519_vm11, %v6429_v49, %v2763_v35  ;;  %v2748_v8 = vadd.f32 %v6443_v53, %v2747_v11  ;;  %vm2749_vm9 = vweird.f32 %v6079_v40 }
 0x7ab   : > { %v2755_v28 = vand.u32 2147483648, %v6079_v40  ;;  %v2771_v19 = vor.u32 1.1754944e-38, %v2770_v59  ;;  %4093 = vrcp.f32 %v6516_v16  ;;  %v2788_v27 = vmul.f32 %v7403_v58, %v2787_v24  ;;  %vm6543_vm12 = vmor %vm2749_vm9, %vm2750_vm8 }
 0x7ac   : > { %vm2769_vm6 = vcmp.eq.f32.partialorder %v2768_v2, 8.507059e+37  ;;  %v2753_v25 = vand.u32 2147483647, %v6079_v40  ;;  %v2685_v18 = vmul.f32 %v6524_v10, %v6472_v48  ;;  %vm2735_vm13 = vweird.f32 %v6464_v13 }
 0x7ad   : > { %2880 = vmatpush.xpose.msra.mxu2 %v2863_v55  ;;  %v2700_v55 = vmul.f32 %v6509_v26, %v6169_v22  ;;  %v2772_v49 = vsel %vm2769_vm6, %v2771_v19, %v2767_v38  ;;  %v2717_v61 = vmul.f32 %v6490_v20, %v2716_v45  ;;  %v2752_v40 = vsel %vm6543_vm12, %v6443_v53, %v2748_v8 }
 0x7ae   : > { %v6553_v15 = vpop.eup %4091  ;;  %v2756_v12 = vor.u32 1.1754944e-38, %v2755_v28  ;;  %vm2734_vm3 = vweird.f32 %v6135_v60  ;;  %v2740_v43 = vand.u32 2147483648, %v6135_v60  ;;  %4095 = vrcp.f32 %v6539_v14 }
 0x7af   : > { %v2701_v47 = vsub.f32 1.0, %v2700_v55  ;;  %v2773_v46 = vmul.f32 %v7406_v62, %v2772_v49  ;;  %vm2754_vm14 = vcmp.eq.f32.partialorder %v2753_v25, 8.507059e+37  ;;  %vm6559_vm1 = vmor %vm2734_vm3, %vm2735_vm13  ;;  %v2738_v41 = vand.u32 2147483647, %v6135_v60 }
 0x7b0   : > { %v2686_v33 = vsub.f32 1.0, %v2685_v18  ;;  %v2757_v53 = vsel %vm2754_vm14, %v2756_v12, %v2752_v40  ;;  %v2670_v63 = vmul.f32 %v6553_v15, %v6347_v17  ;;  %v2718_v54 = vadd.f32 %v6490_v20, %v2717_v61  ;;  %v7415_v61 = vld [vmem:[#allocation39_spill] sm:$0xff] }
 0x7b1   : > { %2881 = vmatpush.xpose.msra.mxu2 %v2848_v1  ;;  %v2733_v1 = vadd.f32 %v6464_v13, %v2732_v0  ;;  %v6567_v51 = vpop.eup %4093  ;;  %v2702_v37 = vmul.f32 %v6509_v26, %v2701_v47  ;;  %vm2720_vm7 = vweird.f32 %v6490_v20  ;;  %v2741_v6 = vor.u32 1.1754944e-38, %v2740_v43 }
 0x7b2   : > { %v2725_v60 = vand.u32 2147483648, %v6147_v42  ;;  %vm2719_vm4 = vweird.f32 %v6147_v42  ;;  %v2758_v31 = vmul.f32 %v7409_v7, %v2757_v53  ;;  %vm2739_vm10 = vcmp.eq.f32.partialorder %v2738_v41, 8.507059e+37  ;;  %v7419_v7 = vld [vmem:[#allocation12_spill] sm:$0xff] }
 0x7b3   : > { %v2687_v32 = vmul.f32 %v6524_v10, %v2686_v33  ;;  %v2655_v36 = vmul.f32 %v6567_v51, %v6516_v16  ;;  %vm6581_vm15 = vmor %vm2719_vm4, %vm2720_vm7  ;;  %v2671_v11 = vsub.f32 1.0, %v2670_v63  ;;  %vm2705_vm5 = vweird.f32 %v6509_v26 }
 0x7b4   : > { %v6585_v9 = vpop.eup %4095  ;;  %v2722_v39 = vsel %vm6581_vm15, %v6490_v20, %v2718_v54  ;;  %v2710_v3 = vand.u32 2147483648, %v6169_v22  ;;  %v2726_v5 = vor.u32 1.1754944e-38, %v2725_v60  ;;  %vm2704_vm2 = vweird.f32 %v6169_v22  ;;  %v759_v54 = vpop.permute.xlu1 %758 }
 0x7b5   : > { %2882 = vmatpush.xpose.msra.mxu2 %v2833_v30  ;;  %v2737_v30 = vsel %vm6559_vm1, %v6464_v13, %v2733_v1  ;;  %v2723_v13 = vand.u32 2147483647, %v6147_v42  ;;  %v2703_v42 = vadd.f32 %v6509_v26, %v2702_v37  ;;  %v2708_v35 = vand.u32 2147483647, %v6169_v22  ;;  %vm2706_vm8 = vmor %vm2704_vm2, %vm2705_vm5  ;;  %v7413_v22 = vld [vmem:[#allocation26_spill] sm:$0xff] }
 0x7b6   : > { %v2742_v56 = vsel %vm2739_vm10, %v2741_v6, %v2737_v30  ;;  %v2640_v34 = vmul.f32 %v6585_v9, %v6539_v14  ;;  %v2656_v59 = vsub.f32 1.0, %v2655_v36  ;;  %v2672_v20 = vmul.f32 %v6553_v15, %v2671_v11  ;;  %v7418_v6 = vld [vmem:[#allocation55_spill] sm:$0xff]  ;;  %v2899_v36 = vld [vmem:[%s6999_s6] sm:$0xff]  ;;  %v2902_v11 = vld [vmem:[%s6999_s6 + $0x18] sm:$0xff] }
 0x7b7   : > { %v2743_v52 = vmul.f32 %v7412_v23, %v2742_v56  ;;  %vm2724_vm11 = vcmp.eq.f32.partialorder %v2723_v13, 8.507059e+37  ;;  %v2688_v2 = vadd.f32 %v6524_v10, %v2687_v32  ;;  %vm2690_vm9 = vweird.f32 %v6524_v10  ;;  %v7420_v32 = vld [vmem:[#allocation61_spill] sm:$0xff]  ;;  %v7421_v56 = vld [vmem:[#allocation47_spill] sm:$0xff] }
 0x7b8   : > { %v2727_v21 = vsel %vm2724_vm11, %v2726_v5, %v2722_v39  ;;  %v2711_v0 = vor.u32 1.1754944e-38, %v2710_v3  ;;  %v2695_v24 = vand.u32 2147483648, %v6472_v48  ;;  %vm2689_vm6 = vweird.f32 %v6472_v48  ;;  %v2925_v5 = vpop.permute.xlu0 %2924 }
 0x7b9   : > { %2883 = vmatpush.xpose.msra.mxu2 %v2818_v4  ;;  %v2728_v44 = vmul.f32 %v7413_v22, %v2727_v21  ;;  %vm2709_vm12 = vcmp.eq.f32.partialorder %v2708_v35, 8.507059e+37  ;;  %v2693_v55 = vand.u32 2147483647, %v6472_v48  ;;  %v2641_v45 = vsub.f32 1.0, %v2640_v34  ;;  %vm2691_vm13 = vmor %vm2689_vm6, %vm2690_vm9  ;;  %v2900_v4 = vld [vmem:[%s6999_s6 + $0x8] sm:$0xff]  ;;  %v2920_v35 = vpop.permute.xlu2 %2919  ;;  %v2972_v22 = vld [vmem:[%s7001_s8 + $0x20] sm:$0xff] }
 0x7ba   : > { %v2657_v8 = vmul.f32 %v6567_v51, %v2656_v59  ;;  %v2673_v28 = vadd.f32 %v6553_v15, %v2672_v20  ;;  %vm2675_vm3 = vweird.f32 %v6553_v15  ;;  %v2696_v19 = vor.u32 1.1754944e-38, %v2695_v24  ;;  %v2969_v24 = vld [vmem:[%s7001_s8 + $0x8] sm:$0xff] }
 0x7bb   : > { %v2680_v58 = vand.u32 2147483648, %v6347_v17  ;;  %vm2674_vm14 = vweird.f32 %v6347_v17  ;;  %vm2694_vm1 = vcmp.eq.f32.partialorder %v2693_v55, 8.507059e+37  ;;  %v2678_v48 = vand.u32 2147483647, %v6347_v17  ;;  %v2973_v55 = vld [vmem:[%s7001_s8 + $0x28] sm:$0xff] }
 0x7bc   : > { %vm2676_vm7 = vmor %vm2674_vm14, %vm2675_vm3  ;;  %v2642_v49 = vmul.f32 %v6585_v9, %v2641_v45  ;;  %v2658_v50 = vadd.f32 %v6567_v51, %v2657_v8  ;;  %vm2660_vm4 = vweird.f32 %v6567_v51  ;;  %v2665_v1 = vand.u32 2147483648, %v6516_v16  ;;  %v2910_v20 = vpop.permute.xlu1 %2909  ;;  %v2974_v45 = vld [vmem:[%s7001_s8 + $0x30] sm:$0xff] }
 0x7bd   : > { %2884 = vmatpush.xpose.msra.mxu2 %v2803_v29  ;;  %v2707_v29 = vsel %vm2706_vm8, %v6509_v26, %v2703_v42  ;;  %v2692_v26 = vsel %vm2691_vm13, %v6524_v10, %v2688_v2  ;;  %v2677_v10 = vsel %vm2676_vm7, %v6553_v15, %v2673_v28  ;;  %v2681_v47 = vor.u32 1.1754944e-38, %v2680_v58  ;;  %v2968_v2 = vld [vmem:[%s7001_s8] sm:$0xff]  ;;  %v7422_v58 = vld [vmem:[#allocation36_spill] sm:$0xff] }
 0x7be   : > { %v2712_v38 = vsel %vm2709_vm12, %v2711_v0, %v2707_v29  ;;  %v2697_v18 = vsel %vm2694_vm1, %v2696_v19, %v2692_v26  ;;  %vm2659_vm10 = vweird.f32 %v6516_v16  ;;  %vm2679_vm15 = vcmp.eq.f32.partialorder %v2678_v48, 8.507059e+37  ;;  %v2971_v0 = vld [vmem:[%s7001_s8 + $0x18] sm:$0xff] }
 0x7bf   : > { %v2698_v40 = vmul.f32 %v7415_v61, %v2697_v18  ;;  %v2663_v17 = vand.u32 2147483647, %v6516_v16  ;;  %v2682_v12 = vsel %vm2679_vm15, %v2681_v47, %v2677_v10  ;;  %vm2661_vm5 = vmor %vm2659_vm10, %vm2660_vm4  ;;  %v2643_v15 = vadd.f32 %v6585_v9, %v2642_v49  ;;  %v7424_v10 = vld [vmem:[#allocation5_spill] sm:$0xff] }
 0x7c0   : > { %v2662_v43 = vsel %vm2661_vm5, %v6567_v51, %v2658_v50  ;;  %vm2645_vm2 = vweird.f32 %v6585_v9  ;;  %v2650_v62 = vand.u32 2147483648, %v6539_v14  ;;  %vm2644_vm11 = vweird.f32 %v6539_v14  ;;  %v7417_v51 = vld [vmem:[#allocation20_spill] sm:$0xff]  ;;  %v2915_v59 = vpop.permute.xlu0 %2914 }
 0x7c1   : > { %2885 = vmatpush.xpose.msra.mxu2 %v2788_v27  ;;  %v7414_v27 = vld [vmem:[#allocation64_spill] sm:$0xff]  ;;  %v2683_v41 = vmul.f32 %v7416_v57, %v2682_v12  ;;  %vm2664_vm8 = vcmp.eq.f32.partialorder %v2663_v17, 8.507059e+37  ;;  %v2648_v33 = vand.u32 2147483647, %v6539_v14  ;;  %vm2646_vm9 = vmor %vm2644_vm11, %vm2645_vm2  ;;  %v3060_v8 = vpop.permute.xlu2 %3059  ;;  %v4142_v49 = vmov 0.0  }
 0x7c2   : > { %v2713_v25 = vmul.f32 %v7414_v27, %v2712_v38  ;;  %v2647_v53 = vsel %vm2646_vm9, %v6585_v9, %v2643_v15  ;;  %v2651_v30 = vor.u32 1.1754944e-38, %v2650_v62  ;;  %v2901_v9 = vld [vmem:[%s6999_s6 + $0x10] sm:$0xff]  ;;  %v2975_v38 = vld [vmem:[%s7001_s8 + $0x38] sm:$0xff]  ;;  %vm7425_vm12 = vcmp.lt.s32.totalorder %v7424_v10, 16 }
 0x7c3   : > { %vm2649_vm6 = vcmp.eq.f32.partialorder %v2648_v33, 8.507059e+37  ;;  %v6689_v50 = vsel %vm7425_vm12, 1.0, %v4142_v49  ;;  %v7426_v15 = vld [vmem:[#allocation68_spill] sm:$0xff] }
 0x7c4   : > { %v2652_v63 = vsel %vm2649_vm6, %v2651_v30, %v2647_v53  ;;  %v3070_v17 = vpop.permute.xlu1 %3069 }
 0x7c5   : > { %2886 = vmatpush.xpose.msra.mxu2 %v2773_v46  ;;  %v2666_v46 = vor.u32 1.1754944e-38, %v2665_v1  ;;  %v2653_v60 = vmul.f32 %v7418_v6, %v2652_v63  ;;  %v7428_v63 = vld [vmem:[#allocation27_spill] sm:$0xff]  ;;  %v7429_v6 = vld [vmem:[#allocation57_spill] sm:$0xff] }
 0x7c7   : > { %v2667_v16 = vsel %vm2664_vm8, %v2666_v46, %v2662_v43  ;;  %v7427_v46 = vld [vmem:[#allocation66_spill] sm:$0xff] }
 0x7c8   : > { %v2668_v37 = vmul.f32 %v7417_v51, %v2667_v16  ;;  %v3065_v26 = vpop.permute.xlu0 %3064 }
 0x7c9   : > { %2887 = vmatpush.xpose.msra.mxu2 %v2758_v31  ;;  %v824_v31 = vadd.f32 %v7419_v7, %v759_v54  ;;  %v3075_v18 = vpop.permute.xlu2 %3074 }
 0x7cc   : > { %v3085_v7 = vpop.permute.xlu1 %3084 }
 0x7cd   : > { %2888 = vmatpush.xpose.msra.mxu2 %v2743_v52 }
 0x7d1   : > { %2889 = vmatpush.xpose.msra.mxu2 %v2728_v44  ;;  %v2970_v44 = vld [vmem:[%s7001_s8 + $0x10] sm:$0xff] }
 0x7d5   : > { %2890 = vmatpush.xpose.msra.mxu2 %v2713_v25  ;;  %v7423_v25 = vld [vmem:[#allocation40_spill] sm:$0xff] }
 0x7d9   : > { %2891 = vmatpush.xpose.msra.mxu2 %v2698_v40 }
 0x7dd   : > { %2892 = vmatpush.xpose.msra.mxu2 %v2683_v41  ;;  %v3080_v41 = vpop.permute.xlu0 %3079 }
 0x7e1   : > { %2893 = vmatpush.xpose.msra.mxu2 %v2668_v37 }
 0x7e5   : > { %2894 = vmatpush.xpose.msra.mxu2 %v2653_v60 }
 0x7e8   : > { %2895 = vmatmul.f32.vlgmr.msra.gmra.mxu2 %v824_v31 }
 0x82b   : > { %v2379_v13 = vpop.f32.mrf.mxu2 }
 0x86b   : > { %v2896_v14 = vpop.f32.mrf.mxu2 }
 0x86c   : > { %2951 = vmatpush.msra.mxu1 %v2896_v14 }
 0x86e   : > { %2952 = vmatpush.msra.mxu1 %v2379_v13 }
 0x870   : > { %2953 = vmatpush.msra.mxu1 %v7420_v32 }
 0x872   : > { %2954 = vmatpush.msra.mxu1 %v7421_v56  ;;  %v7430_v56 = vld [vmem:[#allocation65_spill] sm:$0xff] }
 0x873   : > { %3764 = vmatmul.msk.f32.vlgmr.msra.gmra.mxu1 %vm587_vm0, %v2899_v36 }
 0x87b   : > { %3765 = vmatmul.msk.f32.gmra.mxu1 %vm587_vm0, %v2900_v4 }
 0x883   : > { %3766 = vmatmul.msk.f32.gmra.mxu1 %vm587_vm0, %v2901_v9  ;;  %v3090_v9 = vpop.permute.xlu2 %3089 }
 0x88b   : > { %3767 = vmatmul.msk.f32.gmra.mxu1 %vm587_vm0, %v2902_v11 }
 0x8f0   : > { %v2956_v39 = vpop.f32.mrf.mxu1 }
 0x8f1   : > { %v2957_v29 = vadd.f32 %v2956_v39, %v2910_v20 }
 0x8f8   : > { %v2959_v42 = vpop.f32.mrf.mxu1 }
 0x8f9   : > { %v2960_v21 = vadd.f32 %v2959_v42, %v2915_v59 }
 0x900   : > { %v2962_v3 = vpop.f32.mrf.mxu1 }
 0x901   : > { %v2963_v34 = vadd.f32 %v2962_v3, %v2920_v35  ;;  %v7431_v3 = vld [vmem:[#allocation67_spill] sm:$0xff] }
 0x908   : > { %v2965_v23 = vpop.f32.mrf.mxu1 }
 0x909   : > { %v2966_v52 = vadd.f32 %v2965_v23, %v2925_v5  ;;  %v3095_v23 = vpop.permute.xlu0 %3094 }
 0x90b   : > { %3012 = vmatpush.msrb.mxu2 %v2966_v52  ;;  %3790 = vmatpush.msra.mxu3 %v2966_v52 }
 0x90d   : > { %3013 = vmatpush.msrb.mxu2 %v2963_v34  ;;  %3791 = vmatpush.msra.mxu3 %v2963_v34 }
 0x90f   : > { %3014 = vmatpush.msrb.mxu2 %v2960_v21  ;;  %3792 = vmatpush.msra.mxu3 %v2960_v21 }
 0x911   : > { %3015 = vmatpush.msrb.mxu2 %v2957_v29  ;;  %3793 = vmatpush.msra.mxu3 %v2957_v29 }
 0x912   : > { %3768 = vmatmul.msk.f32.vlgmr.msrb.gmra.mxu2 %vm587_vm0, %v2968_v2  ;;  %3771 = vmatmul.msk.f32.vlgmr.msra.gmra.mxu3 %vm587_vm0, %v2971_v0 }
 0x91a   : > { %3769 = vmatmul.msk.f32.gmra.mxu2 %vm587_vm0, %v2969_v24  ;;  %3772 = vmatmul.msk.f32.gmra.mxu3 %vm587_vm0, %v2972_v22 }
 0x922   : > { %3770 = vmatmul.msk.f32.gmra.mxu2 %vm587_vm0, %v2970_v44  ;;  %3773 = vmatmul.msk.f32.gmra.mxu3 %vm587_vm0, %v2973_v55 }
 0x92a   : > { %3774 = vmatmul.msk.f32.gmra.mxu3 %vm587_vm0, %v2974_v45 }
 0x932   : > { %3775 = vmatmul.msk.f32.gmra.mxu3 %vm587_vm0, %v2975_v38 }
 0x995   : > { %v3017_v28 = vpop.f32.mrf.mxu2  ;;  %v3026_v19 = vpop.f32.mrf.mxu3 }
 0x996   : > { %v3041_v27 = vadd.f32 %v3017_v28, %v7422_v58  ;;  %v3044_v48 = vadd.f32 %v3026_v19, %v7423_v25 }
 0x998   : > { %v3097_v1 = vadd.f32 %v3060_v8, %v3041_v27  ;;  %v3100_v47 = vadd.f32 %v3075_v18, %v3044_v48 }
 0x99a   : > { %v3108_v61 = vmul.f32 %v6689_v50, %v3097_v1  ;;  %v3111_v40 = vmul.f32 %v6689_v50, %v3100_v47 }
 0x99c   : > { %3120 = vst [vmem:[%s6693_s26] sm:$0xff] %v3108_v61 }
 0x99d   : > { %3123 = vst [vmem:[%s6693_s26 + $0x30] sm:$0xff] %v3111_v40  ;;  %v3020_v12 = vpop.f32.mrf.mxu2  ;;  %v3029_v43 = vpop.f32.mrf.mxu3 }
 0x99e   : > { %v3042_v62 = vadd.f32 %v3020_v12, %v7426_v15  ;;  %v3045_v57 = vadd.f32 %v3029_v43, %v7427_v46 }
 0x9a0   : > { %v3098_v33 = vadd.f32 %v3065_v26, %v3042_v62  ;;  %v3101_v16 = vadd.f32 %v3080_v41, %v3045_v57 }
 0x9a2   : > { %v3109_v53 = vmul.f32 %v6689_v50, %v3098_v33  ;;  %v3112_v30 = vmul.f32 %v6689_v50, %v3101_v16 }
 0x9a4   : > { %3121 = vst [vmem:[%s6693_s26 + $0x10] sm:$0xff] %v3109_v53 }
 0x9a5   : > { %3124 = vst [vmem:[%s6693_s26 + $0x40] sm:$0xff] %v3112_v30  ;;  %v3023_v51 = vpop.f32.mrf.mxu2  ;;  %v3032_v37 = vpop.f32.mrf.mxu3 }
 0x9a6   : > { %v3043_v54 = vadd.f32 %v3023_v51, %v7428_v63  ;;  %v3046_v60 = vadd.f32 %v3032_v37, %v7429_v6 }
 0x9a8   : > { %v3099_v31 = vadd.f32 %v3070_v17, %v3043_v54  ;;  %v3102_v13 = vadd.f32 %v3085_v7, %v3046_v60 }
 0x9aa   : > { %v3110_v14 = vmul.f32 %v6689_v50, %v3099_v31  ;;  %v3113_v32 = vmul.f32 %v6689_v50, %v3102_v13 }
 0x9ac   : > { %3122 = vst [vmem:[%s6693_s26 + $0x20] sm:$0xff] %v3110_v14 }
 0x9ad   : > { %3125 = vst [vmem:[%s6693_s26 + $0x50] sm:$0xff] %v3113_v32  ;;  %v3035_v36 = vpop.f32.mrf.mxu3 }
 0x9ae   : > { %v3047_v4 = vadd.f32 %v3035_v36, %v7430_v56 }
 0x9b0   : > { %v3103_v11 = vadd.f32 %v3090_v9, %v3047_v4 }
 0x9b2   : > { %v3114_v39 = vmul.f32 %v6689_v50, %v3103_v11 }
 0x9b4   : > { %3126 = vst [vmem:[%s6693_s26 + $0x60] sm:$0xff] %v3114_v39 }
 0x9b5   : > { %v3038_v42 = vpop.f32.mrf.mxu3 }
 0x9b6   : > { %v3048_v5 = vadd.f32 %v3038_v42, %v7431_v3 }
 0x9b8   : > { %v3104_v52 = vadd.f32 %v3095_v23, %v3048_v5  ;;  %3131 = sbr.rel (%p3779_p8) target bundleno = 3062 (0xbf6), region = 156 }
 0x9ba   : > { %v3115_v35 = vmul.f32 %v6689_v50, %v3104_v52 }
 0x9bc   : > { %3127 = vst [vmem:[%s6693_s26 + $0x70] sm:$0xff] %v3115_v35 }
 0x9bd   : > { %v6736_v47 = vperm.slane %v6689_v50, 0  ;;  %v4143_v57 = vmov 0  }
 0x9be   : > { %4098 = vset.pattern.permute.xlu1 %v4143_v57  ;;  %4097 = vset.pattern.permute.xlu0 %v4143_v57 }
 0x9bf   : > { %4099 = vset.pattern.permute.xlu2 %v4143_v57 }
 0x9c3   : > { %v3146_v34 = vld [vmem:[#allocation2 + $0x70] sm:$0xff]  ;;  %v3147_v59 = vld [vmem:[#allocation2 + $0x78] sm:$0xff]  ;;  %v3144_v44 = vld [vmem:[#allocation2 + $0x60] sm:$0xff] }
 0x9c4   : > { %v3142_v21 = vld [vmem:[#allocation2 + $0x50] sm:$0xff]  ;;  %v3169_v20 = vadd.f32 %v3147_v59, %v3146_v34  ;;  %v3143_v29 = vld [vmem:[#allocation2 + $0x58] sm:$0xff]  ;;  %v3145_v55 = vld [vmem:[#allocation2 + $0x68] sm:$0xff] }
 0x9c5   : > { %v6717_v2 = vld [vmem:[#allocation2 + $0x30] sm:$0xff]  ;;  %v6719_v0 = vld [vmem:[#allocation2 + $0x38] sm:$0xff]  ;;  %v3163_v24 = vadd.f32 %v3143_v29, %v3142_v21  ;;  %v3140_v45 = vld [vmem:[#allocation2 + $0x40] sm:$0xff]  ;;  %v3166_v28 = vadd.f32 %v3145_v55, %v3144_v44 }
 0x9c6   : > { %v3157_v22 = vadd.f32 %v6719_v0, %v6717_v2  ;;  %3170 = vadd.xlane.f32.xlu0 %v3169_v20  ;;  %v3141_v38 = vld [vmem:[#allocation2 + $0x48] sm:$0xff]  ;;  %v3136_v8 = vld [vmem:[#allocation2 + $0x20] sm:$0xff]  ;;  %v6723_v27 = vld [vmem:[#allocation2 + $0x10] sm:$0xff] }
 0x9c7   : > { %3164 = vadd.xlane.f32.xlu1 %v3163_v24  ;;  %v3137_v26 = vld [vmem:[#allocation2 + $0x28] sm:$0xff]  ;;  %v3160_v19 = vadd.f32 %v3141_v38, %v3140_v45  ;;  %v6725_v25 = vld [vmem:[#allocation2 + $0x18] sm:$0xff]  ;;  %v6727_v48 = vld [vmem:[#allocation2] sm:$0xff] }
 0x9c8   : > { %3158 = vadd.xlane.f32.xlu2 %v3157_v22  ;;  %v3154_v58 = vadd.f32 %v3137_v26, %v3136_v8  ;;  %v6729_v18 = vld [vmem:[#allocation2 + $0x8] sm:$0xff]  ;;  %v3151_v49 = vadd.f32 %v6725_v25, %v6723_v27 }
 0x9c9   : > { %v3148_v10 = vadd.f32 %v6729_v18, %v6727_v48 }
 0x9ce   : > { %3167 = vadd.xlane.f32.xlu0 %v3166_v28 }
 0x9cf   : > { %3161 = vadd.xlane.f32.xlu1 %v3160_v19 }
 0x9d0   : > { %3155 = vadd.xlane.f32.xlu2 %v3154_v58 }
 0x9d6   : > { %3152 = vadd.xlane.f32.xlu0 %v3151_v49 }
 0x9d7   : > { %3149 = vadd.xlane.f32.xlu1 %v3148_v10 }
 0xa39   : > { %v3171_v1 = vpop.xlane.xlu0 %3170 }
 0xa3a   : > { %v3179_v61 = vmul.f32 0.03125, %v3171_v1  ;;  %v3165_v40 = vpop.xlane.xlu1 %3164 }
 0xa3b   : > { %v3159_v17 = vpop.xlane.xlu2 %3158  ;;  %v3177_v12 = vmul.f32 0.03125, %v3165_v40 }
 0xa3c   : > { %v3194_v43 = vsub.f32 %v3146_v34, %v3179_v61  ;;  %v3195_v15 = vsub.f32 %v3147_v59, %v3179_v61  ;;  %v3175_v54 = vmul.f32 0.03125, %v3159_v17 }
 0xa3d   : > { %v3190_v62 = vsub.f32 %v3142_v21, %v3177_v12  ;;  %v3191_v46 = vsub.f32 %v3143_v29, %v3177_v12 }
 0xa3e   : > { %v6739_v41 = vmul.f32 %v6736_v47, %v3194_v43  ;;  %v6742_v33 = vmul.f32 %v6736_v47, %v3195_v15  ;;  %v3186_v42 = vsub.f32 %v6717_v2, %v3175_v54  ;;  %v3187_v3 = vsub.f32 %v6719_v0, %v3175_v54 }
 0xa3f   : > { %v6745_v50 = vmul.f32 %v6736_v47, %v3190_v62  ;;  %v6748_v16 = vmul.f32 %v6736_v47, %v3191_v46 }
 0xa40   : > { %v3227_v53 = vmul.f32 %v6739_v41, %v6739_v41  ;;  %v3228_v30 = vmul.f32 %v6742_v33, %v6742_v33 }
 0xa41   : > { %v3168_v51 = vpop.xlane.xlu0 %3167  ;;  %v3223_v37 = vmul.f32 %v6745_v50, %v6745_v50  ;;  %v3224_v63 = vmul.f32 %v6748_v16, %v6748_v16 }
 0xa42   : > { %v3178_v6 = vmul.f32 0.03125, %v3168_v51  ;;  %v3162_v60 = vpop.xlane.xlu1 %3161  ;;  %v3250_v31 = vadd.f32 %v3228_v30, %v3227_v53  ;;  %v3435_v53 = vld [vmem:[%s7004_s11 + $0x30] sm:$0xff]  ;;  %v3433_v30 = vld [vmem:[%s7004_s11 + $0x20] sm:$0xff]  ;;  %v3436_v51 = vld [vmem:[%s7004_s11 + $0x38] sm:$0xff] }
 0xa43   : > { %v3156_v7 = vpop.xlane.xlu2 %3155  ;;  %v3176_v13 = vmul.f32 0.03125, %v3162_v60  ;;  %v3244_v32 = vadd.f32 %v3224_v63, %v3223_v37  ;;  %v3432_v37 = vld [vmem:[%s7004_s11 + $0x18] sm:$0xff]  ;;  %v3431_v63 = vld [vmem:[%s7004_s11 + $0x10] sm:$0xff] }
 0xa44   : > { %v3174_v14 = vmul.f32 0.03125, %v3156_v7  ;;  %v3192_v36 = vsub.f32 %v3144_v44, %v3178_v6  ;;  %v3193_v56 = vsub.f32 %v3145_v55, %v3178_v6  ;;  %3251 = vadd.xlane.f32.xlu2 %v3250_v31  ;;  %v6791_v44 = vmul.f32 %v6736_v47, %v3186_v42 }
 0xa45   : > { %v3188_v4 = vsub.f32 %v3140_v45, %v3176_v13  ;;  %v3189_v9 = vsub.f32 %v3141_v38, %v3176_v13  ;;  %3245 = vadd.xlane.f32.xlu1 %v3244_v32  ;;  %v6794_v55 = vmul.f32 %v6736_v47, %v3187_v3 }
 0xa46   : > { %v3184_v11 = vsub.f32 %v3136_v8, %v3174_v14  ;;  %v3185_v39 = vsub.f32 %v3137_v26, %v3174_v14  ;;  %v6761_v5 = vmul.f32 %v6736_v47, %v3192_v36  ;;  %v6764_v23 = vmul.f32 %v6736_v47, %v3193_v56 }
 0xa47   : > { %v6767_v52 = vmul.f32 %v6736_v47, %v3188_v4  ;;  %v6770_v35 = vmul.f32 %v6736_v47, %v3189_v9  ;;  %v3219_v17 = vmul.f32 %v6791_v44, %v6791_v44 }
 0xa48   : > { %v6773_v34 = vmul.f32 %v6736_v47, %v3184_v11  ;;  %v6776_v59 = vmul.f32 %v6736_v47, %v3185_v39  ;;  %v3225_v21 = vmul.f32 %v6761_v5, %v6761_v5  ;;  %v3226_v20 = vmul.f32 %v6764_v23, %v6764_v23 }
 0xa49   : > { %v3153_v29 = vpop.xlane.xlu0 %3152  ;;  %v3221_v2 = vmul.f32 %v6767_v52, %v6767_v52  ;;  %v3222_v0 = vmul.f32 %v6770_v35, %v6770_v35 }
 0xa4a   : > { %v3217_v24 = vmul.f32 %v6773_v34, %v6773_v34  ;;  %v3218_v22 = vmul.f32 %v6776_v59, %v6776_v59  ;;  %v3173_v45 = vmul.f32 0.03125, %v3153_v29  ;;  %v3247_v38 = vadd.f32 %v3226_v20, %v3225_v21  ;;  %v3150_v8 = vpop.xlane.xlu1 %3149 }
 0xa4b   : > { %v3241_v26 = vadd.f32 %v3222_v0, %v3221_v2  ;;  %v3172_v19 = vmul.f32 0.03125, %v3150_v8 }
 0xa4c   : > { %v3235_v28 = vadd.f32 %v3218_v22, %v3217_v24  ;;  %v3182_v58 = vsub.f32 %v6723_v27, %v3173_v45  ;;  %v3183_v49 = vsub.f32 %v6725_v25, %v3173_v45  ;;  %3248 = vadd.xlane.f32.xlu0 %v3247_v38  ;;  %v3220_v27 = vmul.f32 %v6794_v55, %v6794_v55 }
 0xa4d   : > { %3242 = vadd.xlane.f32.xlu2 %v3241_v26  ;;  %v3180_v10 = vsub.f32 %v6727_v48, %v3172_v19  ;;  %v3181_v1 = vsub.f32 %v6729_v18, %v3172_v19 }
 0xa4e   : > { %3236 = vadd.xlane.f32.xlu1 %v3235_v28  ;;  %v6801_v61 = vmul.f32 %v6736_v47, %v3182_v58  ;;  %v6804_v40 = vmul.f32 %v6736_v47, %v3183_v49  ;;  %v3238_v43 = vadd.f32 %v3220_v27, %v3219_v17 }
 0xa4f   : > { %v6815_v18 = vmul.f32 %v6736_v47, %v3180_v10  ;;  %v6818_v12 = vmul.f32 %v6736_v47, %v3181_v1  ;;  %v3434_v47 = vld [vmem:[%s7004_s11 + $0x28] sm:$0xff] }
 0xa50   : > { %v3215_v25 = vmul.f32 %v6801_v61, %v6801_v61  ;;  %v3216_v48 = vmul.f32 %v6804_v40, %v6804_v40 }
 0xa51   : > { %v3213_v62 = vmul.f32 %v6815_v18, %v6815_v18  ;;  %v3214_v46 = vmul.f32 %v6818_v12, %v6818_v12 }
 0xa52   : > { %v3232_v15 = vadd.f32 %v3216_v48, %v3215_v25 }
 0xa53   : > { %v3229_v57 = vadd.f32 %v3214_v46, %v3213_v62 }
 0xa54   : > { %3239 = vadd.xlane.f32.xlu0 %v3238_v43 }
 0xa55   : > { %3233 = vadd.xlane.f32.xlu2 %v3232_v15 }
 0xa5c   : > { %3230 = vadd.xlane.f32.xlu0 %v3229_v57  ;;  %v3276_v57 = vld [vmem:[%s7003_s10 + $0x38] sm:$0xff] }
 0xa67   : > { %3469 = vperm.xlu1 %4098, %v3435_v53  }
 0xa6d   : > { %3454 = vperm.xlu2 %4099, %v3432_v37  }
 0xa6f   : > { %3464 = vperm.xlu1 %4098, %v3434_v47  }
 0xa70   : > { %3474 = vperm.xlu0 %4097, %v3436_v51  }
 0xa77   : > { %3459 = vperm.xlu1 %4098, %v3433_v30  }
 0xa78   : > { %3449 = vperm.xlu0 %4097, %v3431_v63  }
 0xab7   : > { %v3252_v54 = vpop.xlane.xlu2 %3251 }
 0xab8   : > { %v3260_v6 = vmul.f32 0.03125, %v3252_v54  ;;  %v3246_v60 = vpop.xlane.xlu1 %3245 }
 0xab9   : > { %v3258_v7 = vmul.f32 0.03125, %v3246_v60 }
 0xaba   : > { %v3268_v31 = vmax.f32 %v3260_v6, 0.0 }
 0xabb   : > { %v3266_v13 = vmax.f32 %v3258_v7, 0.0 }
 0xabc   : > { %v3284_v14 = vadd.f32 1e-05, %v3268_v31 }
 0xabd   : > { %v6842_v32 = vadd.f32 1e-05, %v3266_v13 }
 0xabe   : > { %4100 = vrsqrt.f32 %v3284_v14  ;;  %vm3361_vm13 = vweird.f32 %v3284_v14 }
 0xabf   : > { %4102 = vrsqrt.f32 %v6842_v32  ;;  %v3249_v36 = vpop.xlane.xlu0 %3248  ;;  %vm3341_vm2 = vweird.f32 %v6842_v32 }
 0xac0   : > { %v3243_v56 = vpop.xlane.xlu2 %3242  ;;  %v3259_v4 = vmul.f32 0.03125, %v3249_v36 }
 0xac1   : > { %v3237_v9 = vpop.xlane.xlu1 %3236  ;;  %v3257_v11 = vmul.f32 0.03125, %v3243_v56 }
 0xac2   : > { %v3255_v39 = vmul.f32 0.03125, %v3237_v9  ;;  %v3267_v42 = vmax.f32 %v3259_v4, 0.0 }
 0xac3   : > { %v3265_v3 = vmax.f32 %v3257_v11, 0.0 }
 0xac4   : > { %v3263_v21 = vmax.f32 %v3255_v39, 0.0  ;;  %v4101_v20 = vpop.eup %4100  ;;  %v3283_v29 = vadd.f32 1e-05, %v3267_v42  ;;  %v3275_v39 = vld [vmem:[%s7003_s10 + $0x30] sm:$0xff] }
 0xac5   : > { %v6845_v2 = vpop.eup %4102  ;;  %v3356_v0 = vmul.f32 %v4101_v20, %v3284_v14  ;;  %v6847_v24 = vadd.f32 1e-05, %v3265_v3  ;;  %vm3362_vm0 = vweird.f32 %v4101_v20 }
 0xac6   : > { %v3279_v22 = vadd.f32 1e-05, %v3263_v21  ;;  %4104 = vrsqrt.f32 %v3283_v29  ;;  %v3336_v8 = vmul.f32 %v6845_v2, %v6842_v32  ;;  %vm3363_vm3 = vmor %vm3361_vm13, %vm3362_vm0  ;;  %vm3351_vm1 = vweird.f32 %v3283_v29  ;;  %v3270_v32 = vld [vmem:[%s7003_s10 + $0x8] sm:$0xff] }
 0xac7   : > { %v3357_v45 = vmul.f32 %v4101_v20, %v3356_v0  ;;  %4106 = vrsqrt.f32 %v6847_v24  ;;  %v3240_v38 = vpop.xlane.xlu0 %3239  ;;  %vm3342_vm15 = vweird.f32 %v6845_v2  ;;  %vm3331_vm0 = vweird.f32 %v6847_v24 }
 0xac8   : > { %4108 = vrsqrt.f32 %v3279_v22  ;;  %v3234_v26 = vpop.xlane.xlu2 %3233  ;;  %v3256_v28 = vmul.f32 0.03125, %v3240_v38  ;;  %v3337_v27 = vmul.f32 %v6845_v2, %v3336_v8  ;;  %vm3311_vm7 = vweird.f32 %v3279_v22  ;;  %vm3343_vm11 = vmor %vm3341_vm2, %vm3342_vm15 }
 0xac9   : > { %v3358_v19 = vmul.f32 0.5, %v3357_v45  ;;  %v3254_v58 = vmul.f32 0.03125, %v3234_v26  ;;  %vm3537_vm15 = vcmask 523264  }
 0xaca   : > { %v3264_v49 = vmax.f32 %v3256_v28, 0.0  ;;  %v3338_v51 = vmul.f32 0.5, %v3337_v27 }
 0xacb   : > { %v3359_v10 = vsub.f32 1.5, %v3358_v19  ;;  %v3262_v1 = vmax.f32 %v3254_v58, 0.0 }
 0xacc   : > { %v4105_v17 = vpop.eup %4104  ;;  %v6853_v25 = vadd.f32 1e-05, %v3264_v49  ;;  %v3339_v36 = vsub.f32 1.5, %v3338_v51 }
 0xacd   : > { %v6855_v48 = vpop.eup %4106  ;;  %v3346_v43 = vmul.f32 %v4105_v17, %v3283_v29  ;;  %v6857_v15 = vadd.f32 1e-05, %v3262_v1  ;;  %v3360_v62 = vmul.f32 %v4101_v20, %v3359_v10  ;;  %vm3352_vm14 = vweird.f32 %v4105_v17  ;;  %v3271_v29 = vld [vmem:[%s7003_s10 + $0x10] sm:$0xff] }
 0xace   : > { %v4109_v46 = vpop.eup %4108  ;;  %v3326_v54 = vmul.f32 %v6855_v48, %v6847_v24  ;;  %vm3353_vm10 = vmor %vm3351_vm1, %vm3352_vm14  ;;  %v3340_v19 = vmul.f32 %v6845_v2, %v3339_v36  ;;  %vm3332_vm12 = vweird.f32 %v6855_v48  ;;  %v3515_v24 = vld [vmem:[%s7006_s13 + $0x10] sm:$0xff]  ;;  %vm3321_vm14 = vweird.f32 %v6853_v25  ;;  %v3514_v36 = vld [vmem:[%s7006_s13 + $0x8] sm:$0xff] }
 0xacf   : > { %v3347_v53 = vmul.f32 %v4105_v17, %v3346_v43  ;;  %v3306_v47 = vmul.f32 %v4109_v46, %v3279_v22  ;;  %4110 = vrsqrt.f32 %v6857_v15  ;;  %v3231_v30 = vpop.xlane.xlu0 %3230  ;;  %v3364_v37 = vsel %vm3363_vm3, %v4101_v20, %v3360_v62  ;;  %vm3333_vm13 = vmor %vm3331_vm0, %vm3332_vm12 }
 0xad0   : > { %4112 = vrsqrt.f32 %v6853_v25  ;;  %v3253_v63 = vmul.f32 0.03125, %v3231_v30  ;;  %v3372_v7 = vmul.f32 %v3364_v37, %v3276_v57  ;;  %v3327_v9 = vmul.f32 %v6855_v48, %v3326_v54 }
 0xad1   : > { %v3348_v6 = vmul.f32 0.5, %v3347_v53  ;;  %v3307_v60 = vmul.f32 %v4109_v46, %v3306_v47  ;;  %vm3312_vm4 = vweird.f32 %v4109_v46  ;;  %v3344_v27 = vsel %vm3343_vm11, %v6845_v2, %v3340_v19  ;;  %v3429_v2 = vld [vmem:[%s7004_s11] sm:$0xff] }
 0xad2   : > { %v3261_v31 = vmax.f32 %v3253_v63, 0.0  ;;  %3410 = vperm.xlu1 %4098, %v3372_v7   ;;  %vm3313_vm5 = vmor %vm3311_vm7, %vm3312_vm4  ;;  %v3328_v8 = vmul.f32 0.5, %v3327_v9  ;;  %vm3301_vm9 = vweird.f32 %v6857_v15  ;;  %v3273_v63 = vld [vmem:[%s7003_s10 + $0x20] sm:$0xff] }
 0xad3   : > { %v3349_v13 = vsub.f32 1.5, %v3348_v6  ;;  %v3308_v14 = vmul.f32 0.5, %v3307_v60  ;;  %v3430_v6 = vld [vmem:[%s7004_s11 + $0x8] sm:$0xff] }
 0xad4   : > { %v6866_v56 = vadd.f32 1e-05, %v3261_v31  ;;  %v3329_v22 = vsub.f32 1.5, %v3328_v8 }
 0xad5   : > { %v4111_v4 = vpop.eup %4110  ;;  %v3309_v11 = vsub.f32 1.5, %v3308_v14  ;;  %v3350_v42 = vmul.f32 %v4105_v17, %v3349_v13  ;;  %v3272_v13 = vld [vmem:[%s7003_s10 + $0x18] sm:$0xff] }
 0xad6   : > { %v6872_v3 = vpop.eup %4112  ;;  %v3296_v21 = vmul.f32 %v4111_v4, %v6857_v15  ;;  %4114 = vrsqrt.f32 %v6866_v56  ;;  %vm3302_vm8 = vweird.f32 %v4111_v4  ;;  %v3330_v15 = vmul.f32 %v6855_v48, %v3329_v22 }
 0xad7   : > { %v3354_v20 = vsel %vm3353_vm10, %v4105_v17, %v3350_v42  ;;  %v3310_v0 = vmul.f32 %v4109_v46, %v3309_v11  ;;  %v3316_v26 = vmul.f32 %v6872_v3, %v6853_v25  ;;  %v3274_v17 = vld [vmem:[%s7003_s10 + $0x28] sm:$0xff]  ;;  %vm3303_vm6 = vmor %vm3301_vm9, %vm3302_vm8  ;;  %vm3322_vm3 = vweird.f32 %v6872_v3  ;;  %v3269_v25 = vld [vmem:[%s7003_s10] sm:$0xff] }
 0xad8   : > { %v3297_v45 = vmul.f32 %v4111_v4, %v3296_v21  ;;  %v3371_v38 = vmul.f32 %v3354_v20, %v3275_v39  ;;  %v3370_v57 = vmul.f32 %v3344_v27, %v3274_v17  ;;  %v3334_v54 = vsel %vm3333_vm13, %v6855_v48, %v3330_v15  ;;  %vm3323_vm1 = vmor %vm3321_vm14, %vm3322_vm3  ;;  %v3516_v42 = vld [vmem:[%s7006_s13 + $0x18] sm:$0xff]  ;;  %v3455_v21 = vpop.permute.xlu2 %3454 }
 0xad9   : > { %v3314_v28 = vsel %vm3313_vm5, %v4109_v46, %v3310_v0  ;;  %v3317_v1 = vmul.f32 %v6872_v3, %v3316_v26  ;;  %v3369_v60 = vmul.f32 %v3334_v54, %v3273_v63  ;;  %vm3291_vm7 = vweird.f32 %v6866_v56 }
 0xada   : > { %v3298_v58 = vmul.f32 0.5, %v3297_v45  ;;  %3405 = vperm.xlu2 %4099, %v3371_v38   ;;  %v3367_v49 = vmul.f32 %v3314_v28, %v3271_v29 }
 0xadb   : > { %v3318_v53 = vmul.f32 0.5, %v3317_v1 }
 0xadc   : > { %v3299_v10 = vsub.f32 1.5, %v3298_v58  ;;  %3385 = vperm.xlu0 %4097, %v3367_v49   ;;  %v4115_v43 = vpop.eup %4114 }
 0xadd   : > { %v3286_v47 = vmul.f32 %v4115_v43, %v6866_v56  ;;  %v3319_v51 = vsub.f32 1.5, %v3318_v53  ;;  %vm3292_vm4 = vweird.f32 %v4115_v43  ;;  %v3513_v56 = vld [vmem:[%s7006_s13] sm:$0xff] }
 0xade   : > { %v3300_v62 = vmul.f32 %v4111_v4, %v3299_v10  ;;  %vm3293_vm10 = vmor %vm3291_vm7, %vm3292_vm4 }
 0xadf   : > { %v3287_v37 = vmul.f32 %v4115_v43, %v3286_v47  ;;  %v3320_v31 = vmul.f32 %v6872_v3, %v3319_v51 }
 0xae0   : > { %v3304_v46 = vsel %vm3303_vm6, %v4111_v4, %v3300_v62 }
 0xae1   : > { %v3366_v30 = vmul.f32 %v3304_v46, %v3270_v32  ;;  %v3288_v7 = vmul.f32 0.5, %v3287_v37  ;;  %v3324_v14 = vsel %vm3323_vm1, %v6872_v3, %v3320_v31  ;;  %v3470_v3 = vpop.permute.xlu1 %3469 }
 0xae2   : > { %3400 = vperm.xlu2 %4099, %v3370_v57   ;;  %v3368_v4 = vmul.f32 %v3324_v14, %v3272_v13  ;;  %v3475_v0 = vpop.permute.xlu0 %3474 }
 0xae3   : > { %3380 = vperm.xlu1 %4098, %v3366_v30   ;;  %v3289_v48 = vsub.f32 1.5, %v3288_v7 }
 0xae4   : > { %3439 = vperm.xlu0 %4097, %v3429_v2  }
 0xae5   : > { %v3290_v9 = vmul.f32 %v4115_v43, %v3289_v48 }
 0xae7   : > { %v3294_v11 = vsel %vm3293_vm10, %v4115_v43, %v3290_v9 }
 0xae8   : > { %v3365_v39 = vmul.f32 %v3294_v11, %v3269_v25 }
 0xae9   : > { %v3465_v20 = vpop.permute.xlu1 %3464 }
 0xaea   : > { %3395 = vperm.xlu2 %4099, %v3369_v60   ;;  %v3450_v26 = vpop.permute.xlu0 %3449 }
 0xaeb   : > { %3444 = vperm.xlu1 %4098, %v3430_v6  }
 0xaec   : > { %3529 = vperm.xlu0 %4097, %v3515_v24  }
 0xaf1   : > { %v3460_v38 = vpop.permute.xlu1 %3459 }
 0xaf2   : > { %3390 = vperm.xlu2 %4099, %v3368_v4  }
 0xaf3   : > { %3524 = vperm.xlu1 %4098, %v3514_v36  }
 0xafa   : > { %3375 = vperm.xlu2 %4099, %v3365_v39  }
 0xb02   : > { %3519 = vperm.xlu2 %4099, %v3513_v56  }
 0xb0a   : > { %3534 = vperm.xlu2 %4099, %v3516_v42  }
 0xb34   : > { %v3406_v29 = vpop.permute.xlu2 %3405 }
 0xb35   : > { %v3425_v8 = vmul.f32 %v3406_v29, %v6761_v5  ;;  %v3426_v19 = vmul.f32 %v3406_v29, %v6764_v23  ;;  %v3512_v29 = vld [vmem:[%s7005_s12 + $0x18] sm:$0xff] }
 0xb37   : > { %v3489_v32 = vadd.f32 %v3470_v3, %v3425_v8  ;;  %v3490_v62 = vadd.f32 %v3470_v3, %v3426_v19 }
 0xb3c   : > { %v3401_v45 = vpop.permute.xlu2 %3400 }
 0xb3d   : > { %v3423_v49 = vmul.f32 %v3401_v45, %v6745_v50  ;;  %v3424_v1 = vmul.f32 %v3401_v45, %v6748_v16 }
 0xb3f   : > { %v3487_v23 = vadd.f32 %v3465_v20, %v3423_v49  ;;  %v3488_v53 = vadd.f32 %v3465_v20, %v3424_v1 }
 0xb41   : > { %v3504_v37 = vmax.f32 %v3488_v53, 0.0 }
 0xb44   : > { %v3396_v28 = vpop.permute.xlu2 %3395  ;;  %v3411_v58 = vpop.permute.xlu1 %3410 }
 0xb45   : > { %v3427_v10 = vmul.f32 %v3411_v58, %v6739_v41  ;;  %v3428_v22 = vmul.f32 %v3411_v58, %v6742_v33  ;;  %v3421_v17 = vmul.f32 %v3396_v28, %v6767_v52  ;;  %v3422_v5 = vmul.f32 %v3396_v28, %v6770_v35 }
 0xb46   : > { %v3505_v41 = vmax.f32 %v3489_v32, 0.0  ;;  %v3506_v52 = vmax.f32 %v3490_v62, 0.0  ;;  %v3503_v35 = vmax.f32 %v3487_v23, 0.0 }
 0xb47   : > { %v3491_v27 = vadd.f32 %v3475_v0, %v3427_v10  ;;  %v3492_v43 = vadd.f32 %v3475_v0, %v3428_v22  ;;  %v3485_v47 = vadd.f32 %v3460_v38, %v3421_v17  ;;  %v3486_v30 = vadd.f32 %v3460_v38, %v3422_v5 }
 0xb49   : > { %v3507_v46 = vmax.f32 %v3491_v27, 0.0  ;;  %v3508_v57 = vmax.f32 %v3492_v43, 0.0  ;;  %v3501_v54 = vmax.f32 %v3485_v47, 0.0 }
 0xb4b   : > { %3558 = vmatpush.msra.mxu0 %v3507_v46  ;;  %3794 = vmatpush.msra.mxu2 %v3507_v46 }
 0xb4c   : > { %v3391_v50 = vpop.permute.xlu2 %3390  ;;  %3587 = vmatpush.msra.mxu1 %v3508_v57  ;;  %3802 = vmatpush.msra.mxu3 %v3508_v57 }
 0xb4d   : > { %v3419_v33 = vmul.f32 %v3391_v50, %v6791_v44  ;;  %v3420_v16 = vmul.f32 %v3391_v50, %v6794_v55  ;;  %3559 = vmatpush.msra.mxu0 %v3505_v41  ;;  %3795 = vmatpush.msra.mxu2 %v3505_v41  ;;  %v3502_v55 = vmax.f32 %v3486_v30, 0.0 }
 0xb4e   : > { %v3386_v2 = vpop.permute.xlu0 %3385  ;;  %3588 = vmatpush.msra.mxu1 %v3506_v52  ;;  %3803 = vmatpush.msra.mxu3 %v3506_v52 }
 0xb4f   : > { %v3417_v15 = vmul.f32 %v3386_v2, %v6773_v34  ;;  %v3418_v51 = vmul.f32 %v3386_v2, %v6776_v59  ;;  %v3483_v63 = vadd.f32 %v3455_v21, %v3419_v33  ;;  %3560 = vmatpush.msra.mxu0 %v3503_v35  ;;  %3796 = vmatpush.msra.mxu2 %v3503_v35 }
 0xb50   : > { %v3484_v44 = vadd.f32 %v3455_v21, %v3420_v16  ;;  %3589 = vmatpush.msra.mxu1 %v3504_v37  ;;  %3804 = vmatpush.msra.mxu3 %v3504_v37 }
 0xb51   : > { %v3499_v6 = vmax.f32 %v3483_v63, 0.0  ;;  %v3481_v60 = vadd.f32 %v3450_v26, %v3417_v15  ;;  %v3482_v7 = vadd.f32 %v3450_v26, %v3418_v51  ;;  %3561 = vmatpush.msra.mxu0 %v3501_v54  ;;  %3797 = vmatpush.msra.mxu2 %v3501_v54 }
 0xb52   : > { %v3500_v24 = vmax.f32 %v3484_v44, 0.0  ;;  %3590 = vmatpush.msra.mxu1 %v3502_v55  ;;  %3805 = vmatpush.msra.mxu3 %v3502_v55 }
 0xb53   : > { %3562 = vmatpush.msra.mxu0 %v3499_v6  ;;  %3798 = vmatpush.msra.mxu2 %v3499_v6  ;;  %v3497_v34 = vmax.f32 %v3481_v60, 0.0  ;;  %v3498_v31 = vmax.f32 %v3482_v7, 0.0 }
 0xb54   : > { %3591 = vmatpush.msra.mxu1 %v3500_v24  ;;  %3806 = vmatpush.msra.mxu3 %v3500_v24  ;;  %v3376_v48 = vpop.permute.xlu2 %3375 }
 0xb55   : > { %v3381_v59 = vpop.permute.xlu1 %3380  ;;  %3563 = vmatpush.msra.mxu0 %v3497_v34  ;;  %3799 = vmatpush.msra.mxu2 %v3497_v34  ;;  %v3413_v13 = vmul.f32 %v3376_v48, %v6815_v18  ;;  %v3414_v14 = vmul.f32 %v3376_v48, %v6818_v12  ;;  %v3510_v12 = vld [vmem:[%s7005_s12 + $0x8] sm:$0xff] }
 0xb56   : > { %3592 = vmatpush.msra.mxu1 %v3498_v31  ;;  %3807 = vmatpush.msra.mxu3 %v3498_v31  ;;  %v3415_v36 = vmul.f32 %v3381_v59, %v6801_v61  ;;  %v3416_v4 = vmul.f32 %v3381_v59, %v6804_v40  ;;  %v3440_v9 = vpop.permute.xlu0 %3439  ;;  %v3509_v61 = vld [vmem:[%s7005_s12] sm:$0xff]  ;;  %v3511_v40 = vld [vmem:[%s7005_s12 + $0x10] sm:$0xff] }
 0xb57   : > { %v3477_v11 = vadd.f32 %v3440_v9, %v3413_v13  ;;  %v3478_v42 = vadd.f32 %v3440_v9, %v3414_v14 }
 0xb59   : > { %v3493_v20 = vmax.f32 %v3477_v11, 0.0  ;;  %v3494_v18 = vmax.f32 %v3478_v42, 0.0 }
 0xb5c   : > { %v3520_v0 = vpop.permute.xlu2 %3519 }
 0xb5d   : > { %v3445_v25 = vpop.permute.xlu1 %3444 }
 0xb5e   : > { %v3479_v39 = vadd.f32 %v3445_v25, %v3415_v36  ;;  %v3480_v56 = vadd.f32 %v3445_v25, %v3416_v4  ;;  %v3530_v28 = vpop.permute.xlu0 %3529 }
 0xb60   : > { %v3495_v3 = vmax.f32 %v3479_v39, 0.0  ;;  %v3496_v21 = vmax.f32 %v3480_v56, 0.0 }
 0xb62   : > { %3564 = vmatpush.msra.mxu0 %v3495_v3  ;;  %3800 = vmatpush.msra.mxu2 %v3495_v3 }
 0xb63   : > { %3593 = vmatpush.msra.mxu1 %v3496_v21  ;;  %3808 = vmatpush.msra.mxu3 %v3496_v21 }
 0xb64   : > { %3565 = vmatpush.msra.mxu0 %v3493_v20  ;;  %3801 = vmatpush.msra.mxu2 %v3493_v20  ;;  %v3535_v32 = vpop.permute.xlu2 %3534 }
 0xb65   : > { %3594 = vmatpush.msra.mxu1 %v3494_v18  ;;  %3809 = vmatpush.msra.mxu3 %v3494_v18  ;;  %v3525_v10 = vpop.permute.xlu1 %3524 }
 0xb66   : > { %3780 = vmatmul.msk.f32.vlgmr.msra.gmra.mxu0 %vm3537_vm15, %v3509_v61  ;;  %3782 = vmatmul.msk.f32.vlgmr.msra.gmra.mxu2 %vm3537_vm15, %v3511_v40 }
 0xb67   : > { %3784 = vmatmul.msk.f32.vlgmr.msra.gmra.mxu1 %vm3537_vm15, %v3509_v61  ;;  %3786 = vmatmul.msk.f32.vlgmr.msra.gmra.mxu3 %vm3537_vm15, %v3511_v40 }
 0xb6e   : > { %3781 = vmatmul.msk.f32.gmra.mxu0 %vm3537_vm15, %v3510_v12  ;;  %3783 = vmatmul.msk.f32.gmra.mxu2 %vm3537_vm15, %v3512_v29 }
 0xb6f   : > { %3785 = vmatmul.msk.f32.gmra.mxu1 %vm3537_vm15, %v3510_v12  ;;  %3787 = vmatmul.msk.f32.gmra.mxu3 %vm3537_vm15, %v3512_v29 }
 0xbe3   : > { %v3567_v45 = vpop.f32.mrf.mxu0 }
 0xbe4   : > { %v3568_v38 = vadd.f32 %v3567_v45, %v3520_v0  ;;  %v3596_v8 = vpop.f32.mrf.mxu1 }
 0xbe5   : > { %v3597_v26 = vadd.f32 %v3596_v8, %v3520_v0 }
 0xbe6   : > { %3608 = vst [vmem:[%s7007_s14] sm:$0xff] %v3568_v38 }
 0xbe7   : > { %3609 = vst [vmem:[%s7007_s14 + $0x8] sm:$0xff] %v3597_v26 }
 0xbe9   : > { %v3573_v19 = vpop.f32.mrf.mxu2 }
 0xbea   : > { %v3574_v58 = vadd.f32 %v3573_v19, %v3530_v28  ;;  %v3602_v49 = vpop.f32.mrf.mxu3 }
 0xbeb   : > { %v3603_v22 = vadd.f32 %v3602_v49, %v3530_v28  ;;  %v3570_v1 = vpop.f32.mrf.mxu0 }
 0xbec   : > { %3612 = vst [vmem:[%s7007_s14 + $0x20] sm:$0xff] %v3574_v58  ;;  %v3571_v17 = vadd.f32 %v3570_v1, %v3525_v10  ;;  %v3599_v27 = vpop.f32.mrf.mxu1 }
 0xbed   : > { %3613 = vst [vmem:[%s7007_s14 + $0x28] sm:$0xff] %v3603_v22  ;;  %v3600_v43 = vadd.f32 %v3599_v27, %v3525_v10 }
 0xbee   : > { %3610 = vst [vmem:[%s7007_s14 + $0x10] sm:$0xff] %v3571_v17 }
 0xbef   : > { %3611 = vst [vmem:[%s7007_s14 + $0x18] sm:$0xff] %v3600_v43 }
 0xbf1   : > { %v3576_v5 = vpop.f32.mrf.mxu2 }
 0xbf2   : > { %v3577_v62 = vadd.f32 %v3576_v5, %v3535_v32  ;;  %v3605_v46 = vpop.f32.mrf.mxu3 }
 0xbf3   : > { %v3606_v57 = vadd.f32 %v3605_v46, %v3535_v32 }
 0xbf4   : > { %3614 = vst [vmem:[%s7007_s14 + $0x30] sm:$0xff] %v3577_v62 }
 0xbf5   : > { %3615 = vst [vmem:[%s7007_s14 + $0x38] sm:$0xff] %v3606_v57 }
 0xbf6 PF: > { %p21_p9 = scmp.ge.s32.totalorder %s4236_s17, 4   ;;  %s7432_s29 = smov %s4134_s30 }
 0xbf7   : > { %s7433_s30 = smov %s4245_s20  ;;  %s7434_s15 = smov %s4236_s17 }
 0xbf8   :  { %23 = sbr.rel (!%p21_p9) target bundleno = 2 (0x2), region = 196 }

</bundles_post_ra>
